<compile_context>
chip_gen: v5e
topology: v5e:2x2
jax: 0.10.0
libtpu: 0.0.40
codegen_flags: <defaults>
</compile_context>

<pallas_src>
import functools

import jax
import jax.numpy as jnp
from jax import lax
from jax.experimental import pallas as pl
from jax.experimental.pallas import tpu as pltpu

EPS = 1e-5
LANE = 128
_ROW_TILE_CAP = 256           # pixel-rows per grid step for the 1x1 stages

_CPARAMS = pltpu.CompilerParams(
    dimension_semantics=("parallel",),      # tiles are independent (dual-TC on v7x)
    vmem_limit_bytes=32 * 1024 * 1024,      # explicit headroom, fits v5e..v7x
)


def _round_up(x, m):
    return (x + m - 1) // m * m


def _pick_row_tile(m, cap=_ROW_TILE_CAP):
    """Largest multiple-of-8 divisor of m that is <= cap (fallback: m)."""
    best = None
    t = 8
    while t <= min(cap, m):
        if m % t == 0:
            best = t
        t += 8
    return best if best is not None else m


def _pad_trailing(a, shape):
    pads = [(0, s - d) for d, s in zip(a.shape, shape)]
    return jnp.pad(a, pads)


# --------------------------------- kernels ----------------------------------

def _write_stats(st_ref, y):
    # st_ref block: (1, 2, C).  row 0 = per-channel sum, row 1 = sum of squares
    st_ref[0, 0:1, :] = jnp.sum(y, axis=0, keepdims=True)
    st_ref[0, 1:2, :] = jnp.sum(y * y, axis=0, keepdims=True)


def _matmul_stats_kernel(s_ref, t_ref, x_ref, w_ref, y_ref, st_ref, *, pre_affine):
    """(optional fused BN scale/bias + ReLU) -> 1x1 conv as matmul -> partial stats."""
    x = x_ref[...]
    if pre_affine:
        x = jnp.maximum(x * s_ref[...] + t_ref[...], 0.0)   # f32 elementwise
    y = jnp.dot(x.astype(jnp.bfloat16), w_ref[...],          # bf16 MXU, f32 acc
                preferred_element_type=jnp.float32)
    y_ref[...] = y
    _write_stats(st_ref, y)


def _conv3x3_kernel(s_ref, t_ref, y1_ref, w2_ref, y2_ref, st_ref, a_ref,
                    *, H, W, guard):
    """BN1 scale/bias + ReLU, then 3x3 conv (pad=1) for one image, + stats.

    The activation is written once into a row-guarded VMEM scratch (only the
    small zero guard is re-zeroed, not a full padded image).  Each of the 9
    taps is then a contiguous row-offset load of that scratch (no strided
    slice+reshape copies); W-boundary taps are masked with jnp.where.  Taps
    accumulate into the output block, which acts as the f32 VMEM accumulator.
    """
    HW, C = y1_ref.shape

    # zero guards (top/bottom) + BN1-apply+ReLU straight into the scratch
    a_ref[pl.ds(0, guard), :] = jnp.zeros((guard, C), jnp.float32)
    a_ref[pl.ds(guard + HW, guard), :] = jnp.zeros((guard, C), jnp.float32)
    a_ref[pl.ds(guard, HW), :] = jnp.maximum(
        y1_ref[...] * s_ref[...] + t_ref[...], 0.0)

    r = lax.broadcasted_iota(jnp.int32, (HW, 1), 0)
    ww = r % W                                            # pixel column index

    y2_ref[...] = jnp.zeros_like(y2_ref)                  # VMEM accumulator
    for di in range(3):
        for dj in range(3):
            oi, oj = di - 1, dj - 1
            tap = a_ref[pl.ds(guard + oi * W + oj, HW), :]
            if oj != 0:                                   # mask W wrap-around
                valid = (ww + oj >= 0) & (ww + oj < W)
                tap = jnp.where(valid, tap, 0.0)
            y2_ref[...] += jnp.dot(tap.astype(jnp.bfloat16), w2_ref[di, dj],
                                   preferred_element_type=jnp.float32)
    _write_stats(st_ref, y2_ref[...])


def _residual_kernel(s_ref, t_ref, y_ref, x_ref, o_ref):
    """BN3 scale/bias + identity residual add + final ReLU (x re-read per tile)."""
    o_ref[...] = jnp.maximum(y_ref[...] * s_ref[...] + t_ref[...] + x_ref[...], 0.0)


# ----------------------------- pallas_call builders --------------------------

def _conv1x1_stats(x, w, scale, bias, tm, *, pre_affine):
    m, k = x.shape
    c = w.shape[1]
    g = m // tm
    kern = functools.partial(_matmul_stats_kernel, pre_affine=pre_affine)
    return pl.pallas_call(
        kern,
        out_shape=(jax.ShapeDtypeStruct((m, c), jnp.float32),
                   jax.ShapeDtypeStruct((g, 2, c), jnp.float32)),
        grid=(g,),
        in_specs=[pl.BlockSpec((1, k), lambda i: (0, 0)),
                  pl.BlockSpec((1, k), lambda i: (0, 0)),
                  pl.BlockSpec((tm, k), lambda i: (i, 0)),
                  pl.BlockSpec((k, c), lambda i: (0, 0))],
        out_specs=(pl.BlockSpec((tm, c), lambda i: (i, 0)),
                   pl.BlockSpec((1, 2, c), lambda i: (i, 0, 0))),
        compiler_params=_CPARAMS,
    )(scale, bias, x, w)


def _conv3x3_stats(y1, w2, scale, bias, n, h, w_sp):
    m, c = y1.shape
    hw = h * w_sp
    guard = _round_up(w_sp + 1, 8)          # halo rows above/below, 8-aligned
    kern = functools.partial(_conv3x3_kernel, H=h, W=w_sp, guard=guard)
    return pl.pallas_call(
        kern,
        out_shape=(jax.ShapeDtypeStruct((m, c), jnp.float32),
                   jax.ShapeDtypeStruct((n, 2, c), jnp.float32)),
        grid=(n,),
        in_specs=[pl.BlockSpec((1, c), lambda i: (0, 0)),
                  pl.BlockSpec((1, c), lambda i: (0, 0)),
                  pl.BlockSpec((hw, c), lambda i: (i, 0)),
                  pl.BlockSpec((3, 3, c, c), lambda i: (0, 0, 0, 0))],
        out_specs=(pl.BlockSpec((hw, c), lambda i: (i, 0)),
                   pl.BlockSpec((1, 2, c), lambda i: (i, 0, 0))),
        scratch_shapes=[pltpu.VMEM((hw + 2 * guard, c), jnp.float32)],
        compiler_params=_CPARAMS,
    )(scale, bias, y1, w2)


def _residual_finalize(y3, x2d, scale, bias, tm):
    m, c = y3.shape
    g = m // tm
    return pl.pallas_call(
        _residual_kernel,
        out_shape=jax.ShapeDtypeStruct((m, c), jnp.float32),
        grid=(g,),
        in_specs=[pl.BlockSpec((1, c), lambda i: (0, 0)),
                  pl.BlockSpec((1, c), lambda i: (0, 0)),
                  pl.BlockSpec((tm, c), lambda i: (i, 0)),
                  pl.BlockSpec((tm, c), lambda i: (i, 0))],
        out_specs=pl.BlockSpec((tm, c), lambda i: (i, 0)),
        compiler_params=_CPARAMS,
    )(scale, bias, y3, x2d)


def _bn_scale_bias(stats, gamma, beta, count):
    """Fold training-mode BN into per-channel scale/bias (one-pass var)."""
    tot = jnp.sum(stats, axis=0)                      # (2, C): [sum, sumsq]
    mean = tot[0] / count
    var = jnp.maximum(tot[1] / count - mean * mean, 0.0)
    s = gamma * lax.rsqrt(var + EPS)
    t = beta - mean * s
    return s.reshape(1, -1), t.reshape(1, -1)


# --------------------------------- forward ----------------------------------

def _bottleneck_nhwc(x_nhwc, params):
    n, h, w_sp, cin = x_nhwc.shape
    width = params["w1"].shape[0]
    cout = params["w3"].shape[0]
    assert cout == cin, "identity residual requires inplanes == planes * 4"
    assert (h * w_sp) % 8 == 0

    cp = _round_up(cin, LANE)        # lane-dense input/output channels (cin==cout)
    wp = _round_up(width, LANE)      # lane-dense bottleneck width
    m = n * h * w_sp
    tm = _pick_row_tile(m)
    f32, bf16 = jnp.float32, jnp.bfloat16

    # weights: channels-last, zero-padded to 128-lane multiples, bf16 MXU operands
    w1 = _pad_trailing(jnp.transpose(params["w1"][:, :, 0, 0], (1, 0)), (cp, wp)).astype(bf16)
    w2 = _pad_trailing(jnp.transpose(params["w2"], (2, 3, 1, 0)), (3, 3, wp, wp)).astype(bf16)
    w3 = _pad_trailing(jnp.transpose(params["w3"][:, :, 0, 0], (1, 0)), (wp, cp)).astype(bf16)
    g1 = _pad_trailing(params["g1"], (wp,)); b1 = _pad_trailing(params["b1"], (wp,))
    g2 = _pad_trailing(params["g2"], (wp,)); b2 = _pad_trailing(params["b2"], (wp,))
    g3 = _pad_trailing(params["g3"], (cp,)); b3 = _pad_trailing(params["b3"], (cp,))

    x2d = _pad_trailing(x_nhwc.astype(f32), (n, h, w_sp, cp)).reshape(m, cp)
    ones = jnp.ones((1, cp), f32)
    zeros = jnp.zeros((1, cp), f32)

    # --- K1: conv1 (1x1) + BN1 partial stats ---------------------------------
    y1, st1 = _conv1x1_stats(x2d, w1, ones, zeros, tm, pre_affine=False)
    s1, t1 = _bn_scale_bias(st1, g1, b1, m)
    # --- K2: BN1+ReLU + conv2 (3x3, pad=1) + BN2 partial stats ---------------
    y2, st2 = _conv3x3_stats(y1, w2, s1, t1, n, h, w_sp)
    s2, t2 = _bn_scale_bias(st2, g2, b2, m)
    # --- K3: BN2+ReLU + conv3 (1x1) + BN3 partial stats ----------------------
    y3, st3 = _conv1x1_stats(y2, w3, s2, t2, tm, pre_affine=True)
    s3, t3 = _bn_scale_bias(st3, g3, b3, m)
    # --- K4: BN3 + residual add + ReLU ---------------------------------------
    out2d = _residual_finalize(y3, x2d, s3, t3, tm)
    return out2d.reshape(n, h, w_sp, cp)[..., :cout]


@jax.jit
def bottleneck_forward(x_nchw, params):
    """x_nchw: (N, Cin, H, W) float32 -> (N, Cout, H, W)."""
    # NCHW<->NHWC relayout is kept outside the kernels; in a full network keep
    # activations channels-last so this transpose is paid once, not per block.
    x_nhwc = jnp.transpose(x_nchw, (0, 2, 3, 1))
    out_nhwc = _bottleneck_nhwc(x_nhwc, params)
    return jnp.transpose(out_nhwc, (0, 3, 1, 2))


# ----------------------- reference (pure JAX, NCHW like PyTorch) -------------

def reference_forward(x, p):
    def bn(y, g, b):
        mean = y.mean(axis=(0, 2, 3), keepdims=True)
        var = ((y - mean) ** 2).mean(axis=(0, 2, 3), keepdims=True)
        return ((y - mean) / jnp.sqrt(var + EPS)) * g.reshape(1, -1, 1, 1) \
               + b.reshape(1, -1, 1, 1)

    dn = ("NCHW", "OIHW", "NCHW")
    out = lax.conv_general_dilated(x, p["w1"], (1, 1), "VALID",
                                   dimension_numbers=dn)
    out = jax.nn.relu(bn(out, p["g1"], p["b1"]))
    out = lax.conv_general_dilated(out, p["w2"], (1, 1), ((1, 1), (1, 1)),
                                   dimension_numbers=dn)
    out = jax.nn.relu(bn(out, p["g2"], p["b2"]))
    out = lax.conv_general_dilated(out, p["w3"], (1, 1), "VALID",
                                   dimension_numbers=dn)
    out = bn(out, p["g3"], p["b3"])
    return jax.nn.relu(out + x)


def make_params(key, inplanes, planes, base_width=64, groups=1):
    width = int(planes * (base_width / 64.0)) * groups
    cout = planes * 4  # Bottleneck.expansion
    ks = jax.random.split(key, 9)
    scale = 0.1
    return {
        # conv weights in PyTorch OIHW layout
        "w1": scale * jax.random.normal(ks[0], (width, inplanes, 1, 1), jnp.float32),
        "w2": scale * jax.random.normal(ks[1], (width, width, 3, 3), jnp.float32),
        "w3": scale * jax.random.normal(ks[2], (cout, width, 1, 1), jnp.float32),
        # batch-norm affine params (perturbed so the test is non-trivial)
        "g1": 1.0 + 0.1 * jax.random.normal(ks[3], (width,), jnp.float32),
        "b1": 0.1 * jax.random.normal(ks[4], (width,), jnp.float32),
        "g2": 1.0 + 0.1 * jax.random.normal(ks[5], (width,), jnp.float32),
        "b2": 0.1 * jax.random.normal(ks[6], (width,), jnp.float32),
        "g3": 1.0 + 0.1 * jax.random.normal(ks[7], (cout,), jnp.float32),
        "b3": 0.1 * jax.random.normal(ks[8], (cout,), jnp.float32),
    }


if __name__ == "__main__":
    key = jax.random.PRNGKey(0)
    kx, kp = jax.random.split(key)

    N, planes, H, W = 2, 4, 16, 16
    inplanes = planes * 4            # identity add requires Cin == planes*4
    x = jax.random.normal(kx, (N, inplanes, H, W), jnp.float32)
    params = make_params(kp, inplanes, planes)

    out = jax.block_until_ready(bottleneck_forward(x, params))
    ref = reference_forward(x, params)

    assert out.shape == ref.shape == (N, inplanes, H, W)
    err = jnp.max(jnp.abs(out - ref))
    # bf16 MXU operands (f32 accumulation) vs f32 reference -> loose tolerance
    assert jnp.allclose(out, ref, atol=4e-2, rtol=4e-2), f"max abs err {err}"

    print("KERNEL_OK")
</pallas_src>

<mosaic_0001>
module attributes {stable_mosaic.version = 11 : i64} {
  func.func @_matmul_stats_kernel(%arg0: i32, %arg1: memref<1x128xf32, #tpu.memory_space<vmem>>, %arg2: memref<1x128xf32, #tpu.memory_space<vmem>>, %arg3: memref<256x128xf32, #tpu.memory_space<vmem>>, %arg4: memref<128x128xbf16, #tpu.memory_space<vmem>>, %arg5: memref<256x128xf32, #tpu.memory_space<vmem>>, %arg6: memref<1x2x128xf32, #tpu.memory_space<vmem>>) attributes {dimension_semantics = [#tpu.dimension_semantics<parallel>], iteration_bounds = array<i64: 2>, scalar_prefetch = 0 : i64, scratch_operands = 0 : i64, tpu.core_type = #tpu.core_type<tc>, window_params = [{pipeline_mode = #tpu.pipeline_mode<synchronous>, transform_indices = @transform_0, window_bounds = array<i64: 1, 128>}, {pipeline_mode = #tpu.pipeline_mode<synchronous>, transform_indices = @transform_1, window_bounds = array<i64: 1, 128>}, {transform_indices = @transform_2, window_bounds = array<i64: 256, 128>}, {pipeline_mode = #tpu.pipeline_mode<synchronous>, transform_indices = @transform_3, window_bounds = array<i64: 128, 128>}, {transform_indices = @transform_4, window_bounds = array<i64: 256, 128>}, {transform_indices = @transform_5, window_bounds = array<i64: 1, 2, 128>}]} {
    %c0 = arith.constant 0 : index
    %c0_0 = arith.constant 0 : index
    %0 = vector.load %arg3[%c0, %c0_0] : memref<256x128xf32, #tpu.memory_space<vmem>>, vector<256x128xf32>
    %1 = arith.truncf %0 : vector<256x128xf32> to vector<256x128xbf16>
    %c0_1 = arith.constant 0 : index
    %c0_2 = arith.constant 0 : index
    %2 = vector.load %arg4[%c0_1, %c0_2] : memref<128x128xbf16, #tpu.memory_space<vmem>>, vector<128x128xbf16>
    %cst = arith.constant dense<0.000000e+00> : vector<256x128xf32>
    %3 = tpu.matmul %1, %2, %cst {dimension_numbers = #tpu.dot_dimension_numbers<[1], [0], [0], [1], [0, 0, 1, 1], [], []>} : vector<256x128xbf16>, vector<128x128xbf16>, vector<256x128xf32> -> vector<256x128xf32>
    %c0_3 = arith.constant 0 : index
    %c0_4 = arith.constant 0 : index
    %4 = vector.load %arg5[%c0_3, %c0_4] : memref<256x128xf32, #tpu.memory_space<vmem>>, vector<256x128xf32>
    tpu.vector_store %arg5[%c0_3, %c0_4], %3 {strides = array<i32>} : memref<256x128xf32, #tpu.memory_space<vmem>>, vector<256x128xf32>,
    %cst_5 = arith.constant dense<0.000000e+00> : vector<128xf32>
    %5 = vector.multi_reduction <add>, %3, %cst_5 [0] : vector<256x128xf32> to vector<128xf32>
    %6 = vector.shape_cast %5 : vector<128xf32> to vector<1x128xf32>
    %c0_6 = arith.constant 0 : index
    %c0_7 = arith.constant 0 : index
    %c0_8 = arith.constant 0 : index
    %7 = vector.load %arg6[%c0_6, %c0_7, %c0_8] : memref<1x2x128xf32, #tpu.memory_space<vmem>>, vector<1x1x128xf32>
    %8 = vector.shape_cast %7 : vector<1x1x128xf32> to vector<1x128xf32>
    %9 = vector.shape_cast %6 : vector<1x128xf32> to vector<1x1x128xf32>
    tpu.vector_store %arg6[%c0_6, %c0_7, %c0_8], %9 {strides = array<i32>} : memref<1x2x128xf32, #tpu.memory_space<vmem>>, vector<1x1x128xf32>,
    %10 = arith.mulf %3, %3 : vector<256x128xf32>
    %cst_9 = arith.constant dense<0.000000e+00> : vector<128xf32>
    %11 = vector.multi_reduction <add>, %10, %cst_9 [0] : vector<256x128xf32> to vector<128xf32>
    %12 = vector.shape_cast %11 : vector<128xf32> to vector<1x128xf32>
    %c0_10 = arith.constant 0 : index
    %c1 = arith.constant 1 : index
    %c0_11 = arith.constant 0 : index
    %13 = vector.load %arg6[%c0_10, %c1, %c0_11] : memref<1x2x128xf32, #tpu.memory_space<vmem>>, vector<1x1x128xf32>
    %14 = vector.shape_cast %13 : vector<1x1x128xf32> to vector<1x128xf32>
    %15 = vector.shape_cast %12 : vector<1x128xf32> to vector<1x1x128xf32>
    tpu.vector_store %arg6[%c0_10, %c1, %c0_11], %15 {strides = array<i32>} : memref<1x2x128xf32, #tpu.memory_space<vmem>>, vector<1x1x128xf32>,
    return
  }
  func.func @transform_0(%arg0: i32) -> (i32, i32) {
    %c0_i32 = arith.constant 0 : i32
    %c0_i32_0 = arith.constant 0 : i32
    %c0_i32_1 = arith.constant 0 : i32
    return %c0_i32, %c0_i32_0 : i32, i32
  }
  func.func @transform_1(%arg0: i32) -> (i32, i32) {
    %c0_i32 = arith.constant 0 : i32
    %c0_i32_0 = arith.constant 0 : i32
    %c0_i32_1 = arith.constant 0 : i32
    return %c0_i32, %c0_i32_0 : i32, i32
  }
  func.func @transform_2(%arg0: i32) -> (i32, i32) {
    %c0_i32 = arith.constant 0 : i32
    %c0_i32_0 = arith.constant 0 : i32
    return %arg0, %c0_i32 : i32, i32
  }
  func.func @transform_3(%arg0: i32) -> (i32, i32) {
    %c0_i32 = arith.constant 0 : i32
    %c0_i32_0 = arith.constant 0 : i32
    %c0_i32_1 = arith.constant 0 : i32
    return %c0_i32, %c0_i32_0 : i32, i32
  }
  func.func @transform_4(%arg0: i32) -> (i32, i32) {
    %c0_i32 = arith.constant 0 : i32
    %c0_i32_0 = arith.constant 0 : i32
    return %arg0, %c0_i32 : i32, i32
  }
  func.func @transform_5(%arg0: i32) -> (i32, i32, i32) {
    %c0_i32 = arith.constant 0 : i32
    %c0_i32_0 = arith.constant 0 : i32
    %c0_i32_1 = arith.constant 0 : i32
    return %arg0, %c0_i32, %c0_i32_0 : i32, i32, i32
  }
}

module attributes {stable_mosaic.version = 11 : i64} {
  func.func @_matmul_stats_kernel(%arg0: i32, %arg1: memref<1x128xf32, #tpu.memory_space<vmem>>, %arg2: memref<1x128xf32, #tpu.memory_space<vmem>>, %arg3: memref<256x128xf32, #tpu.memory_space<vmem>>, %arg4: memref<128x128xbf16, #tpu.memory_space<vmem>>, %arg5: memref<256x128xf32, #tpu.memory_space<vmem>>, %arg6: memref<1x2x128xf32, #tpu.memory_space<vmem>>) attributes {dimension_semantics = [#tpu.dimension_semantics<parallel>], iteration_bounds = array<i64: 2>, scalar_prefetch = 0 : i64, scratch_operands = 0 : i64, tpu.core_type = #tpu.core_type<tc>, window_params = [{pipeline_mode = #tpu.pipeline_mode<synchronous>, transform_indices = @transform_0, window_bounds = array<i64: 1, 128>}, {pipeline_mode = #tpu.pipeline_mode<synchronous>, transform_indices = @transform_1, window_bounds = array<i64: 1, 128>}, {transform_indices = @transform_2, window_bounds = array<i64: 256, 128>}, {pipeline_mode = #tpu.pipeline_mode<synchronous>, transform_indices = @transform_3, window_bounds = array<i64: 128, 128>}, {transform_indices = @transform_4, window_bounds = array<i64: 256, 128>}, {transform_indices = @transform_5, window_bounds = array<i64: 1, 2, 128>}]} {
    %c0 = arith.constant 0 : index
    %c0_0 = arith.constant 0 : index
    %0 = vector.load %arg3[%c0, %c0_0] : memref<256x128xf32, #tpu.memory_space<vmem>>, vector<256x128xf32>
    %c0_1 = arith.constant 0 : index
    %c0_2 = arith.constant 0 : index
    %1 = vector.load %arg1[%c0_1, %c0_2] : memref<1x128xf32, #tpu.memory_space<vmem>>, vector<1x128xf32>
    %2 = vector.broadcast %1 : vector<1x128xf32> to vector<256x128xf32>
    %3 = arith.mulf %0, %2 : vector<256x128xf32>
    %c0_3 = arith.constant 0 : index
    %c0_4 = arith.constant 0 : index
    %4 = vector.load %arg2[%c0_3, %c0_4] : memref<1x128xf32, #tpu.memory_space<vmem>>, vector<1x128xf32>
    %5 = vector.broadcast %4 : vector<1x128xf32> to vector<256x128xf32>
    %6 = arith.addf %3, %5 : vector<256x128xf32>
    %cst = arith.constant 0.000000e+00 : f32
    %7 = vector.broadcast %cst : f32 to vector<256x128xf32>
    %8 = arith.maximumf %6, %7 : vector<256x128xf32>
    %9 = arith.truncf %8 : vector<256x128xf32> to vector<256x128xbf16>
    %c0_5 = arith.constant 0 : index
    %c0_6 = arith.constant 0 : index
    %10 = vector.load %arg4[%c0_5, %c0_6] : memref<128x128xbf16, #tpu.memory_space<vmem>>, vector<128x128xbf16>
    %cst_7 = arith.constant dense<0.000000e+00> : vector<256x128xf32>
    %11 = tpu.matmul %9, %10, %cst_7 {dimension_numbers = #tpu.dot_dimension_numbers<[1], [0], [0], [1], [0, 0, 1, 1], [], []>} : vector<256x128xbf16>, vector<128x128xbf16>, vector<256x128xf32> -> vector<256x128xf32>
    %c0_8 = arith.constant 0 : index
    %c0_9 = arith.constant 0 : index
    %12 = vector.load %arg5[%c0_8, %c0_9] : memref<256x128xf32, #tpu.memory_space<vmem>>, vector<256x128xf32>
    tpu.vector_store %arg5[%c0_8, %c0_9], %11 {strides = array<i32>} : memref<256x128xf32, #tpu.memory_space<vmem>>, vector<256x128xf32>,
    %cst_10 = arith.constant dense<0.000000e+00> : vector<128xf32>
    %13 = vector.multi_reduction <add>, %11, %cst_10 [0] : vector<256x128xf32> to vector<128xf32>
    %14 = vector.shape_cast %13 : vector<128xf32> to vector<1x128xf32>
    %c0_11 = arith.constant 0 : index
    %c0_12 = arith.constant 0 : index
    %c0_13 = arith.constant 0 : index
    %15 = vector.load %arg6[%c0_11, %c0_12, %c0_13] : memref<1x2x128xf32, #tpu.memory_space<vmem>>, vector<1x1x128xf32>
    %16 = vector.shape_cast %15 : vector<1x1x128xf32> to vector<1x128xf32>
    %17 = vector.shape_cast %14 : vector<1x128xf32> to vector<1x1x128xf32>
    tpu.vector_store %arg6[%c0_11, %c0_12, %c0_13], %17 {strides = array<i32>} : memref<1x2x128xf32, #tpu.memory_space<vmem>>, vector<1x1x128xf32>,
    %18 = arith.mulf %11, %11 : vector<256x128xf32>
    %cst_14 = arith.constant dense<0.000000e+00> : vector<128xf32>
    %19 = vector.multi_reduction <add>, %18, %cst_14 [0] : vector<256x128xf32> to vector<128xf32>
    %20 = vector.shape_cast %19 : vector<128xf32> to vector<1x128xf32>
    %c0_15 = arith.constant 0 : index
    %c1 = arith.constant 1 : index
    %c0_16 = arith.constant 0 : index
    %21 = vector.load %arg6[%c0_15, %c1, %c0_16] : memref<1x2x128xf32, #tpu.memory_space<vmem>>, vector<1x1x128xf32>
    %22 = vector.shape_cast %21 : vector<1x1x128xf32> to vector<1x128xf32>
    %23 = vector.shape_cast %20 : vector<1x128xf32> to vector<1x1x128xf32>
    tpu.vector_store %arg6[%c0_15, %c1, %c0_16], %23 {strides = array<i32>} : memref<1x2x128xf32, #tpu.memory_space<vmem>>, vector<1x1x128xf32>,
    return
  }
  func.func @transform_0(%arg0: i32) -> (i32, i32) {
    %c0_i32 = arith.constant 0 : i32
    %c0_i32_0 = arith.constant 0 : i32
    %c0_i32_1 = arith.constant 0 : i32
    return %c0_i32, %c0_i32_0 : i32, i32
  }
  func.func @transform_1(%arg0: i32) -> (i32, i32) {
    %c0_i32 = arith.constant 0 : i32
    %c0_i32_0 = arith.constant 0 : i32
    %c0_i32_1 = arith.constant 0 : i32
    return %c0_i32, %c0_i32_0 : i32, i32
  }
  func.func @transform_2(%arg0: i32) -> (i32, i32) {
    %c0_i32 = arith.constant 0 : i32
    %c0_i32_0 = arith.constant 0 : i32
    return %arg0, %c0_i32 : i32, i32
  }
  func.func @transform_3(%arg0: i32) -> (i32, i32) {
    %c0_i32 = arith.constant 0 : i32
    %c0_i32_0 = arith.constant 0 : i32
    %c0_i32_1 = arith.constant 0 : i32
    return %c0_i32, %c0_i32_0 : i32, i32
  }
  func.func @transform_4(%arg0: i32) -> (i32, i32) {
    %c0_i32 = arith.constant 0 : i32
    %c0_i32_0 = arith.constant 0 : i32
    return %arg0, %c0_i32 : i32, i32
  }
  func.func @transform_5(%arg0: i32) -> (i32, i32, i32) {
    %c0_i32 = arith.constant 0 : i32
    %c0_i32_0 = arith.constant 0 : i32
    %c0_i32_1 = arith.constant 0 : i32
    return %arg0, %c0_i32, %c0_i32_0 : i32, i32, i32
  }
}

module attributes {stable_mosaic.version = 11 : i64} {
  func.func @_conv3x3_kernel(%arg0: i32, %arg1: memref<1x128xf32, #tpu.memory_space<vmem>>, %arg2: memref<1x128xf32, #tpu.memory_space<vmem>>, %arg3: memref<256x128xf32, #tpu.memory_space<vmem>>, %arg4: memref<3x3x128x128xbf16, #tpu.memory_space<vmem>>, %arg5: memref<256x128xf32, #tpu.memory_space<vmem>>, %arg6: memref<1x2x128xf32, #tpu.memory_space<vmem>>, %arg7: memref<304x128xf32, #tpu.memory_space<vmem>>) attributes {dimension_semantics = [#tpu.dimension_semantics<parallel>], iteration_bounds = array<i64: 2>, scalar_prefetch = 0 : i64, scratch_operands = 1 : i64, tpu.core_type = #tpu.core_type<tc>, window_params = [{pipeline_mode = #tpu.pipeline_mode<synchronous>, transform_indices = @transform_0, window_bounds = array<i64: 1, 128>}, {pipeline_mode = #tpu.pipeline_mode<synchronous>, transform_indices = @transform_1, window_bounds = array<i64: 1, 128>}, {transform_indices = @transform_2, window_bounds = array<i64: 256, 128>}, {pipeline_mode = #tpu.pipeline_mode<synchronous>, transform_indices = @transform_3, window_bounds = array<i64: 3, 3, 128, 128>}, {transform_indices = @transform_4, window_bounds = array<i64: 256, 128>}, {transform_indices = @transform_5, window_bounds = array<i64: 1, 2, 128>}]} {
    %cst = arith.constant 0.000000e+00 : f32
    %0 = vector.broadcast %cst : f32 to vector<24x128xf32>
    %c0 = arith.constant 0 : index
    %c0_0 = arith.constant 0 : index
    %1 = vector.load %arg7[%c0, %c0_0] : memref<304x128xf32, #tpu.memory_space<vmem>>, vector<24x128xf32>
    tpu.vector_store %arg7[%c0, %c0_0], %0 {strides = array<i32>} : memref<304x128xf32, #tpu.memory_space<vmem>>, vector<24x128xf32>,
    %cst_1 = arith.constant 0.000000e+00 : f32
    %2 = vector.broadcast %cst_1 : f32 to vector<24x128xf32>
    %c280 = arith.constant 280 : index
    %c0_2 = arith.constant 0 : index
    %3 = vector.load %arg7[%c280, %c0_2] : memref<304x128xf32, #tpu.memory_space<vmem>>, vector<24x128xf32>
    tpu.vector_store %arg7[%c280, %c0_2], %2 {strides = array<i32>} : memref<304x128xf32, #tpu.memory_space<vmem>>, vector<24x128xf32>,
    %c0_3 = arith.constant 0 : index
    %c0_4 = arith.constant 0 : index
    %4 = vector.load %arg3[%c0_3, %c0_4] : memref<256x128xf32, #tpu.memory_space<vmem>>, vector<256x128xf32>
    %c0_5 = arith.constant 0 : index
    %c0_6 = arith.constant 0 : index
    %5 = vector.load %arg1[%c0_5, %c0_6] : memref<1x128xf32, #tpu.memory_space<vmem>>, vector<1x128xf32>
    %6 = vector.broadcast %5 : vector<1x128xf32> to vector<256x128xf32>
    %7 = arith.mulf %4, %6 : vector<256x128xf32>
    %c0_7 = arith.constant 0 : index
    %c0_8 = arith.constant 0 : index
    %8 = vector.load %arg2[%c0_7, %c0_8] : memref<1x128xf32, #tpu.memory_space<vmem>>, vector<1x128xf32>
    %9 = vector.broadcast %8 : vector<1x128xf32> to vector<256x128xf32>
    %10 = arith.addf %7, %9 : vector<256x128xf32>
    %cst_9 = arith.constant 0.000000e+00 : f32
    %11 = vector.broadcast %cst_9 : f32 to vector<256x128xf32>
    %12 = arith.maximumf %10, %11 : vector<256x128xf32>
    %c24 = arith.constant 24 : index
    %c0_10 = arith.constant 0 : index
    %13 = vector.load %arg7[%c24, %c0_10] : memref<304x128xf32, #tpu.memory_space<vmem>>, vector<256x128xf32>
    tpu.vector_store %arg7[%c24, %c0_10], %12 {strides = array<i32>} : memref<304x128xf32, #tpu.memory_space<vmem>>, vector<256x128xf32>,
    %14 = tpu.iota {dimensions = array<i32: 0>} : vector<256x1xi32>
    %c16_i32 = arith.constant 16 : i32
    %c0_i32 = arith.constant 0 : i32
    %15 = arith.cmpi eq, %c16_i32, %c0_i32 : i32
    %c1_i32 = arith.constant 1 : i32
    %16 = arith.select %15, %c1_i32, %c16_i32 : i32
    %17 = vector.broadcast %16 : i32 to vector<256x1xi32>
    %18 = arith.remsi %14, %17 : vector<256x1xi32>
    %c0_i32_11 = arith.constant 0 : i32
    %19 = vector.broadcast %c0_i32_11 : i32 to vector<256x1xi32>
    %20 = arith.cmpi ne, %18, %19 : vector<256x1xi32>
    %c0_i32_12 = arith.constant 0 : i32
    %21 = vector.broadcast %c0_i32_12 : i32 to vector<256x1xi32>
    %22 = arith.cmpi slt, %18, %21 : vector<256x1xi32>
    %c0_i32_13 = arith.constant 0 : i32
    %23 = arith.cmpi slt, %16, %c0_i32_13 : i32
    %24 = vector.broadcast %23 : i1 to vector<256x1xi1>
    %25 = vector.broadcast %24 : vector<256x1xi1> to vector<256x1xi1>
    %26 = arith.xori %22, %25 : vector<256x1xi1>
    %27 = arith.andi %26, %20 : vector<256x1xi1>
    %28 = vector.broadcast %16 : i32 to vector<256x1xi32>
    %29 = arith.addi %18, %28 : vector<256x1xi32>
    %30 = arith.select %27, %29, %18 : vector<256x1xi1>, vector<256x1xi32>
    %cst_14 = arith.constant 0.000000e+00 : f32
    %31 = vector.broadcast %cst_14 : f32 to vector<256x128xf32>
    %c0_15 = arith.constant 0 : index
    %c0_16 = arith.constant 0 : index
    %32 = vector.load %arg5[%c0_15, %c0_16] : memref<256x128xf32, #tpu.memory_space<vmem>>, vector<256x128xf32>
    tpu.vector_store %arg5[%c0_15, %c0_16], %31 {strides = array<i32>} : memref<256x128xf32, #tpu.memory_space<vmem>>, vector<256x128xf32>,
    %c7 = arith.constant 7 : index
    %c0_17 = arith.constant 0 : index
    %33 = vector.load %arg7[%c7, %c0_17] : memref<304x128xf32, #tpu.memory_space<vmem>>, vector<256x128xf32>
    %c-1_i32 = arith.constant -1 : i32
    %34 = vector.broadcast %c-1_i32 : i32 to vector<256x1xi32>
    %35 = arith.addi %30, %34 : vector<256x1xi32>
    %c0_i32_18 = arith.constant 0 : i32
    %36 = vector.broadcast %c0_i32_18 : i32 to vector<256x1xi32>
    %37 = arith.cmpi sge, %35, %36 : vector<256x1xi32>
    %c-1_i32_19 = arith.constant -1 : i32
    %38 = vector.broadcast %c-1_i32_19 : i32 to vector<256x1xi32>
    %39 = arith.addi %30, %38 : vector<256x1xi32>
    %c16_i32_20 = arith.constant 16 : i32
    %40 = vector.broadcast %c16_i32_20 : i32 to vector<256x1xi32>
    %41 = arith.cmpi slt, %39, %40 : vector<256x1xi32>
    %42 = arith.andi %37, %41 : vector<256x1xi1>
    %cst_21 = arith.constant 0.000000e+00 : f32
    %43 = vector.shape_cast %42 : vector<256x1xi1> to vector<256x1xi1>
    %44 = vector.broadcast %43 : vector<256x1xi1> to vector<256x128xi1>
    %45 = vector.broadcast %cst_21 : f32 to vector<256x128xf32>
    %46 = arith.select %44, %33, %45 : vector<256x128xi1>, vector<256x128xf32>
    %c0_22 = arith.constant 0 : index
    %c0_23 = arith.constant 0 : index
    %47 = vector.load %arg5[%c0_22, %c0_23] : memref<256x128xf32, #tpu.memory_space<vmem>>, vector<256x128xf32>
    %48 = arith.truncf %46 : vector<256x128xf32> to vector<256x128xbf16>
    %c0_24 = arith.constant 0 : index
    %c0_25 = arith.constant 0 : index
    %c0_26 = arith.constant 0 : index
    %c0_27 = arith.constant 0 : index
    %49 = vector.load %arg4[%c0_24, %c0_25, %c0_26, %c0_27] : memref<3x3x128x128xbf16, #tpu.memory_space<vmem>>, vector<1x1x128x128xbf16>
    %50 = vector.shape_cast %49 : vector<1x1x128x128xbf16> to vector<128x128xbf16>
    %cst_28 = arith.constant dense<0.000000e+00> : vector<256x128xf32>
    %51 = tpu.matmul %48, %50, %cst_28 {dimension_numbers = #tpu.dot_dimension_numbers<[1], [0], [0], [1], [0, 0, 1, 1], [], []>} : vector<256x128xbf16>, vector<128x128xbf16>, vector<256x128xf32> -> vector<256x128xf32>
    %52 = arith.addf %47, %51 : vector<256x128xf32>
    %c0_29 = arith.constant 0 : index
    %c0_30 = arith.constant 0 : index
    %53 = vector.load %arg5[%c0_29, %c0_30] : memref<256x128xf32, #tpu.memory_space<vmem>>, vector<256x128xf32>
    tpu.vector_store %arg5[%c0_29, %c0_30], %52 {strides = array<i32>} : memref<256x128xf32, #tpu.memory_space<vmem>>, vector<256x128xf32>,
    %c8 = arith.constant 8 : index
    %c0_31 = arith.constant 0 : index
    %54 = vector.load %arg7[%c8, %c0_31] : memref<304x128xf32, #tpu.memory_space<vmem>>, vector<256x128xf32>
    %c0_32 = arith.constant 0 : index
    %c0_33 = arith.constant 0 : index
    %55 = vector.load %arg5[%c0_32, %c0_33] : memref<256x128xf32, #tpu.memory_space<vmem>>, vector<256x128xf32>
    %56 = arith.truncf %54 : vector<256x128xf32> to vector<256x128xbf16>
    %c0_34 = arith.constant 0 : index
    %c1 = arith.constant 1 : index
    %c0_35 = arith.constant 0 : index
    %c0_36 = arith.constant 0 : index
    %57 = vector.load %arg4[%c0_34, %c1, %c0_35, %c0_36] : memref<3x3x128x128xbf16, #tpu.memory_space<vmem>>, vector<1x1x128x128xbf16>
    %58 = vector.shape_cast %57 : vector<1x1x128x128xbf16> to vector<128x128xbf16>
    %cst_37 = arith.constant dense<0.000000e+00> : vector<256x128xf32>
    %59 = tpu.matmul %56, %58, %cst_37 {dimension_numbers = #tpu.dot_dimension_numbers<[1], [0], [0], [1], [0, 0, 1, 1], [], []>} : vector<256x128xbf16>, vector<128x128xbf16>, vector<256x128xf32> -> vector<256x128xf32>
    %60 = arith.addf %55, %59 : vector<256x128xf32>
    %c0_38 = arith.constant 0 : index
    %c0_39 = arith.constant 0 : index
    %61 = vector.load %arg5[%c0_38, %c0_39] : memref<256x128xf32, #tpu.memory_space<vmem>>, vector<256x128xf32>
    tpu.vector_store %arg5[%c0_38, %c0_39], %60 {strides = array<i32>} : memref<256x128xf32, #tpu.memory_space<vmem>>, vector<256x128xf32>,
    %c9 = arith.constant 9 : index
    %c0_40 = arith.constant 0 : index
    %62 = vector.load %arg7[%c9, %c0_40] : memref<304x128xf32, #tpu.memory_space<vmem>>, vector<256x128xf32>
    %c1_i32_41 = arith.constant 1 : i32
    %63 = vector.broadcast %c1_i32_41 : i32 to vector<256x1xi32>
    %64 = arith.addi %30, %63 : vector<256x1xi32>
    %c0_i32_42 = arith.constant 0 : i32
    %65 = vector.broadcast %c0_i32_42 : i32 to vector<256x1xi32>
    %66 = arith.cmpi sge, %64, %65 : vector<256x1xi32>
    %c1_i32_43 = arith.constant 1 : i32
    %67 = vector.broadcast %c1_i32_43 : i32 to vector<256x1xi32>
    %68 = arith.addi %30, %67 : vector<256x1xi32>
    %c16_i32_44 = arith.constant 16 : i32
    %69 = vector.broadcast %c16_i32_44 : i32 to vector<256x1xi32>
    %70 = arith.cmpi slt, %68, %69 : vector<256x1xi32>
    %71 = arith.andi %66, %70 : vector<256x1xi1>
    %cst_45 = arith.constant 0.000000e+00 : f32
    %72 = vector.shape_cast %71 : vector<256x1xi1> to vector<256x1xi1>
    %73 = vector.broadcast %72 : vector<256x1xi1> to vector<256x128xi1>
    %74 = vector.broadcast %cst_45 : f32 to vector<256x128xf32>
    %75 = arith.select %73, %62, %74 : vector<256x128xi1>, vector<256x128xf32>
    %c0_46 = arith.constant 0 : index
    %c0_47 = arith.constant 0 : index
    %76 = vector.load %arg5[%c0_46, %c0_47] : memref<256x128xf32, #tpu.memory_space<vmem>>, vector<256x128xf32>
    %77 = arith.truncf %75 : vector<256x128xf32> to vector<256x128xbf16>
    %c0_48 = arith.constant 0 : index
    %c2 = arith.constant 2 : index
    %c0_49 = arith.constant 0 : index
    %c0_50 = arith.constant 0 : index
    %78 = vector.load %arg4[%c0_48, %c2, %c0_49, %c0_50] : memref<3x3x128x128xbf16, #tpu.memory_space<vmem>>, vector<1x1x128x128xbf16>
    %79 = vector.shape_cast %78 : vector<1x1x128x128xbf16> to vector<128x128xbf16>
    %cst_51 = arith.constant dense<0.000000e+00> : vector<256x128xf32>
    %80 = tpu.matmul %77, %79, %cst_51 {dimension_numbers = #tpu.dot_dimension_numbers<[1], [0], [0], [1], [0, 0, 1, 1], [], []>} : vector<256x128xbf16>, vector<128x128xbf16>, vector<256x128xf32> -> vector<256x128xf32>
    %81 = arith.addf %76, %80 : vector<256x128xf32>
    %c0_52 = arith.constant 0 : index
    %c0_53 = arith.constant 0 : index
    %82 = vector.load %arg5[%c0_52, %c0_53] : memref<256x128xf32, #tpu.memory_space<vmem>>, vector<256x128xf32>
    tpu.vector_store %arg5[%c0_52, %c0_53], %81 {strides = array<i32>} : memref<256x128xf32, #tpu.memory_space<vmem>>, vector<256x128xf32>,
    %c23 = arith.constant 23 : index
    %c0_54 = arith.constant 0 : index
    %83 = vector.load %arg7[%c23, %c0_54] : memref<304x128xf32, #tpu.memory_space<vmem>>, vector<256x128xf32>
    %c-1_i32_55 = arith.constant -1 : i32
    %84 = vector.broadcast %c-1_i32_55 : i32 to vector<256x1xi32>
    %85 = arith.addi %30, %84 : vector<256x1xi32>
    %c0_i32_56 = arith.constant 0 : i32
    %86 = vector.broadcast %c0_i32_56 : i32 to vector<256x1xi32>
    %87 = arith.cmpi sge, %85, %86 : vector<256x1xi32>
    %c-1_i32_57 = arith.constant -1 : i32
    %88 = vector.broadcast %c-1_i32_57 : i32 to vector<256x1xi32>
    %89 = arith.addi %30, %88 : vector<256x1xi32>
    %c16_i32_58 = arith.constant 16 : i32
    %90 = vector.broadcast %c16_i32_58 : i32 to vector<256x1xi32>
    %91 = arith.cmpi slt, %89, %90 : vector<256x1xi32>
    %92 = arith.andi %87, %91 : vector<256x1xi1>
    %cst_59 = arith.constant 0.000000e+00 : f32
    %93 = vector.shape_cast %92 : vector<256x1xi1> to vector<256x1xi1>
    %94 = vector.broadcast %93 : vector<256x1xi1> to vector<256x128xi1>
    %95 = vector.broadcast %cst_59 : f32 to vector<256x128xf32>
    %96 = arith.select %94, %83, %95 : vector<256x128xi1>, vector<256x128xf32>
    %c0_60 = arith.constant 0 : index
    %c0_61 = arith.constant 0 : index
    %97 = vector.load %arg5[%c0_60, %c0_61] : memref<256x128xf32, #tpu.memory_space<vmem>>, vector<256x128xf32>
    %98 = arith.truncf %96 : vector<256x128xf32> to vector<256x128xbf16>
    %c1_62 = arith.constant 1 : index
    %c0_63 = arith.constant 0 : index
    %c0_64 = arith.constant 0 : index
    %c0_65 = arith.constant 0 : index
    %99 = vector.load %arg4[%c1_62, %c0_63, %c0_64, %c0_65] : memref<3x3x128x128xbf16, #tpu.memory_space<vmem>>, vector<1x1x128x128xbf16>
    %100 = vector.shape_cast %99 : vector<1x1x128x128xbf16> to vector<128x128xbf16>
    %cst_66 = arith.constant dense<0.000000e+00> : vector<256x128xf32>
    %101 = tpu.matmul %98, %100, %cst_66 {dimension_numbers = #tpu.dot_dimension_numbers<[1], [0], [0], [1], [0, 0, 1, 1], [], []>} : vector<256x128xbf16>, vector<128x128xbf16>, vector<256x128xf32> -> vector<256x128xf32>
    %102 = arith.addf %97, %101 : vector<256x128xf32>
    %c0_67 = arith.constant 0 : index
    %c0_68 = arith.constant 0 : index
    %103 = vector.load %arg5[%c0_67, %c0_68] : memref<256x128xf32, #tpu.memory_space<vmem>>, vector<256x128xf32>
    tpu.vector_store %arg5[%c0_67, %c0_68], %102 {strides = array<i32>} : memref<256x128xf32, #tpu.memory_space<vmem>>, vector<256x128xf32>,
    %c24_69 = arith.constant 24 : index
    %c0_70 = arith.constant 0 : index
    %104 = vector.load %arg7[%c24_69, %c0_70] : memref<304x128xf32, #tpu.memory_space<vmem>>, vector<256x128xf32>
    %c0_71 = arith.constant 0 : index
    %c0_72 = arith.constant 0 : index
    %105 = vector.load %arg5[%c0_71, %c0_72] : memref<256x128xf32, #tpu.memory_space<vmem>>, vector<256x128xf32>
    %106 = arith.truncf %104 : vector<256x128xf32> to vector<256x128xbf16>
    %c1_73 = arith.constant 1 : index
    %c1_74 = arith.constant 1 : index
    %c0_75 = arith.constant 0 : index
    %c0_76 = arith.constant 0 : index
    %107 = vector.load %arg4[%c1_73, %c1_74, %c0_75, %c0_76] : memref<3x3x128x128xbf16, #tpu.memory_space<vmem>>, vector<1x1x128x128xbf16>
    %108 = vector.shape_cast %107 : vector<1x1x128x128xbf16> to vector<128x128xbf16>
    %cst_77 = arith.constant dense<0.000000e+00> : vector<256x128xf32>
    %109 = tpu.matmul %106, %108, %cst_77 {dimension_numbers = #tpu.dot_dimension_numbers<[1], [0], [0], [1], [0, 0, 1, 1], [], []>} : vector<256x128xbf16>, vector<128x128xbf16>, vector<256x128xf32> -> vector<256x128xf32>
    %110 = arith.addf %105, %109 : vector<256x128xf32>
    %c0_78 = arith.constant 0 : index
    %c0_79 = arith.constant 0 : index
    %111 = vector.load %arg5[%c0_78, %c0_79] : memref<256x128xf32, #tpu.memory_space<vmem>>, vector<256x128xf32>
    tpu.vector_store %arg5[%c0_78, %c0_79], %110 {strides = array<i32>} : memref<256x128xf32, #tpu.memory_space<vmem>>, vector<256x128xf32>,
    %c25 = arith.constant 25 : index
    %c0_80 = arith.constant 0 : index
    %112 = vector.load %arg7[%c25, %c0_80] : memref<304x128xf32, #tpu.memory_space<vmem>>, vector<256x128xf32>
    %c1_i32_81 = arith.constant 1 : i32
    %113 = vector.broadcast %c1_i32_81 : i32 to vector<256x1xi32>
    %114 = arith.addi %30, %113 : vector<256x1xi32>
    %c0_i32_82 = arith.constant 0 : i32
    %115 = vector.broadcast %c0_i32_82 : i32 to vector<256x1xi32>
    %116 = arith.cmpi sge, %114, %115 : vector<256x1xi32>
    %c1_i32_83 = arith.constant 1 : i32
    %117 = vector.broadcast %c1_i32_83 : i32 to vector<256x1xi32>
    %118 = arith.addi %30, %117 : vector<256x1xi32>
    %c16_i32_84 = arith.constant 16 : i32
    %119 = vector.broadcast %c16_i32_84 : i32 to vector<256x1xi32>
    %120 = arith.cmpi slt, %118, %119 : vector<256x1xi32>
    %121 = arith.andi %116, %120 : vector<256x1xi1>
    %cst_85 = arith.constant 0.000000e+00 : f32
    %122 = vector.shape_cast %121 : vector<256x1xi1> to vector<256x1xi1>
    %123 = vector.broadcast %122 : vector<256x1xi1> to vector<256x128xi1>
    %124 = vector.broadcast %cst_85 : f32 to vector<256x128xf32>
    %125 = arith.select %123, %112, %124 : vector<256x128xi1>, vector<256x128xf32>
    %c0_86 = arith.constant 0 : index
    %c0_87 = arith.constant 0 : index
    %126 = vector.load %arg5[%c0_86, %c0_87] : memref<256x128xf32, #tpu.memory_space<vmem>>, vector<256x128xf32>
    %127 = arith.truncf %125 : vector<256x128xf32> to vector<256x128xbf16>
    %c1_88 = arith.constant 1 : index
    %c2_89 = arith.constant 2 : index
    %c0_90 = arith.constant 0 : index
    %c0_91 = arith.constant 0 : index
    %128 = vector.load %arg4[%c1_88, %c2_89, %c0_90, %c0_91] : memref<3x3x128x128xbf16, #tpu.memory_space<vmem>>, vector<1x1x128x128xbf16>
    %129 = vector.shape_cast %128 : vector<1x1x128x128xbf16> to vector<128x128xbf16>
    %cst_92 = arith.constant dense<0.000000e+00> : vector<256x128xf32>
    %130 = tpu.matmul %127, %129, %cst_92 {dimension_numbers = #tpu.dot_dimension_numbers<[1], [0], [0], [1], [0, 0, 1, 1], [], []>} : vector<256x128xbf16>, vector<128x128xbf16>, vector<256x128xf32> -> vector<256x128xf32>
    %131 = arith.addf %126, %130 : vector<256x128xf32>
    %c0_93 = arith.constant 0 : index
    %c0_94 = arith.constant 0 : index
    %132 = vector.load %arg5[%c0_93, %c0_94] : memref<256x128xf32, #tpu.memory_space<vmem>>, vector<256x128xf32>
    tpu.vector_store %arg5[%c0_93, %c0_94], %131 {strides = array<i32>} : memref<256x128xf32, #tpu.memory_space<vmem>>, vector<256x128xf32>,
    %c39 = arith.constant 39 : index
    %c0_95 = arith.constant 0 : index
    %133 = vector.load %arg7[%c39, %c0_95] : memref<304x128xf32, #tpu.memory_space<vmem>>, vector<256x128xf32>
    %c-1_i32_96 = arith.constant -1 : i32
    %134 = vector.broadcast %c-1_i32_96 : i32 to vector<256x1xi32>
    %135 = arith.addi %30, %134 : vector<256x1xi32>
    %c0_i32_97 = arith.constant 0 : i32
    %136 = vector.broadcast %c0_i32_97 : i32 to vector<256x1xi32>
    %137 = arith.cmpi sge, %135, %136 : vector<256x1xi32>
    %c-1_i32_98 = arith.constant -1 : i32
    %138 = vector.broadcast %c-1_i32_98 : i32 to vector<256x1xi32>
    %139 = arith.addi %30, %138 : vector<256x1xi32>
    %c16_i32_99 = arith.constant 16 : i32
    %140 = vector.broadcast %c16_i32_99 : i32 to vector<256x1xi32>
    %141 = arith.cmpi slt, %139, %140 : vector<256x1xi32>
    %142 = arith.andi %137, %141 : vector<256x1xi1>
    %cst_100 = arith.constant 0.000000e+00 : f32
    %143 = vector.shape_cast %142 : vector<256x1xi1> to vector<256x1xi1>
    %144 = vector.broadcast %143 : vector<256x1xi1> to vector<256x128xi1>
    %145 = vector.broadcast %cst_100 : f32 to vector<256x128xf32>
    %146 = arith.select %144, %133, %145 : vector<256x128xi1>, vector<256x128xf32>
    %c0_101 = arith.constant 0 : index
    %c0_102 = arith.constant 0 : index
    %147 = vector.load %arg5[%c0_101, %c0_102] : memref<256x128xf32, #tpu.memory_space<vmem>>, vector<256x128xf32>
    %148 = arith.truncf %146 : vector<256x128xf32> to vector<256x128xbf16>
    %c2_103 = arith.constant 2 : index
    %c0_104 = arith.constant 0 : index
    %c0_105 = arith.constant 0 : index
    %c0_106 = arith.constant 0 : index
    %149 = vector.load %arg4[%c2_103, %c0_104, %c0_105, %c0_106] : memref<3x3x128x128xbf16, #tpu.memory_space<vmem>>, vector<1x1x128x128xbf16>
    %150 = vector.shape_cast %149 : vector<1x1x128x128xbf16> to vector<128x128xbf16>
    %cst_107 = arith.constant dense<0.000000e+00> : vector<256x128xf32>
    %151 = tpu.matmul %148, %150, %cst_107 {dimension_numbers = #tpu.dot_dimension_numbers<[1], [0], [0], [1], [0, 0, 1, 1], [], []>} : vector<256x128xbf16>, vector<128x128xbf16>, vector<256x128xf32> -> vector<256x128xf32>
    %152 = arith.addf %147, %151 : vector<256x128xf32>
    %c0_108 = arith.constant 0 : index
    %c0_109 = arith.constant 0 : index
    %153 = vector.load %arg5[%c0_108, %c0_109] : memref<256x128xf32, #tpu.memory_space<vmem>>, vector<256x128xf32>
    tpu.vector_store %arg5[%c0_108, %c0_109], %152 {strides = array<i32>} : memref<256x128xf32, #tpu.memory_space<vmem>>, vector<256x128xf32>,
    %c40 = arith.constant 40 : index
    %c0_110 = arith.constant 0 : index
    %154 = vector.load %arg7[%c40, %c0_110] : memref<304x128xf32, #tpu.memory_space<vmem>>, vector<256x128xf32>
    %c0_111 = arith.constant 0 : index
    %c0_112 = arith.constant 0 : index
    %155 = vector.load %arg5[%c0_111, %c0_112] : memref<256x128xf32, #tpu.memory_space<vmem>>, vector<256x128xf32>
    %156 = arith.truncf %154 : vector<256x128xf32> to vector<256x128xbf16>
    %c2_113 = arith.constant 2 : index
    %c1_114 = arith.constant 1 : index
    %c0_115 = arith.constant 0 : index
    %c0_116 = arith.constant 0 : index
    %157 = vector.load %arg4[%c2_113, %c1_114, %c0_115, %c0_116] : memref<3x3x128x128xbf16, #tpu.memory_space<vmem>>, vector<1x1x128x128xbf16>
    %158 = vector.shape_cast %157 : vector<1x1x128x128xbf16> to vector<128x128xbf16>
    %cst_117 = arith.constant dense<0.000000e+00> : vector<256x128xf32>
    %159 = tpu.matmul %156, %158, %cst_117 {dimension_numbers = #tpu.dot_dimension_numbers<[1], [0], [0], [1], [0, 0, 1, 1], [], []>} : vector<256x128xbf16>, vector<128x128xbf16>, vector<256x128xf32> -> vector<256x128xf32>
    %160 = arith.addf %155, %159 : vector<256x128xf32>
    %c0_118 = arith.constant 0 : index
    %c0_119 = arith.constant 0 : index
    %161 = vector.load %arg5[%c0_118, %c0_119] : memref<256x128xf32, #tpu.memory_space<vmem>>, vector<256x128xf32>
    tpu.vector_store %arg5[%c0_118, %c0_119], %160 {strides = array<i32>} : memref<256x128xf32, #tpu.memory_space<vmem>>, vector<256x128xf32>,
    %c41 = arith.constant 41 : index
    %c0_120 = arith.constant 0 : index
    %162 = vector.load %arg7[%c41, %c0_120] : memref<304x128xf32, #tpu.memory_space<vmem>>, vector<256x128xf32>
    %c1_i32_121 = arith.constant 1 : i32
    %163 = vector.broadcast %c1_i32_121 : i32 to vector<256x1xi32>
    %164 = arith.addi %30, %163 : vector<256x1xi32>
    %c0_i32_122 = arith.constant 0 : i32
    %165 = vector.broadcast %c0_i32_122 : i32 to vector<256x1xi32>
    %166 = arith.cmpi sge, %164, %165 : vector<256x1xi32>
    %c1_i32_123 = arith.constant 1 : i32
    %167 = vector.broadcast %c1_i32_123 : i32 to vector<256x1xi32>
    %168 = arith.addi %30, %167 : vector<256x1xi32>
    %c16_i32_124 = arith.constant 16 : i32
    %169 = vector.broadcast %c16_i32_124 : i32 to vector<256x1xi32>
    %170 = arith.cmpi slt, %168, %169 : vector<256x1xi32>
    %171 = arith.andi %166, %170 : vector<256x1xi1>
    %cst_125 = arith.constant 0.000000e+00 : f32
    %172 = vector.shape_cast %171 : vector<256x1xi1> to vector<256x1xi1>
    %173 = vector.broadcast %172 : vector<256x1xi1> to vector<256x128xi1>
    %174 = vector.broadcast %cst_125 : f32 to vector<256x128xf32>
    %175 = arith.select %173, %162, %174 : vector<256x128xi1>, vector<256x128xf32>
    %c0_126 = arith.constant 0 : index
    %c0_127 = arith.constant 0 : index
    %176 = vector.load %arg5[%c0_126, %c0_127] : memref<256x128xf32, #tpu.memory_space<vmem>>, vector<256x128xf32>
    %177 = arith.truncf %175 : vector<256x128xf32> to vector<256x128xbf16>
    %c2_128 = arith.constant 2 : index
    %c2_129 = arith.constant 2 : index
    %c0_130 = arith.constant 0 : index
    %c0_131 = arith.constant 0 : index
    %178 = vector.load %arg4[%c2_128, %c2_129, %c0_130, %c0_131] : memref<3x3x128x128xbf16, #tpu.memory_space<vmem>>, vector<1x1x128x128xbf16>
    %179 = vector.shape_cast %178 : vector<1x1x128x128xbf16> to vector<128x128xbf16>
    %cst_132 = arith.constant dense<0.000000e+00> : vector<256x128xf32>
    %180 = tpu.matmul %177, %179, %cst_132 {dimension_numbers = #tpu.dot_dimension_numbers<[1], [0], [0], [1], [0, 0, 1, 1], [], []>} : vector<256x128xbf16>, vector<128x128xbf16>, vector<256x128xf32> -> vector<256x128xf32>
    %181 = arith.addf %176, %180 : vector<256x128xf32>
    %c0_133 = arith.constant 0 : index
    %c0_134 = arith.constant 0 : index
    %182 = vector.load %arg5[%c0_133, %c0_134] : memref<256x128xf32, #tpu.memory_space<vmem>>, vector<256x128xf32>
    tpu.vector_store %arg5[%c0_133, %c0_134], %181 {strides = array<i32>} : memref<256x128xf32, #tpu.memory_space<vmem>>, vector<256x128xf32>,
    %c0_135 = arith.constant 0 : index
    %c0_136 = arith.constant 0 : index
    %183 = vector.load %arg5[%c0_135, %c0_136] : memref<256x128xf32, #tpu.memory_space<vmem>>, vector<256x128xf32>
    %cst_137 = arith.constant dense<0.000000e+00> : vector<128xf32>
    %184 = vector.multi_reduction <add>, %183, %cst_137 [0] : vector<256x128xf32> to vector<128xf32>
    %185 = vector.shape_cast %184 : vector<128xf32> to vector<1x128xf32>
    %c0_138 = arith.constant 0 : index
    %c0_139 = arith.constant 0 : index
    %c0_140 = arith.constant 0 : index
    %186 = vector.load %arg6[%c0_138, %c0_139, %c0_140] : memref<1x2x128xf32, #tpu.memory_space<vmem>>, vector<1x1x128xf32>
    %187 = vector.shape_cast %186 : vector<1x1x128xf32> to vector<1x128xf32>
    %188 = vector.shape_cast %185 : vector<1x128xf32> to vector<1x1x128xf32>
    tpu.vector_store %arg6[%c0_138, %c0_139, %c0_140], %188 {strides = array<i32>} : memref<1x2x128xf32, #tpu.memory_space<vmem>>, vector<1x1x128xf32>,
    %189 = arith.mulf %183, %183 : vector<256x128xf32>
    %cst_141 = arith.constant dense<0.000000e+00> : vector<128xf32>
    %190 = vector.multi_reduction <add>, %189, %cst_141 [0] : vector<256x128xf32> to vector<128xf32>
    %191 = vector.shape_cast %190 : vector<128xf32> to vector<1x128xf32>
    %c0_142 = arith.constant 0 : index
    %c1_143 = arith.constant 1 : index
    %c0_144 = arith.constant 0 : index
    %192 = vector.load %arg6[%c0_142, %c1_143, %c0_144] : memref<1x2x128xf32, #tpu.memory_space<vmem>>, vector<1x1x128xf32>
    %193 = vector.shape_cast %192 : vector<1x1x128xf32> to vector<1x128xf32>
    %194 = vector.shape_cast %191 : vector<1x128xf32> to vector<1x1x128xf32>
    tpu.vector_store %arg6[%c0_142, %c1_143, %c0_144], %194 {strides = array<i32>} : memref<1x2x128xf32, #tpu.memory_space<vmem>>, vector<1x1x128xf32>,
    return
  }
  func.func @transform_0(%arg0: i32) -> (i32, i32) {
    %c0_i32 = arith.constant 0 : i32
    %c0_i32_0 = arith.constant 0 : i32
    %c0_i32_1 = arith.constant 0 : i32
    return %c0_i32, %c0_i32_0 : i32, i32
  }
  func.func @transform_1(%arg0: i32) -> (i32, i32) {
    %c0_i32 = arith.constant 0 : i32
    %c0_i32_0 = arith.constant 0 : i32
    %c0_i32_1 = arith.constant 0 : i32
    return %c0_i32, %c0_i32_0 : i32, i32
  }
  func.func @transform_2(%arg0: i32) -> (i32, i32) {
    %c0_i32 = arith.constant 0 : i32
    %c0_i32_0 = arith.constant 0 : i32
    return %arg0, %c0_i32 : i32, i32
  }
  func.func @transform_3(%arg0: i32) -> (i32, i32, i32, i32) {
    %c0_i32 = arith.constant 0 : i32
    %c0_i32_0 = arith.constant 0 : i32
    %c0_i32_1 = arith.constant 0 : i32
    %c0_i32_2 = arith.constant 0 : i32
    %c0_i32_3 = arith.constant 0 : i32
    return %c0_i32, %c0_i32_0, %c0_i32_1, %c0_i32_2 : i32, i32, i32, i32
  }
  func.func @transform_4(%arg0: i32) -> (i32, i32) {
    %c0_i32 = arith.constant 0 : i32
    %c0_i32_0 = arith.constant 0 : i32
    return %arg0, %c0_i32 : i32, i32
  }
  func.func @transform_5(%arg0: i32) -> (i32, i32, i32) {
    %c0_i32 = arith.constant 0 : i32
    %c0_i32_0 = arith.constant 0 : i32
    %c0_i32_1 = arith.constant 0 : i32
    return %arg0, %c0_i32, %c0_i32_0 : i32, i32, i32
  }
}

module attributes {stable_mosaic.version = 11 : i64} {
  func.func @_residual_kernel(%arg0: i32, %arg1: memref<1x128xf32, #tpu.memory_space<vmem>>, %arg2: memref<1x128xf32, #tpu.memory_space<vmem>>, %arg3: memref<256x128xf32, #tpu.memory_space<vmem>>, %arg4: memref<256x128xf32, #tpu.memory_space<vmem>>, %arg5: memref<256x128xf32, #tpu.memory_space<vmem>>) attributes {dimension_semantics = [#tpu.dimension_semantics<parallel>], iteration_bounds = array<i64: 2>, scalar_prefetch = 0 : i64, scratch_operands = 0 : i64, tpu.core_type = #tpu.core_type<tc>, window_params = [{pipeline_mode = #tpu.pipeline_mode<synchronous>, transform_indices = @transform_0, window_bounds = array<i64: 1, 128>}, {pipeline_mode = #tpu.pipeline_mode<synchronous>, transform_indices = @transform_1, window_bounds = array<i64: 1, 128>}, {transform_indices = @transform_2, window_bounds = array<i64: 256, 128>}, {transform_indices = @transform_3, window_bounds = array<i64: 256, 128>}, {transform_indices = @transform_4, window_bounds = array<i64: 256, 128>}]} {
    %c0 = arith.constant 0 : index
    %c0_0 = arith.constant 0 : index
    %0 = vector.load %arg3[%c0, %c0_0] : memref<256x128xf32, #tpu.memory_space<vmem>>, vector<256x128xf32>
    %c0_1 = arith.constant 0 : index
    %c0_2 = arith.constant 0 : index
    %1 = vector.load %arg1[%c0_1, %c0_2] : memref<1x128xf32, #tpu.memory_space<vmem>>, vector<1x128xf32>
    %2 = vector.broadcast %1 : vector<1x128xf32> to vector<256x128xf32>
    %3 = arith.mulf %0, %2 : vector<256x128xf32>
    %c0_3 = arith.constant 0 : index
    %c0_4 = arith.constant 0 : index
    %4 = vector.load %arg2[%c0_3, %c0_4] : memref<1x128xf32, #tpu.memory_space<vmem>>, vector<1x128xf32>
    %5 = vector.broadcast %4 : vector<1x128xf32> to vector<256x128xf32>
    %6 = arith.addf %3, %5 : vector<256x128xf32>
    %c0_5 = arith.constant 0 : index
    %c0_6 = arith.constant 0 : index
    %7 = vector.load %arg4[%c0_5, %c0_6] : memref<256x128xf32, #tpu.memory_space<vmem>>, vector<256x128xf32>
    %8 = arith.addf %6, %7 : vector<256x128xf32>
    %cst = arith.constant 0.000000e+00 : f32
    %9 = vector.broadcast %cst : f32 to vector<256x128xf32>
    %10 = arith.maximumf %8, %9 : vector<256x128xf32>
    %c0_7 = arith.constant 0 : index
    %c0_8 = arith.constant 0 : index
    %11 = vector.load %arg5[%c0_7, %c0_8] : memref<256x128xf32, #tpu.memory_space<vmem>>, vector<256x128xf32>
    tpu.vector_store %arg5[%c0_7, %c0_8], %10 {strides = array<i32>} : memref<256x128xf32, #tpu.memory_space<vmem>>, vector<256x128xf32>,
    return
  }
  func.func @transform_0(%arg0: i32) -> (i32, i32) {
    %c0_i32 = arith.constant 0 : i32
    %c0_i32_0 = arith.constant 0 : i32
    %c0_i32_1 = arith.constant 0 : i32
    return %c0_i32, %c0_i32_0 : i32, i32
  }
  func.func @transform_1(%arg0: i32) -> (i32, i32) {
    %c0_i32 = arith.constant 0 : i32
    %c0_i32_0 = arith.constant 0 : i32
    %c0_i32_1 = arith.constant 0 : i32
    return %c0_i32, %c0_i32_0 : i32, i32
  }
  func.func @transform_2(%arg0: i32) -> (i32, i32) {
    %c0_i32 = arith.constant 0 : i32
    %c0_i32_0 = arith.constant 0 : i32
    return %arg0, %c0_i32 : i32, i32
  }
  func.func @transform_3(%arg0: i32) -> (i32, i32) {
    %c0_i32 = arith.constant 0 : i32
    %c0_i32_0 = arith.constant 0 : i32
    return %arg0, %c0_i32 : i32, i32
  }
  func.func @transform_4(%arg0: i32) -> (i32, i32) {
    %c0_i32 = arith.constant 0 : i32
    %c0_i32_0 = arith.constant 0 : i32
    return %arg0, %c0_i32 : i32, i32
  }
}

</mosaic_0001>

<bundles_post_ra>
// kernel: bottleneck_forward.4
= control target key start
LH: loop header
LB: loop body
LE: loop exit
PB: predicated region body
PF: predicated region fallthrough
CT: control target
= control target key end

     0   :  { %s789_s18 = smov 0   ;;  %s1027_s0 = inlined_call_operand.vmem [shape: f32[1,128], index: 0, kind: input, shape index: {}]   ;;  %s1028_s1 = inlined_call_operand.vmem [shape: f32[1,128], index: 1, kind: input, shape index: {}]   ;;  %s1029_s2 = inlined_call_operand.vmem [shape: f32[512,128], index: 2, kind: input, shape index: {}]   ;;  %s1030_s3 = inlined_call_operand.vmem [shape: bf16[128,128], index: 3, kind: input, shape index: {}]   ;;  %s1031_s4 = inlined_call_operand.vmem [shape: f32[512,128], index: 4, kind: output, shape index: {0}]   ;;  %s1032_s5 = inlined_call_operand.vmem [shape: f32[2,2,128], index: 5, kind: output, shape index: {1}]  }
   0x1 LB: > { %s795_s0 = sadd.s32 4294967295, %s757_s18   ;;  %p671_p0 = scmp.ge.s32.totalorder %s757_s18, 1  ;;  %s757_s18 = sphi %s789_s18, %s16_s18  }
   0x2   : > { %p191_p1 = scmp.lt.s32.totalorder %s757_s18, 3 }
   0x4   : > { %p192_p2 = pnand %p671_p0, %p191_p1 }
   0x5   : > { %s672_s24 = sshll.u32 (!%p192_p2), %s795_s0, 5  ;;  %p235_p4 = scmp.lt.s32.totalorder (!%p192_p2), %s795_s0, 1 }
   0x6   : > { %195 = sbr.rel (%p192_p2) target bundleno = 290 (0x122), region = 36  ;;  %p224_p3 = scmp.lt.s32.totalorder (!%p192_p2), %s672_s24, 63 }
   0xb   : > { %v718_v0 = vld [vmem:[%s1030_s3 + $0x38] sm:$0xff]  ;;  %v717_v1 = vld [vmem:[%s1030_s3 + $0x30] sm:$0xff]  ;;  %v716_v2 = vld [vmem:[%s1030_s3 + $0x28] sm:$0xff]  ;;  %s1034_s24 = smov (!%p224_p3, %s672_s24), 63  ;;  %s1036_s0 = smov (!%p235_p4, %s795_s0), 1 }
   0xc   : > { %351 = vmatpush.bf16.msra.mxu0 %v718_v0  ;;  %719 = vmatpush.bf16.msra.mxu1 %v718_v0  ;;  %v715_v3 = vld [vmem:[%s1030_s3 + $0x20] sm:$0xff]  ;;  %v714_v4 = vld [vmem:[%s1030_s3 + $0x18] sm:$0xff]  ;;  %v713_v5 = vld [vmem:[%s1030_s3 + $0x10] sm:$0xff]  ;;  %s673_s6 = sshll.u32 %s1034_s24, 3  ;;  %s676_s17 = sshll.u32 %s1036_s0, 1 }
   0xd   : > { %720 = vmatpush.bf16.msra.mxu2 %v718_v0  ;;  %721 = vmatpush.bf16.msra.mxu3 %v718_v0  ;;  %v712_v6 = vld [vmem:[%s1030_s3 + $0x8] sm:$0xff]  ;;  %s829_s11 = scalar_lea.vmem %s1029_s2, %s673_s6  ;;  %v711_v7 = vld [vmem:[%s1030_s3] sm:$0xff]  ;;  %s871_s16 = scalar_lea.vmem %s1031_s4, %s673_s6 }
   0xe   : > { %v239_v8 = vld [vmem:[%s829_s11] sm:$0xff]  ;;  %v240_v9 = vld [vmem:[%s829_s11 + $0x8] sm:$0xff]  ;;  %v241_v20 = vld [vmem:[%s829_s11 + $0x10] sm:$0xff]  ;;  %s238_s20 = scalar_lea.vmem %s1032_s5, %s676_s17 }
   0xf   : > { %v247_v10 = vld [vmem:[%s829_s11 + $0x40] sm:$0xff]  ;;  %v248_v11 = vld [vmem:[%s829_s11 + $0x48] sm:$0xff]  ;;  %v271_v14 = vpack.c.bf16 %v240_v9, %v239_v8  ;;  %v242_v21 = vld [vmem:[%s829_s11 + $0x18] sm:$0xff] }
  0x10   : > { %352 = vmatpush.bf16.msra.mxu0 %v717_v1  ;;  %722 = vmatpush.bf16.msra.mxu1 %v717_v1  ;;  %v255_v12 = vld [vmem:[%s829_s11 + $0x80] sm:$0xff]  ;;  %v256_v13 = vld [vmem:[%s829_s11 + $0x88] sm:$0xff]  ;;  %v275_v15 = vpack.c.bf16 %v248_v11, %v247_v10  ;;  %v249_v22 = vld [vmem:[%s829_s11 + $0x50] sm:$0xff]  ;;  %v272_v26 = vpack.c.bf16 %v242_v21, %v241_v20 }
  0x11   : > { %723 = vmatpush.bf16.msra.mxu2 %v717_v1  ;;  %724 = vmatpush.bf16.msra.mxu3 %v717_v1  ;;  %v279_v16 = vpack.c.bf16 %v256_v13, %v255_v12  ;;  %v263_v17 = vld [vmem:[%s829_s11 + $0xc0] sm:$0xff]  ;;  %v264_v18 = vld [vmem:[%s829_s11 + $0xc8] sm:$0xff]  ;;  %v250_v23 = vld [vmem:[%s829_s11 + $0x58] sm:$0xff] }
  0x12   : > { %v283_v19 = vpack.c.bf16 %v264_v18, %v263_v17  ;;  %v257_v24 = vld [vmem:[%s829_s11 + $0x90] sm:$0xff]  ;;  %v258_v25 = vld [vmem:[%s829_s11 + $0x98] sm:$0xff]  ;;  %v276_v27 = vpack.c.bf16 %v250_v23, %v249_v22  ;;  %v243_v32 = vld [vmem:[%s829_s11 + $0x20] sm:$0xff] }
  0x13   : > { %v280_v28 = vpack.c.bf16 %v258_v25, %v257_v24  ;;  %v265_v29 = vld [vmem:[%s829_s11 + $0xd0] sm:$0xff]  ;;  %v266_v30 = vld [vmem:[%s829_s11 + $0xd8] sm:$0xff]  ;;  %v244_v33 = vld [vmem:[%s829_s11 + $0x28] sm:$0xff] }
  0x14   : > { %353 = vmatpush.bf16.msra.mxu0 %v716_v2  ;;  %725 = vmatpush.bf16.msra.mxu1 %v716_v2  ;;  %v284_v31 = vpack.c.bf16 %v266_v30, %v265_v29  ;;  %v251_v34 = vld [vmem:[%s829_s11 + $0x60] sm:$0xff]  ;;  %v252_v35 = vld [vmem:[%s829_s11 + $0x68] sm:$0xff]  ;;  %v273_v38 = vpack.c.bf16 %v244_v33, %v243_v32  ;;  %v245_v44 = vld [vmem:[%s829_s11 + $0x30] sm:$0xff] }
  0x15   : > { %726 = vmatpush.bf16.msra.mxu2 %v716_v2  ;;  %727 = vmatpush.bf16.msra.mxu3 %v716_v2  ;;  %v259_v36 = vld [vmem:[%s829_s11 + $0xa0] sm:$0xff]  ;;  %v260_v37 = vld [vmem:[%s829_s11 + $0xa8] sm:$0xff]  ;;  %v277_v39 = vpack.c.bf16 %v252_v35, %v251_v34  ;;  %v246_v45 = vld [vmem:[%s829_s11 + $0x38] sm:$0xff] }
  0x16   : > { %v267_v40 = vld [vmem:[%s829_s11 + $0xe0] sm:$0xff]  ;;  %v268_v41 = vld [vmem:[%s829_s11 + $0xe8] sm:$0xff]  ;;  %v281_v42 = vpack.c.bf16 %v260_v37, %v259_v36  ;;  %v253_v46 = vld [vmem:[%s829_s11 + $0x70] sm:$0xff]  ;;  %v274_v50 = vpack.c.bf16 %v246_v45, %v245_v44 }
  0x17   : > { %v285_v43 = vpack.c.bf16 %v268_v41, %v267_v40  ;;  %v254_v47 = vld [vmem:[%s829_s11 + $0x78] sm:$0xff]  ;;  %v261_v48 = vld [vmem:[%s829_s11 + $0xb0] sm:$0xff] }
  0x18   : > { %354 = vmatpush.bf16.msra.mxu0 %v715_v3  ;;  %728 = vmatpush.bf16.msra.mxu1 %v715_v3  ;;  %v262_v49 = vld [vmem:[%s829_s11 + $0xb8] sm:$0xff]  ;;  %v278_v51 = vpack.c.bf16 %v254_v47, %v253_v46  ;;  %v269_v52 = vld [vmem:[%s829_s11 + $0xf0] sm:$0xff] }
  0x19   : > { %729 = vmatpush.bf16.msra.mxu2 %v715_v3  ;;  %730 = vmatpush.bf16.msra.mxu3 %v715_v3  ;;  %v270_v53 = vld [vmem:[%s829_s11 + $0xf8] sm:$0xff]  ;;  %v282_v54 = vpack.c.bf16 %v262_v49, %v261_v48 }
  0x1a   : > { %v286_v55 = vpack.c.bf16 %v270_v53, %v269_v52 }
  0x1c   : > { %355 = vmatpush.bf16.msra.mxu0 %v714_v4  ;;  %731 = vmatpush.bf16.msra.mxu1 %v714_v4 }
  0x1d   : > { %732 = vmatpush.bf16.msra.mxu2 %v714_v4  ;;  %733 = vmatpush.bf16.msra.mxu3 %v714_v4 }
  0x20   : > { %356 = vmatpush.bf16.msra.mxu0 %v713_v5  ;;  %734 = vmatpush.bf16.msra.mxu1 %v713_v5 }
  0x21   : > { %735 = vmatpush.bf16.msra.mxu2 %v713_v5  ;;  %736 = vmatpush.bf16.msra.mxu3 %v713_v5 }
  0x24   : > { %357 = vmatpush.bf16.msra.mxu0 %v712_v6  ;;  %737 = vmatpush.bf16.msra.mxu1 %v712_v6 }
  0x25   : > { %738 = vmatpush.bf16.msra.mxu2 %v712_v6  ;;  %739 = vmatpush.bf16.msra.mxu3 %v712_v6 }
  0x28   : > { %358 = vmatpush.bf16.msra.mxu0 %v711_v7  ;;  %740 = vmatpush.bf16.msra.mxu1 %v711_v7 }
  0x29   : > { %741 = vmatpush.bf16.msra.mxu2 %v711_v7  ;;  %742 = vmatpush.bf16.msra.mxu3 %v711_v7 }
  0x2b   : > { %359 = vmatmul.bf16.vlgmr.msra.gmra.mxu0 %v271_v14  ;;  %379 = vmatmul.bf16.vlgmr.msra.gmra.mxu1 %v275_v15 }
  0x2c   : > { %399 = vmatmul.bf16.vlgmr.msra.gmra.mxu2 %v279_v16  ;;  %419 = vmatmul.bf16.vlgmr.msra.gmra.mxu3 %v283_v19 }
  0x3b   : > { %364 = vmatmul.bf16.gmra.mxu0 %v272_v26  ;;  %384 = vmatmul.bf16.gmra.mxu1 %v276_v27 }
  0x3c   : > { %404 = vmatmul.bf16.gmra.mxu2 %v280_v28  ;;  %424 = vmatmul.bf16.gmra.mxu3 %v284_v31 }
  0x4b   : > { %369 = vmatmul.bf16.gmra.mxu0 %v273_v38  ;;  %389 = vmatmul.bf16.gmra.mxu1 %v277_v39 }
  0x4c   : > { %409 = vmatmul.bf16.gmra.mxu2 %v281_v42  ;;  %429 = vmatmul.bf16.gmra.mxu3 %v285_v43 }
  0x5b   : > { %374 = vmatmul.bf16.gmra.mxu0 %v274_v50  ;;  %394 = vmatmul.bf16.gmra.mxu1 %v278_v51 }
  0x5c   : > { %414 = vmatmul.bf16.gmra.mxu2 %v282_v54  ;;  %434 = vmatmul.bf16.gmra.mxu3 %v286_v55 }
  0xa8   : > { %v360_v56 = vpop.f32.mrf.mxu0  ;;  %v873_v57 = vpop.f32.mrf.mxu1 }
  0xa9   : > { %440 = vst [vmem:[%s871_s16] sm:$0xff] %v360_v56  ;;  %v510_v15 = vmul.f32 %v360_v56, %v360_v56  ;;  %v518_v43 = vmul.f32 %v873_v57, %v873_v57 }
  0xaa   : > { %448 = vst [vmem:[%s871_s16 + $0x40] sm:$0xff] %v873_v57 }
  0xaf   : > { %v878_v58 = vpop.f32.mrf.mxu2  ;;  %v885_v61 = vpop.f32.mrf.mxu3 }
  0xb0   : > { %v362_v59 = vpop.f32.mrf.mxu0  ;;  %v880_v60 = vpop.f32.mrf.mxu1  ;;  %456 = vst [vmem:[%s871_s16 + $0x80] sm:$0xff] %v878_v58 }
  0xb1   : > { %441 = vst [vmem:[%s871_s16 + $0x8] sm:$0xff] %v362_v59  ;;  %v511_v14 = vmul.f32 %v362_v59, %v362_v59  ;;  %v472_v16 = vadd.f32 %v362_v59, %v360_v56  ;;  %v519_v46 = vmul.f32 %v880_v60, %v880_v60 }
  0xb2   : > { %449 = vst [vmem:[%s871_s16 + $0x48] sm:$0xff] %v880_v60 }
  0xb3   : > { %464 = vst [vmem:[%s871_s16 + $0xc0] sm:$0xff] %v885_v61  ;;  %v542_v18 = vadd.f32 %v511_v14, %v510_v15 }
  0xb7   : > { %v891_v62 = vpop.f32.mrf.mxu2  ;;  %v898_v1 = vpop.f32.mrf.mxu3 }
  0xb8   : > { %v365_v63 = vpop.f32.mrf.mxu0  ;;  %v893_v0 = vpop.f32.mrf.mxu1  ;;  %457 = vst [vmem:[%s871_s16 + $0x88] sm:$0xff] %v891_v62 }
  0xb9   : > { %442 = vst [vmem:[%s871_s16 + $0x10] sm:$0xff] %v365_v63  ;;  %v512_v17 = vmul.f32 %v365_v63, %v365_v63  ;;  %v473_v19 = vadd.f32 %v472_v16, %v365_v63  ;;  %v520_v49 = vmul.f32 %v893_v0, %v893_v0 }
  0xba   : > { %450 = vst [vmem:[%s871_s16 + $0x50] sm:$0xff] %v893_v0 }
  0xbb   : > { %465 = vst [vmem:[%s871_s16 + $0xc8] sm:$0xff] %v898_v1  ;;  %v543_v24 = vadd.f32 %v542_v18, %v512_v17  ;;  %v526_v17 = vmul.f32 %v878_v58, %v878_v58 }
  0xbf   : > { %v904_v2 = vpop.f32.mrf.mxu2  ;;  %v911_v5 = vpop.f32.mrf.mxu3 }
  0xc0   : > { %v367_v3 = vpop.f32.mrf.mxu0  ;;  %v906_v4 = vpop.f32.mrf.mxu1  ;;  %458 = vst [vmem:[%s871_s16 + $0x90] sm:$0xff] %v904_v2 }
  0xc1   : > { %443 = vst [vmem:[%s871_s16 + $0x18] sm:$0xff] %v367_v3  ;;  %v513_v20 = vmul.f32 %v367_v3, %v367_v3  ;;  %v474_v25 = vadd.f32 %v473_v19, %v367_v3  ;;  %v521_v53 = vmul.f32 %v906_v4, %v906_v4 }
  0xc2   : > { %451 = vst [vmem:[%s871_s16 + $0x58] sm:$0xff] %v906_v4 }
  0xc3   : > { %466 = vst [vmem:[%s871_s16 + $0xd0] sm:$0xff] %v911_v5  ;;  %v544_v28 = vadd.f32 %v543_v24, %v513_v20 }
  0xc7   : > { %v917_v6 = vpop.f32.mrf.mxu2  ;;  %v924_v9 = vpop.f32.mrf.mxu3 }
  0xc8   : > { %v370_v7 = vpop.f32.mrf.mxu0  ;;  %v919_v8 = vpop.f32.mrf.mxu1  ;;  %459 = vst [vmem:[%s871_s16 + $0x98] sm:$0xff] %v917_v6 }
  0xc9   : > { %444 = vst [vmem:[%s871_s16 + $0x20] sm:$0xff] %v370_v7  ;;  %v514_v26 = vmul.f32 %v370_v7, %v370_v7  ;;  %v475_v29 = vadd.f32 %v474_v25, %v370_v7  ;;  %v529_v25 = vmul.f32 %v917_v6, %v917_v6 }
  0xca   : > { %452 = vst [vmem:[%s871_s16 + $0x60] sm:$0xff] %v919_v8 }
  0xcb   : > { %467 = vst [vmem:[%s871_s16 + $0xd8] sm:$0xff] %v924_v9  ;;  %v545_v31 = vadd.f32 %v544_v28, %v514_v26 }
  0xcf   : > { %v930_v10 = vpop.f32.mrf.mxu2  ;;  %v937_v13 = vpop.f32.mrf.mxu3 }
  0xd0   : > { %v372_v11 = vpop.f32.mrf.mxu0  ;;  %v932_v12 = vpop.f32.mrf.mxu1  ;;  %460 = vst [vmem:[%s871_s16 + $0xa0] sm:$0xff] %v930_v10 }
  0xd1   : > { %445 = vst [vmem:[%s871_s16 + $0x28] sm:$0xff] %v372_v11  ;;  %v515_v30 = vmul.f32 %v372_v11, %v372_v11  ;;  %v476_v32 = vadd.f32 %v475_v29, %v372_v11  ;;  %v523_v63 = vmul.f32 %v932_v12, %v932_v12 }
  0xd2   : > { %453 = vst [vmem:[%s871_s16 + $0x68] sm:$0xff] %v932_v12 }
  0xd3   : > { %468 = vst [vmem:[%s871_s16 + $0xe0] sm:$0xff] %v937_v13  ;;  %v546_v34 = vadd.f32 %v545_v31, %v515_v30 }
  0xd7   : > { %v943_v21 = vpop.f32.mrf.mxu2  ;;  %v948_v27 = vpop.f32.mrf.mxu3 }
  0xd8   : > { %v375_v22 = vpop.f32.mrf.mxu0  ;;  %v395_v23 = vpop.f32.mrf.mxu1  ;;  %461 = vst [vmem:[%s871_s16 + $0xa8] sm:$0xff] %v943_v21  ;;  %v531_v31 = vmul.f32 %v943_v21, %v943_v21 }
  0xd9   : > { %446 = vst [vmem:[%s871_s16 + $0x30] sm:$0xff] %v375_v22  ;;  %v516_v33 = vmul.f32 %v375_v22, %v375_v22  ;;  %v477_v35 = vadd.f32 %v476_v32, %v375_v22  ;;  %v524_v11 = vmul.f32 %v395_v23, %v395_v23 }
  0xda   : > { %454 = vst [vmem:[%s871_s16 + $0x70] sm:$0xff] %v395_v23 }
  0xdb   : > { %469 = vst [vmem:[%s871_s16 + $0xe8] sm:$0xff] %v948_v27  ;;  %v547_v39 = vadd.f32 %v546_v34, %v516_v33 }
  0xdf   : > { %v415_v36 = vpop.f32.mrf.mxu2  ;;  %v955_v42 = vpop.f32.mrf.mxu3 }
  0xe0   : > { %v377_v37 = vpop.f32.mrf.mxu0  ;;  %v397_v38 = vpop.f32.mrf.mxu1  ;;  %462 = vst [vmem:[%s871_s16 + $0xb0] sm:$0xff] %v415_v36  ;;  %v532_v34 = vmul.f32 %v415_v36, %v415_v36 }
  0xe1   : > { %447 = vst [vmem:[%s871_s16 + $0x38] sm:$0xff] %v377_v37  ;;  %v478_v40 = vadd.f32 %v477_v35, %v377_v37  ;;  %v517_v41 = vmul.f32 %v377_v37, %v377_v37 }
  0xe2   : > { %455 = vst [vmem:[%s871_s16 + $0x78] sm:$0xff] %v397_v38 }
  0xe3   : > { %v479_v44 = vadd.f32 %v478_v40, %v873_v57  ;;  %v548_v45 = vadd.f32 %v547_v39, %v517_v41  ;;  %470 = vst [vmem:[%s871_s16 + $0xf0] sm:$0xff] %v955_v42  ;;  %v522_v57 = vmul.f32 %v919_v8, %v919_v8 }
  0xe5   : > { %v480_v47 = vadd.f32 %v479_v44, %v880_v60  ;;  %v549_v48 = vadd.f32 %v548_v45, %v518_v43  ;;  %v537_v45 = vmul.f32 %v924_v9, %v924_v9 }
  0xe7   : > { %v481_v50 = vadd.f32 %v480_v47, %v893_v0  ;;  %v550_v51 = vadd.f32 %v549_v48, %v519_v46  ;;  %v417_v52 = vpop.f32.mrf.mxu2  ;;  %v437_v56 = vpop.f32.mrf.mxu3  ;;  %v538_v47 = vmul.f32 %v937_v13, %v937_v13 }
  0xe8   : > { %463 = vst [vmem:[%s871_s16 + $0xb8] sm:$0xff] %v417_v52 }
  0xe9   : > { %v551_v54 = vadd.f32 %v550_v51, %v520_v49  ;;  %v482_v55 = vadd.f32 %v481_v50, %v906_v4  ;;  %471 = vst [vmem:[%s871_s16 + $0xf8] sm:$0xff] %v437_v56  ;;  %v525_v4 = vmul.f32 %v397_v38, %v397_v38  ;;  %v539_v50 = vmul.f32 %v948_v27, %v948_v27 }
  0xeb   : > { %v483_v59 = vadd.f32 %v482_v55, %v919_v8  ;;  %v552_v60 = vadd.f32 %v551_v54, %v521_v53  ;;  %v527_v8 = vmul.f32 %v891_v62, %v891_v62  ;;  %v540_v53 = vmul.f32 %v955_v42, %v955_v42 }
  0xec   : > { %v541_v55 = vmul.f32 %v437_v56, %v437_v56 }
  0xed   : > { %v484_v0 = vadd.f32 %v483_v59, %v932_v12  ;;  %v553_v3 = vadd.f32 %v552_v60, %v522_v57  ;;  %v528_v12 = vmul.f32 %v904_v2, %v904_v2 }
  0xef   : > { %v485_v7 = vadd.f32 %v484_v0, %v395_v23  ;;  %v554_v14 = vadd.f32 %v553_v3, %v523_v63 }
  0xf1   : > { %v555_v15 = vadd.f32 %v554_v14, %v524_v11  ;;  %v486_v16 = vadd.f32 %v485_v7, %v397_v38  ;;  %v533_v38 = vmul.f32 %v417_v52, %v417_v52 }
  0xf3   : > { %v487_v18 = vadd.f32 %v486_v16, %v878_v58  ;;  %v556_v19 = vadd.f32 %v555_v15, %v525_v4  ;;  %v530_v58 = vmul.f32 %v930_v10, %v930_v10 }
  0xf5   : > { %v488_v20 = vadd.f32 %v487_v18, %v891_v62  ;;  %v557_v22 = vadd.f32 %v556_v19, %v526_v17 }
  0xf7   : > { %v489_v23 = vadd.f32 %v488_v20, %v904_v2  ;;  %v558_v24 = vadd.f32 %v557_v22, %v527_v8 }
  0xf9   : > { %v559_v26 = vadd.f32 %v558_v24, %v528_v12  ;;  %v490_v28 = vadd.f32 %v489_v23, %v917_v6  ;;  %v534_v6 = vmul.f32 %v885_v61, %v885_v61 }
  0xfb   : > { %v491_v29 = vadd.f32 %v490_v28, %v930_v10  ;;  %v560_v30 = vadd.f32 %v559_v26, %v529_v25  ;;  %v535_v10 = vmul.f32 %v898_v1, %v898_v1 }
  0xfd   : > { %v492_v62 = vadd.f32 %v491_v29, %v943_v21  ;;  %v561_v32 = vadd.f32 %v560_v30, %v530_v58  ;;  %v536_v21 = vmul.f32 %v911_v5, %v911_v5 }
  0xff   : > { %v562_v2 = vadd.f32 %v561_v32, %v531_v31  ;;  %v493_v33 = vadd.f32 %v492_v62, %v415_v36 }
 0x101   : > { %v563_v35 = vadd.f32 %v562_v2, %v532_v34  ;;  %v494_v37 = vadd.f32 %v493_v33, %v417_v52 }
 0x103   : > { %v495_v39 = vadd.f32 %v494_v37, %v885_v61  ;;  %v564_v40 = vadd.f32 %v563_v35, %v533_v38 }
 0x105   : > { %v496_v41 = vadd.f32 %v495_v39, %v898_v1  ;;  %v565_v43 = vadd.f32 %v564_v40, %v534_v6 }
 0x107   : > { %v497_v36 = vadd.f32 %v496_v41, %v911_v5  ;;  %v566_v44 = vadd.f32 %v565_v43, %v535_v10 }
 0x109   : > { %v567_v46 = vadd.f32 %v566_v44, %v536_v21  ;;  %v498_v61 = vadd.f32 %v497_v36, %v924_v9 }
 0x10b   : > { %v499_v1 = vadd.f32 %v498_v61, %v937_v13  ;;  %v568_v48 = vadd.f32 %v567_v46, %v537_v45 }
 0x10d   : > { %v500_v49 = vadd.f32 %v499_v1, %v948_v27  ;;  %v569_v5 = vadd.f32 %v568_v48, %v538_v47 }
 0x10f   : > { %v570_v51 = vadd.f32 %v569_v5, %v539_v50  ;;  %v501_v52 = vadd.f32 %v500_v49, %v955_v42 }
 0x111   : > { %v571_v9 = vadd.f32 %v570_v51, %v540_v53  ;;  %v502_v54 = vadd.f32 %v501_v52, %v437_v56 }
 0x113   : > { %v503_v57 = vrot.slane %v502_v54, 4  ;;  %v572_v59 = vadd.f32 %v571_v9, %v541_v55 }
 0x115   : > { %v504_v13 = vadd.f32 %v503_v57, %v502_v54  ;;  %v573_v60 = vrot.slane %v572_v59, 4 }
 0x117   : > { %v505_v63 = vrot.slane %v504_v13, 2  ;;  %v574_v0 = vadd.f32 %v573_v60, %v572_v59 }
 0x119   : > { %v506_v27 = vadd.f32 %v505_v63, %v504_v13  ;;  %v575_v3 = vrot.slane %v574_v0, 2 }
 0x11b   : > { %v507_v7 = vrot.slane %v506_v27, 1  ;;  %v576_v11 = vadd.f32 %v575_v3, %v574_v0 }
 0x11d   : > { %v508_v42 = vadd.f32 %v507_v7, %v506_v27  ;;  %v577_v14 = vrot.slane %v576_v11, 1 }
 0x11f   : > { %509 = vst [vmem:[%s238_s20] sm:$0x1] %v508_v42  ;;  %v578_v56 = vadd.f32 %v577_v14, %v576_v11 }
 0x121   : > { %579 = vst [vmem:[%s238_s20 + $0x1] sm:$0x1] %v578_v56 }
 0x122 PF: > { %s16_s18 = sadd.s32 1, %s757_s18  }
 0x123   : > { %p13_p5 = scmp.ge.s32.totalorder %s16_s18, 4  }
 0x125   :  { %15 = sbr.rel (!%p13_p5) target bundleno = 1 (0x1), region = 78 }

// kernel: bottleneck_forward.6
= control target key start
LH: loop header
LB: loop body
LE: loop exit
PB: predicated region body
PF: predicated region fallthrough
CT: control target
= control target key end

     0   :  { %s895_s18 = smov 0   ;;  %s1207_s0 = inlined_call_operand.vmem [shape: f32[1,128], index: 0, kind: input, shape index: {}]   ;;  %s1208_s1 = inlined_call_operand.vmem [shape: f32[1,128], index: 1, kind: input, shape index: {}]   ;;  %s1209_s2 = inlined_call_operand.vmem [shape: f32[512,128], index: 2, kind: input, shape index: {}]   ;;  %s1210_s3 = inlined_call_operand.vmem [shape: bf16[128,128], index: 3, kind: input, shape index: {}]   ;;  %s1211_s4 = inlined_call_operand.vmem [shape: f32[512,128], index: 4, kind: output, shape index: {0}]   ;;  %s1212_s5 = inlined_call_operand.vmem [shape: f32[2,2,128], index: 5, kind: output, shape index: {1}]  }
   0x1 LB: > { %s901_s19 = sadd.s32 4294967295, %s863_s18   ;;  %p775_p0 = scmp.ge.s32.totalorder %s863_s18, 1  ;;  %s863_s18 = sphi %s895_s18, %s16_s18  }
   0x2   : > { %p191_p1 = scmp.lt.s32.totalorder %s863_s18, 3 }
   0x4   : > { %p192_p2 = pnand %p775_p0, %p191_p1 }
   0x5   : > { %s776_s22 = sshll.u32 (!%p192_p2), %s901_s19, 5  ;;  %p235_p4 = scmp.lt.s32.totalorder (!%p192_p2), %s901_s19, 1 }
   0x6   : > { %195 = sbr.rel (%p192_p2) target bundleno = 290 (0x122), region = 36  ;;  %p224_p3 = scmp.lt.s32.totalorder (!%p192_p2), %s776_s22, 63 }
   0xb   : > { %v822_v0 = vld [vmem:[%s1210_s3 + $0x38] sm:$0xff]  ;;  %v821_v1 = vld [vmem:[%s1210_s3 + $0x30] sm:$0xff]  ;;  %s1214_s22 = smov (!%p224_p3, %s776_s22), 63  ;;  %v820_v2 = vld [vmem:[%s1210_s3 + $0x28] sm:$0xff]  ;;  %s1216_s19 = smov (!%p235_p4, %s901_s19), 1 }
   0xc   : > { %455 = vmatpush.bf16.msra.mxu0 %v822_v0  ;;  %823 = vmatpush.bf16.msra.mxu1 %v822_v0  ;;  %s777_s27 = sshll.u32 %s1214_s22, 3  ;;  %v819_v3 = vld [vmem:[%s1210_s3 + $0x20] sm:$0xff]  ;;  %v818_v4 = vld [vmem:[%s1210_s3 + $0x18] sm:$0xff]  ;;  %v817_v17 = vld [vmem:[%s1210_s3 + $0x10] sm:$0xff]  ;;  %s780_s22 = sshll.u32 %s1216_s19, 1 }
   0xd   : > { %824 = vmatpush.bf16.msra.mxu2 %v822_v0  ;;  %825 = vmatpush.bf16.msra.mxu3 %v822_v0  ;;  %s926_s7 = scalar_lea.vmem %s1209_s2, %s777_s27  ;;  %v935_v6 = vld [vmem:[%s1207_s0] ss:$0 sm:$0xff]  ;;  %v816_v24 = vld [vmem:[%s1210_s3 + $0x8] sm:$0xff]  ;;  %s1051_s25 = scalar_lea.vmem %s1211_s4, %s777_s27 }
   0xe   : > { %v239_v5 = vld [vmem:[%s926_s7] sm:$0xff]  ;;  %v240_v7 = vld [vmem:[%s926_s7 + $0x8] sm:$0xff]  ;;  %v241_v40 = vld [vmem:[%s926_s7 + $0x10] sm:$0xff]  ;;  %s238_s28 = scalar_lea.vmem %s1212_s5, %s780_s22 }
   0xf   : > { %v247_v8 = vld [vmem:[%s926_s7 + $0x40] sm:$0xff]  ;;  %v248_v9 = vld [vmem:[%s926_s7 + $0x48] sm:$0xff]  ;;  %v275_v12 = vmul.f32 %v935_v6, %v239_v5  ;;  %v276_v13 = vmul.f32 %v935_v6, %v240_v7  ;;  %v242_v42 = vld [vmem:[%s926_s7 + $0x18] sm:$0xff]  ;;  %v277_v50 = vmul.f32 %v935_v6, %v241_v40 }
  0x10   : > { %456 = vmatpush.bf16.msra.mxu0 %v821_v1  ;;  %826 = vmatpush.bf16.msra.mxu1 %v821_v1  ;;  %v255_v10 = vld [vmem:[%s926_s7 + $0x80] sm:$0xff]  ;;  %v256_v11 = vld [vmem:[%s926_s7 + $0x88] sm:$0xff]  ;;  %v283_v15 = vmul.f32 %v935_v6, %v247_v8  ;;  %v284_v16 = vmul.f32 %v935_v6, %v248_v9  ;;  %v249_v44 = vld [vmem:[%s926_s7 + $0x50] sm:$0xff]  ;;  %v278_v52 = vmul.f32 %v935_v6, %v242_v42 }
  0x11   : > { %827 = vmatpush.bf16.msra.mxu2 %v821_v1  ;;  %828 = vmatpush.bf16.msra.mxu3 %v821_v1  ;;  %v947_v14 = vld [vmem:[%s1208_s1] ss:$0 sm:$0xff]  ;;  %v291_v18 = vmul.f32 %v935_v6, %v255_v10  ;;  %v292_v19 = vmul.f32 %v935_v6, %v256_v11  ;;  %v264_v35 = vld [vmem:[%s926_s7 + $0xc8] sm:$0xff]  ;;  %v250_v45 = vld [vmem:[%s926_s7 + $0x58] sm:$0xff]  ;;  %v285_v53 = vmul.f32 %v935_v6, %v249_v44 }
  0x12   : > { %v311_v20 = vadd.f32 %v947_v14, %v275_v12  ;;  %v312_v21 = vadd.f32 %v947_v14, %v276_v13  ;;  %v319_v22 = vadd.f32 %v947_v14, %v283_v15  ;;  %v320_v23 = vadd.f32 %v947_v14, %v284_v16  ;;  %v815_v31 = vld [vmem:[%s1210_s3] sm:$0xff]  ;;  %v257_v47 = vld [vmem:[%s926_s7 + $0x90] sm:$0xff]  ;;  %v258_v48 = vld [vmem:[%s926_s7 + $0x98] sm:$0xff] }
  0x13   : > { %v327_v25 = vadd.f32 %v947_v14, %v291_v18  ;;  %v328_v26 = vadd.f32 %v947_v14, %v292_v19  ;;  %v263_v34 = vld [vmem:[%s926_s7 + $0xc0] sm:$0xff]  ;;  %v300_v37 = vmul.f32 %v935_v6, %v264_v35  ;;  %v286_v54 = vmul.f32 %v935_v6, %v250_v45  ;;  %v265_v7 = vld [vmem:[%s926_s7 + $0xd0] sm:$0xff]  ;;  %v266_v8 = vld [vmem:[%s926_s7 + $0xd8] sm:$0xff] }
  0x14   : > { %457 = vmatpush.bf16.msra.mxu0 %v820_v2  ;;  %829 = vmatpush.bf16.msra.mxu1 %v820_v2  ;;  %v343_v27 = vmax.f32 %v311_v20, 0.0  ;;  %v344_v28 = vmax.f32 %v312_v21, 0.0  ;;  %v351_v29 = vmax.f32 %v319_v22, 0.0  ;;  %v352_v30 = vmax.f32 %v320_v23, 0.0  ;;  %v243_v13 = vld [vmem:[%s926_s7 + $0x20] sm:$0xff]  ;;  %v244_v16 = vld [vmem:[%s926_s7 + $0x28] sm:$0xff] }
  0x15   : > { %830 = vmatpush.bf16.msra.mxu2 %v820_v2  ;;  %831 = vmatpush.bf16.msra.mxu3 %v820_v2  ;;  %v359_v32 = vmax.f32 %v327_v25, 0.0  ;;  %v360_v33 = vmax.f32 %v328_v26, 0.0  ;;  %v299_v36 = vmul.f32 %v935_v6, %v263_v34  ;;  %v336_v46 = vadd.f32 %v947_v14, %v300_v37  ;;  %v251_v18 = vld [vmem:[%s926_s7 + $0x60] sm:$0xff]  ;;  %v252_v19 = vld [vmem:[%s926_s7 + $0x68] sm:$0xff] }
  0x16   : > { %v375_v38 = vpack.c.bf16 %v344_v28, %v343_v27  ;;  %v379_v39 = vpack.c.bf16 %v352_v30, %v351_v29  ;;  %v293_v55 = vmul.f32 %v935_v6, %v257_v47  ;;  %v294_v56 = vmul.f32 %v935_v6, %v258_v48  ;;  %v259_v21 = vld [vmem:[%s926_s7 + $0xa0] sm:$0xff]  ;;  %v260_v22 = vld [vmem:[%s926_s7 + $0xa8] sm:$0xff] }
  0x17   : > { %v335_v41 = vadd.f32 %v947_v14, %v299_v36  ;;  %v383_v43 = vpack.c.bf16 %v360_v33, %v359_v32  ;;  %v368_v51 = vmax.f32 %v336_v46, 0.0  ;;  %v313_v58 = vadd.f32 %v947_v14, %v277_v50  ;;  %v267_v32 = vld [vmem:[%s926_s7 + $0xe0] sm:$0xff]  ;;  %v268_v33 = vld [vmem:[%s926_s7 + $0xe8] sm:$0xff] }
  0x18   : > { %458 = vmatpush.bf16.msra.mxu0 %v819_v3  ;;  %832 = vmatpush.bf16.msra.mxu1 %v819_v3  ;;  %v314_v59 = vadd.f32 %v947_v14, %v278_v52  ;;  %v321_v60 = vadd.f32 %v947_v14, %v285_v53  ;;  %v322_v61 = vadd.f32 %v947_v14, %v286_v54  ;;  %v245_v54 = vld [vmem:[%s926_s7 + $0x30] sm:$0xff] }
  0x19   : > { %833 = vmatpush.bf16.msra.mxu2 %v819_v3  ;;  %834 = vmatpush.bf16.msra.mxu3 %v819_v3  ;;  %v367_v49 = vmax.f32 %v335_v41, 0.0  ;;  %v329_v62 = vadd.f32 %v947_v14, %v293_v55  ;;  %v330_v63 = vadd.f32 %v947_v14, %v294_v56  ;;  %v345_v0 = vmax.f32 %v313_v58, 0.0  ;;  %v246_v55 = vld [vmem:[%s926_s7 + $0x38] sm:$0xff] }
  0x1a   : > { %v346_v1 = vmax.f32 %v314_v59, 0.0  ;;  %v353_v2 = vmax.f32 %v321_v60, 0.0  ;;  %v354_v3 = vmax.f32 %v322_v61, 0.0  ;;  %v301_v9 = vmul.f32 %v935_v6, %v265_v7  ;;  %v254_v58 = vld [vmem:[%s926_s7 + $0x78] sm:$0xff]  ;;  %v261_v59 = vld [vmem:[%s926_s7 + $0xb0] sm:$0xff] }
  0x1b   : > { %v387_v57 = vpack.c.bf16 %v368_v51, %v367_v49  ;;  %v362_v5 = vmax.f32 %v330_v63, 0.0  ;;  %v302_v10 = vmul.f32 %v935_v6, %v266_v8  ;;  %v280_v26 = vmul.f32 %v935_v6, %v244_v16  ;;  %v262_v60 = vld [vmem:[%s926_s7 + $0xb8] sm:$0xff] }
  0x1c   : > { %459 = vmatpush.bf16.msra.mxu0 %v818_v4  ;;  %835 = vmatpush.bf16.msra.mxu1 %v818_v4  ;;  %v376_v11 = vpack.c.bf16 %v346_v1, %v345_v0  ;;  %v380_v12 = vpack.c.bf16 %v354_v3, %v353_v2  ;;  %v337_v15 = vadd.f32 %v947_v14, %v301_v9  ;;  %v269_v2 = vld [vmem:[%s926_s7 + $0xf0] sm:$0xff]  ;;  %v270_v3 = vld [vmem:[%s926_s7 + $0xf8] sm:$0xff] }
  0x1d   : > { %836 = vmatpush.bf16.msra.mxu2 %v818_v4  ;;  %837 = vmatpush.bf16.msra.mxu3 %v818_v4  ;;  %v361_v4 = vmax.f32 %v329_v62, 0.0  ;;  %v338_v20 = vadd.f32 %v947_v14, %v302_v10  ;;  %v287_v27 = vmul.f32 %v935_v6, %v251_v18  ;;  %v288_v28 = vmul.f32 %v935_v6, %v252_v19 }
  0x1e   : > { %v369_v23 = vmax.f32 %v337_v15, 0.0  ;;  %v295_v29 = vmul.f32 %v935_v6, %v259_v21  ;;  %v296_v30 = vmul.f32 %v935_v6, %v260_v22  ;;  %v303_v34 = vmul.f32 %v935_v6, %v267_v32 }
  0x1f   : > { %v370_v25 = vmax.f32 %v338_v20, 0.0  ;;  %v304_v35 = vmul.f32 %v935_v6, %v268_v33  ;;  %v316_v37 = vadd.f32 %v947_v14, %v280_v26  ;;  %v281_v61 = vmul.f32 %v935_v6, %v245_v54 }
  0x20   : > { %460 = vmatpush.bf16.msra.mxu0 %v817_v17  ;;  %838 = vmatpush.bf16.msra.mxu1 %v817_v17  ;;  %v331_v40 = vadd.f32 %v947_v14, %v295_v29  ;;  %v332_v41 = vadd.f32 %v947_v14, %v296_v30  ;;  %v339_v42 = vadd.f32 %v947_v14, %v303_v34 }
  0x21   : > { %839 = vmatpush.bf16.msra.mxu2 %v817_v17  ;;  %840 = vmatpush.bf16.msra.mxu3 %v817_v17  ;;  %v384_v17 = vpack.c.bf16 %v362_v5, %v361_v4  ;;  %v348_v45 = vmax.f32 %v316_v37, 0.0  ;;  %v282_v63 = vmul.f32 %v935_v6, %v246_v55  ;;  %v290_v1 = vmul.f32 %v935_v6, %v254_v58 }
  0x22   : > { %v363_v48 = vmax.f32 %v331_v40, 0.0  ;;  %v364_v49 = vmax.f32 %v332_v41, 0.0  ;;  %v371_v50 = vmax.f32 %v339_v42, 0.0  ;;  %v297_v4 = vmul.f32 %v935_v6, %v261_v59 }
  0x23   : > { %v298_v5 = vmul.f32 %v935_v6, %v262_v60  ;;  %v305_v7 = vmul.f32 %v935_v6, %v269_v2  ;;  %v306_v8 = vmul.f32 %v935_v6, %v270_v3  ;;  %v317_v9 = vadd.f32 %v947_v14, %v281_v61 }
  0x24   : > { %461 = vmatpush.bf16.msra.mxu0 %v816_v24  ;;  %841 = vmatpush.bf16.msra.mxu1 %v816_v24  ;;  %v385_v56 = vpack.c.bf16 %v364_v49, %v363_v48  ;;  %v318_v10 = vadd.f32 %v947_v14, %v282_v63 }
  0x25   : > { %842 = vmatpush.bf16.msra.mxu2 %v816_v24  ;;  %843 = vmatpush.bf16.msra.mxu3 %v816_v24  ;;  %v279_v24 = vmul.f32 %v935_v6, %v243_v13  ;;  %v333_v13 = vadd.f32 %v947_v14, %v297_v4  ;;  %v334_v15 = vadd.f32 %v947_v14, %v298_v5  ;;  %v349_v18 = vmax.f32 %v317_v9, 0.0 }
  0x26   : > { %v341_v16 = vadd.f32 %v947_v14, %v305_v7  ;;  %v350_v19 = vmax.f32 %v318_v10, 0.0 }
  0x27   : > { %v315_v36 = vadd.f32 %v947_v14, %v279_v24  ;;  %v365_v21 = vmax.f32 %v333_v13, 0.0  ;;  %v366_v22 = vmax.f32 %v334_v15, 0.0 }
  0x28   : > { %462 = vmatpush.bf16.msra.mxu0 %v815_v31  ;;  %844 = vmatpush.bf16.msra.mxu1 %v815_v31 }
  0x29   : > { %845 = vmatpush.bf16.msra.mxu2 %v815_v31  ;;  %846 = vmatpush.bf16.msra.mxu3 %v815_v31  ;;  %v388_v31 = vpack.c.bf16 %v370_v25, %v369_v23  ;;  %v347_v44 = vmax.f32 %v315_v36, 0.0  ;;  %v373_v23 = vmax.f32 %v341_v16, 0.0  ;;  %v378_v25 = vpack.c.bf16 %v350_v19, %v349_v18 }
  0x2b   : > { %463 = vmatmul.bf16.vlgmr.msra.gmra.mxu0 %v375_v38  ;;  %483 = vmatmul.bf16.vlgmr.msra.gmra.mxu1 %v379_v39  ;;  %v323_v38 = vadd.f32 %v947_v14, %v287_v27  ;;  %v324_v39 = vadd.f32 %v947_v14, %v288_v28  ;;  %v377_v52 = vpack.c.bf16 %v348_v45, %v347_v44 }
  0x2c   : > { %503 = vmatmul.bf16.vlgmr.msra.gmra.mxu2 %v383_v43  ;;  %523 = vmatmul.bf16.vlgmr.msra.gmra.mxu3 %v387_v57  ;;  %v340_v43 = vadd.f32 %v947_v14, %v304_v35  ;;  %v253_v57 = vld [vmem:[%s926_s7 + $0x70] sm:$0xff]  ;;  %v386_v27 = vpack.c.bf16 %v366_v22, %v365_v21 }
  0x2d   : > { %v355_v46 = vmax.f32 %v323_v38, 0.0  ;;  %v356_v47 = vmax.f32 %v324_v39, 0.0  ;;  %v289_v0 = vmul.f32 %v935_v6, %v253_v57 }
  0x2e   : > { %v372_v51 = vmax.f32 %v340_v43, 0.0 }
  0x2f   : > { %v381_v53 = vpack.c.bf16 %v356_v47, %v355_v46 }
  0x30   : > { %v389_v62 = vpack.c.bf16 %v372_v51, %v371_v50 }
  0x3b   : > { %468 = vmatmul.bf16.gmra.mxu0 %v376_v11  ;;  %488 = vmatmul.bf16.gmra.mxu1 %v380_v12  ;;  %v325_v11 = vadd.f32 %v947_v14, %v289_v0  ;;  %v326_v12 = vadd.f32 %v947_v14, %v290_v1 }
  0x3c   : > { %508 = vmatmul.bf16.gmra.mxu2 %v384_v17  ;;  %528 = vmatmul.bf16.gmra.mxu3 %v388_v31  ;;  %v342_v17 = vadd.f32 %v947_v14, %v306_v8 }
  0x3d   : > { %v357_v6 = vmax.f32 %v325_v11, 0.0  ;;  %v358_v20 = vmax.f32 %v326_v12, 0.0 }
  0x3e   : > { %v374_v24 = vmax.f32 %v342_v17, 0.0 }
  0x3f   : > { %v382_v26 = vpack.c.bf16 %v358_v20, %v357_v6 }
  0x40   : > { %v390_v28 = vpack.c.bf16 %v374_v24, %v373_v23 }
  0x4b   : > { %473 = vmatmul.bf16.gmra.mxu0 %v377_v52  ;;  %493 = vmatmul.bf16.gmra.mxu1 %v381_v53 }
  0x4c   : > { %513 = vmatmul.bf16.gmra.mxu2 %v385_v56  ;;  %533 = vmatmul.bf16.gmra.mxu3 %v389_v62 }
  0x5b   : > { %478 = vmatmul.bf16.gmra.mxu0 %v378_v25  ;;  %498 = vmatmul.bf16.gmra.mxu1 %v382_v26 }
  0x5c   : > { %518 = vmatmul.bf16.gmra.mxu2 %v386_v27  ;;  %538 = vmatmul.bf16.gmra.mxu3 %v390_v28 }
  0xa8   : > { %v464_v14 = vpop.f32.mrf.mxu0  ;;  %v1053_v29 = vpop.f32.mrf.mxu1 }
  0xa9   : > { %544 = vst [vmem:[%s1051_s25] sm:$0xff] %v464_v14  ;;  %v614_v51 = vmul.f32 %v464_v14, %v464_v14  ;;  %v622_v17 = vmul.f32 %v1053_v29, %v1053_v29 }
  0xaa   : > { %552 = vst [vmem:[%s1051_s25 + $0x40] sm:$0xff] %v1053_v29 }
  0xaf   : > { %v1058_v30 = vpop.f32.mrf.mxu2  ;;  %v1065_v33 = vpop.f32.mrf.mxu3 }
  0xb0   : > { %v466_v31 = vpop.f32.mrf.mxu0  ;;  %v1060_v32 = vpop.f32.mrf.mxu1  ;;  %560 = vst [vmem:[%s1051_s25 + $0x80] sm:$0xff] %v1058_v30 }
  0xb1   : > { %545 = vst [vmem:[%s1051_s25 + $0x8] sm:$0xff] %v466_v31  ;;  %v615_v50 = vmul.f32 %v466_v31, %v466_v31  ;;  %v576_v52 = vadd.f32 %v466_v31, %v464_v14  ;;  %v623_v6 = vmul.f32 %v1060_v32, %v1060_v32 }
  0xb2   : > { %553 = vst [vmem:[%s1051_s25 + $0x48] sm:$0xff] %v1060_v32 }
  0xb3   : > { %568 = vst [vmem:[%s1051_s25 + $0xc0] sm:$0xff] %v1065_v33  ;;  %v646_v54 = vadd.f32 %v615_v50, %v614_v51 }
  0xb7   : > { %v1071_v34 = vpop.f32.mrf.mxu2  ;;  %v1078_v37 = vpop.f32.mrf.mxu3 }
  0xb8   : > { %v469_v35 = vpop.f32.mrf.mxu0  ;;  %v1073_v36 = vpop.f32.mrf.mxu1  ;;  %561 = vst [vmem:[%s1051_s25 + $0x88] sm:$0xff] %v1071_v34 }
  0xb9   : > { %546 = vst [vmem:[%s1051_s25 + $0x10] sm:$0xff] %v469_v35  ;;  %v616_v53 = vmul.f32 %v469_v35, %v469_v35  ;;  %v577_v55 = vadd.f32 %v576_v52, %v469_v35  ;;  %v624_v22 = vmul.f32 %v1073_v36, %v1073_v36 }
  0xba   : > { %554 = vst [vmem:[%s1051_s25 + $0x50] sm:$0xff] %v1073_v36 }
  0xbb   : > { %569 = vst [vmem:[%s1051_s25 + $0xc8] sm:$0xff] %v1078_v37  ;;  %v647_v60 = vadd.f32 %v646_v54, %v616_v53  ;;  %v630_v53 = vmul.f32 %v1058_v30, %v1058_v30 }
  0xbf   : > { %v1084_v38 = vpop.f32.mrf.mxu2  ;;  %v1091_v41 = vpop.f32.mrf.mxu3 }
  0xc0   : > { %v471_v39 = vpop.f32.mrf.mxu0  ;;  %v1086_v40 = vpop.f32.mrf.mxu1  ;;  %562 = vst [vmem:[%s1051_s25 + $0x90] sm:$0xff] %v1084_v38 }
  0xc1   : > { %547 = vst [vmem:[%s1051_s25 + $0x18] sm:$0xff] %v471_v39  ;;  %v617_v56 = vmul.f32 %v471_v39, %v471_v39  ;;  %v578_v61 = vadd.f32 %v577_v55, %v471_v39  ;;  %v625_v26 = vmul.f32 %v1086_v40, %v1086_v40 }
  0xc2   : > { %555 = vst [vmem:[%s1051_s25 + $0x58] sm:$0xff] %v1086_v40 }
  0xc3   : > { %570 = vst [vmem:[%s1051_s25 + $0xd0] sm:$0xff] %v1091_v41  ;;  %v648_v0 = vadd.f32 %v647_v60, %v617_v56 }
  0xc7   : > { %v1097_v42 = vpop.f32.mrf.mxu2  ;;  %v1104_v45 = vpop.f32.mrf.mxu3 }
  0xc8   : > { %v474_v43 = vpop.f32.mrf.mxu0  ;;  %v1099_v44 = vpop.f32.mrf.mxu1  ;;  %563 = vst [vmem:[%s1051_s25 + $0x98] sm:$0xff] %v1097_v42 }
  0xc9   : > { %548 = vst [vmem:[%s1051_s25 + $0x20] sm:$0xff] %v474_v43  ;;  %v618_v62 = vmul.f32 %v474_v43, %v474_v43  ;;  %v579_v1 = vadd.f32 %v578_v61, %v474_v43  ;;  %v633_v61 = vmul.f32 %v1097_v42, %v1097_v42 }
  0xca   : > { %556 = vst [vmem:[%s1051_s25 + $0x60] sm:$0xff] %v1099_v44 }
  0xcb   : > { %571 = vst [vmem:[%s1051_s25 + $0xd8] sm:$0xff] %v1104_v45  ;;  %v649_v3 = vadd.f32 %v648_v0, %v618_v62 }
  0xcf   : > { %v1110_v46 = vpop.f32.mrf.mxu2  ;;  %v1117_v49 = vpop.f32.mrf.mxu3 }
  0xd0   : > { %v476_v47 = vpop.f32.mrf.mxu0  ;;  %v1112_v48 = vpop.f32.mrf.mxu1  ;;  %564 = vst [vmem:[%s1051_s25 + $0xa0] sm:$0xff] %v1110_v46 }
  0xd1   : > { %549 = vst [vmem:[%s1051_s25 + $0x28] sm:$0xff] %v476_v47  ;;  %v619_v2 = vmul.f32 %v476_v47, %v476_v47  ;;  %v580_v4 = vadd.f32 %v579_v1, %v476_v47  ;;  %v627_v35 = vmul.f32 %v1112_v48, %v1112_v48 }
  0xd2   : > { %557 = vst [vmem:[%s1051_s25 + $0x68] sm:$0xff] %v1112_v48 }
  0xd3   : > { %572 = vst [vmem:[%s1051_s25 + $0xe0] sm:$0xff] %v1117_v49  ;;  %v650_v7 = vadd.f32 %v649_v3, %v619_v2 }
  0xd7   : > { %v1123_v57 = vpop.f32.mrf.mxu2  ;;  %v1128_v63 = vpop.f32.mrf.mxu3 }
  0xd8   : > { %v479_v58 = vpop.f32.mrf.mxu0  ;;  %v499_v59 = vpop.f32.mrf.mxu1  ;;  %565 = vst [vmem:[%s1051_s25 + $0xa8] sm:$0xff] %v1123_v57  ;;  %v635_v3 = vmul.f32 %v1123_v57, %v1123_v57 }
  0xd9   : > { %550 = vst [vmem:[%s1051_s25 + $0x30] sm:$0xff] %v479_v58  ;;  %v620_v5 = vmul.f32 %v479_v58, %v479_v58  ;;  %v581_v8 = vadd.f32 %v580_v4, %v479_v58  ;;  %v628_v47 = vmul.f32 %v499_v59, %v499_v59 }
  0xda   : > { %558 = vst [vmem:[%s1051_s25 + $0x70] sm:$0xff] %v499_v59 }
  0xdb   : > { %573 = vst [vmem:[%s1051_s25 + $0xe8] sm:$0xff] %v1128_v63  ;;  %v651_v12 = vadd.f32 %v650_v7, %v620_v5 }
  0xdf   : > { %v519_v9 = vpop.f32.mrf.mxu2  ;;  %v1135_v16 = vpop.f32.mrf.mxu3 }
  0xe0   : > { %v481_v10 = vpop.f32.mrf.mxu0  ;;  %v501_v11 = vpop.f32.mrf.mxu1  ;;  %566 = vst [vmem:[%s1051_s25 + $0xb0] sm:$0xff] %v519_v9  ;;  %v636_v7 = vmul.f32 %v519_v9, %v519_v9 }
  0xe1   : > { %551 = vst [vmem:[%s1051_s25 + $0x38] sm:$0xff] %v481_v10  ;;  %v582_v13 = vadd.f32 %v581_v8, %v481_v10  ;;  %v621_v15 = vmul.f32 %v481_v10, %v481_v10 }
  0xe2   : > { %559 = vst [vmem:[%s1051_s25 + $0x78] sm:$0xff] %v501_v11 }
  0xe3   : > { %v583_v18 = vadd.f32 %v582_v13, %v1053_v29  ;;  %v652_v19 = vadd.f32 %v651_v12, %v621_v15  ;;  %574 = vst [vmem:[%s1051_s25 + $0xf0] sm:$0xff] %v1135_v16  ;;  %v626_v29 = vmul.f32 %v1099_v44, %v1099_v44 }
  0xe5   : > { %v584_v20 = vadd.f32 %v583_v18, %v1060_v32  ;;  %v653_v21 = vadd.f32 %v652_v19, %v622_v17  ;;  %v641_v19 = vmul.f32 %v1104_v45, %v1104_v45 }
  0xe7   : > { %v585_v23 = vadd.f32 %v584_v20, %v1073_v36  ;;  %v654_v24 = vadd.f32 %v653_v21, %v623_v6  ;;  %v521_v25 = vpop.f32.mrf.mxu2  ;;  %v541_v14 = vpop.f32.mrf.mxu3  ;;  %v642_v20 = vmul.f32 %v1117_v49, %v1117_v49 }
  0xe8   : > { %567 = vst [vmem:[%s1051_s25 + $0xb8] sm:$0xff] %v521_v25 }
  0xe9   : > { %v655_v27 = vadd.f32 %v654_v24, %v624_v22  ;;  %v586_v28 = vadd.f32 %v585_v23, %v1086_v40  ;;  %575 = vst [vmem:[%s1051_s25 + $0xf8] sm:$0xff] %v541_v14  ;;  %v629_v40 = vmul.f32 %v501_v11, %v501_v11  ;;  %v643_v23 = vmul.f32 %v1128_v63, %v1128_v63 }
  0xeb   : > { %v587_v31 = vadd.f32 %v586_v28, %v1099_v44  ;;  %v656_v32 = vadd.f32 %v655_v27, %v625_v26  ;;  %v631_v44 = vmul.f32 %v1071_v34, %v1071_v34  ;;  %v644_v26 = vmul.f32 %v1135_v16, %v1135_v16 }
  0xec   : > { %v645_v28 = vmul.f32 %v541_v14, %v541_v14 }
  0xed   : > { %v588_v36 = vadd.f32 %v587_v31, %v1112_v48  ;;  %v657_v39 = vadd.f32 %v656_v32, %v626_v29  ;;  %v632_v48 = vmul.f32 %v1084_v38, %v1084_v38 }
  0xef   : > { %v589_v43 = vadd.f32 %v588_v36, %v499_v59  ;;  %v658_v50 = vadd.f32 %v657_v39, %v627_v35 }
  0xf1   : > { %v659_v51 = vadd.f32 %v658_v50, %v628_v47  ;;  %v590_v52 = vadd.f32 %v589_v43, %v501_v11  ;;  %v637_v11 = vmul.f32 %v521_v25, %v521_v25 }
  0xf3   : > { %v591_v54 = vadd.f32 %v590_v52, %v1058_v30  ;;  %v660_v55 = vadd.f32 %v659_v51, %v629_v40  ;;  %v634_v30 = vmul.f32 %v1110_v46, %v1110_v46 }
  0xf5   : > { %v592_v56 = vadd.f32 %v591_v54, %v1071_v34  ;;  %v661_v58 = vadd.f32 %v660_v55, %v630_v53 }
  0xf7   : > { %v593_v59 = vadd.f32 %v592_v56, %v1084_v38  ;;  %v662_v60 = vadd.f32 %v661_v58, %v631_v44 }
  0xf9   : > { %v663_v62 = vadd.f32 %v662_v60, %v632_v48  ;;  %v594_v0 = vadd.f32 %v593_v59, %v1097_v42  ;;  %v638_v42 = vmul.f32 %v1065_v33, %v1065_v33 }
  0xfb   : > { %v595_v1 = vadd.f32 %v594_v0, %v1110_v46  ;;  %v664_v2 = vadd.f32 %v663_v62, %v633_v61  ;;  %v639_v46 = vmul.f32 %v1078_v37, %v1078_v37 }
  0xfd   : > { %v596_v34 = vadd.f32 %v595_v1, %v1123_v57  ;;  %v665_v4 = vadd.f32 %v664_v2, %v634_v30  ;;  %v640_v57 = vmul.f32 %v1091_v41, %v1091_v41 }
  0xff   : > { %v666_v38 = vadd.f32 %v665_v4, %v635_v3  ;;  %v597_v5 = vadd.f32 %v596_v34, %v519_v9 }
 0x101   : > { %v667_v8 = vadd.f32 %v666_v38, %v636_v7  ;;  %v598_v10 = vadd.f32 %v597_v5, %v521_v25 }
 0x103   : > { %v599_v12 = vadd.f32 %v598_v10, %v1065_v33  ;;  %v668_v13 = vadd.f32 %v667_v8, %v637_v11 }
 0x105   : > { %v600_v15 = vadd.f32 %v599_v12, %v1078_v37  ;;  %v669_v17 = vadd.f32 %v668_v13, %v638_v42 }
 0x107   : > { %v601_v9 = vadd.f32 %v600_v15, %v1091_v41  ;;  %v670_v18 = vadd.f32 %v669_v17, %v639_v46 }
 0x109   : > { %v671_v6 = vadd.f32 %v670_v18, %v640_v57  ;;  %v602_v33 = vadd.f32 %v601_v9, %v1104_v45 }
 0x10b   : > { %v603_v37 = vadd.f32 %v602_v33, %v1117_v49  ;;  %v672_v21 = vadd.f32 %v671_v6, %v641_v19 }
 0x10d   : > { %v604_v22 = vadd.f32 %v603_v37, %v1128_v63  ;;  %v673_v41 = vadd.f32 %v672_v21, %v642_v20 }
 0x10f   : > { %v674_v24 = vadd.f32 %v673_v41, %v643_v23  ;;  %v605_v25 = vadd.f32 %v604_v22, %v1135_v16 }
 0x111   : > { %v675_v45 = vadd.f32 %v674_v24, %v644_v26  ;;  %v606_v27 = vadd.f32 %v605_v25, %v541_v14 }
 0x113   : > { %v607_v29 = vrot.slane %v606_v27, 4  ;;  %v676_v31 = vadd.f32 %v675_v45, %v645_v28 }
 0x115   : > { %v608_v49 = vadd.f32 %v607_v29, %v606_v27  ;;  %v677_v32 = vrot.slane %v676_v31, 4 }
 0x117   : > { %v609_v35 = vrot.slane %v608_v49, 2  ;;  %v678_v36 = vadd.f32 %v677_v32, %v676_v31 }
 0x119   : > { %v610_v63 = vadd.f32 %v609_v35, %v608_v49  ;;  %v679_v39 = vrot.slane %v678_v36, 2 }
 0x11b   : > { %v611_v43 = vrot.slane %v610_v63, 1  ;;  %v680_v47 = vadd.f32 %v679_v39, %v678_v36 }
 0x11d   : > { %v612_v16 = vadd.f32 %v611_v43, %v610_v63  ;;  %v681_v50 = vrot.slane %v680_v47, 1 }
 0x11f   : > { %613 = vst [vmem:[%s238_s28] sm:$0x1] %v612_v16  ;;  %v682_v14 = vadd.f32 %v681_v50, %v680_v47 }
 0x121   : > { %683 = vst [vmem:[%s238_s28 + $0x1] sm:$0x1] %v682_v14 }
 0x122 PF: > { %s16_s18 = sadd.s32 1, %s863_s18  }
 0x123   : > { %p13_p5 = scmp.ge.s32.totalorder %s16_s18, 4  }
 0x125   :  { %15 = sbr.rel (!%p13_p5) target bundleno = 1 (0x1), region = 78 }

// kernel: bottleneck_forward.7
= control target key start
LH: loop header
LB: loop body
LE: loop exit
PB: predicated region body
PF: predicated region fallthrough
CT: control target
= control target key end

     0   :  { %s579_s15 = smov 0   ;;  %s780_s0 = inlined_call_operand.vmem [shape: f32[1,128], index: 0, kind: input, shape index: {}]   ;;  %s781_s1 = inlined_call_operand.vmem [shape: f32[1,128], index: 1, kind: input, shape index: {}]   ;;  %s782_s2 = inlined_call_operand.vmem [shape: f32[512,128], index: 2, kind: input, shape index: {}]   ;;  %s783_s3 = inlined_call_operand.vmem [shape: f32[512,128], index: 3, kind: input, shape index: {}]   ;;  %s784_s4 = inlined_call_operand.vmem [shape: f32[512,128], index: 4, kind: output, shape index: {}]  }
   0x1 LB: > { %s523_s16 = sadd.s32 4294967295, %s552_s15   ;;  %p527_p0 = scmp.ge.s32.totalorder %s552_s15, 1  ;;  %s552_s15 = sphi %s579_s15, %s14_s15  }
   0x2   : > { %p174_p1 = scmp.lt.s32.totalorder %s552_s15, 3 }
   0x4   : > { %p175_p2 = pnand %p527_p0, %p174_p1 }
   0x5   : > { %s528_s17 = sshll.u32 (!%p175_p2), %s523_s16, 5 }
   0x6   : > { %178 = sbr.rel (%p175_p2) target bundleno = 55 (0x37), region = 36  ;;  %p206_p3 = scmp.lt.s32.totalorder (!%p175_p2), %s528_s17, 63 }
   0xb   : > { %s786_s17 = smov (!%p206_p3, %s528_s17), 63  ;;  %v590_v0 = vld [vmem:[%s780_s0] ss:$0 sm:$0xff] }
   0xc   : > { %s592_s20 = sshll.u32 %s786_s17, 3  ;;  %v609_v1 = vld [vmem:[%s781_s1] ss:$0 sm:$0xff] }
   0xd   : > { %s598_s23 = scalar_lea.vmem %s782_s2, %s592_s20  ;;  %s604_s26 = scalar_lea.vmem %s783_s3, %s592_s20 }
   0xe   : > { %v223_v2 = vld [vmem:[%s598_s23] sm:$0xff]  ;;  %v224_v3 = vld [vmem:[%s598_s23 + $0x8] sm:$0xff]  ;;  %v225_v7 = vld [vmem:[%s598_s23 + $0x10] sm:$0xff]  ;;  %s640_s5 = scalar_lea.vmem %s784_s4, %s592_s20 }
   0xf   : > { %v259_v4 = vmul.f32 %v590_v0, %v223_v2  ;;  %v327_v5 = vld [vmem:[%s604_s26] sm:$0xff]  ;;  %v260_v6 = vmul.f32 %v590_v0, %v224_v3  ;;  %v328_v8 = vld [vmem:[%s604_s26 + $0x8] sm:$0xff]  ;;  %v261_v9 = vmul.f32 %v590_v0, %v225_v7  ;;  %v226_v10 = vld [vmem:[%s598_s23 + $0x18] sm:$0xff] }
  0x10   : > { %v227_v11 = vld [vmem:[%s598_s23 + $0x20] sm:$0xff]  ;;  %v329_v14 = vld [vmem:[%s604_s26 + $0x10] sm:$0xff]  ;;  %v262_v15 = vmul.f32 %v590_v0, %v226_v10  ;;  %v330_v16 = vld [vmem:[%s604_s26 + $0x18] sm:$0xff] }
  0x11   : > { %v295_v12 = vadd.f32 %v609_v1, %v259_v4  ;;  %v296_v13 = vadd.f32 %v609_v1, %v260_v6  ;;  %v263_v17 = vmul.f32 %v590_v0, %v227_v11  ;;  %v228_v18 = vld [vmem:[%s598_s23 + $0x28] sm:$0xff]  ;;  %v297_v19 = vadd.f32 %v609_v1, %v261_v9  ;;  %v331_v20 = vld [vmem:[%s604_s26 + $0x20] sm:$0xff]  ;;  %v229_v22 = vld [vmem:[%s598_s23 + $0x30] sm:$0xff] }
  0x12   : > { %v264_v21 = vmul.f32 %v590_v0, %v228_v18  ;;  %v230_v23 = vld [vmem:[%s598_s23 + $0x38] sm:$0xff]  ;;  %v298_v26 = vadd.f32 %v609_v1, %v262_v15  ;;  %v332_v28 = vld [vmem:[%s604_s26 + $0x28] sm:$0xff]  ;;  %v265_v31 = vmul.f32 %v590_v0, %v229_v22  ;;  %v231_v33 = vld [vmem:[%s598_s23 + $0x40] sm:$0xff] }
  0x13   : > { %v359_v24 = vadd.f32 %v327_v5, %v295_v12  ;;  %v360_v25 = vadd.f32 %v328_v8, %v296_v13  ;;  %v299_v27 = vadd.f32 %v609_v1, %v263_v17  ;;  %v361_v29 = vadd.f32 %v329_v14, %v297_v19  ;;  %v232_v34 = vld [vmem:[%s598_s23 + $0x48] sm:$0xff]  ;;  %v333_v39 = vld [vmem:[%s604_s26 + $0x30] sm:$0xff]  ;;  %v334_v40 = vld [vmem:[%s604_s26 + $0x38] sm:$0xff] }
  0x14   : > { %v300_v30 = vadd.f32 %v609_v1, %v264_v21  ;;  %v266_v32 = vmul.f32 %v590_v0, %v230_v23  ;;  %v362_v37 = vadd.f32 %v330_v16, %v298_v26  ;;  %v233_v41 = vld [vmem:[%s598_s23 + $0x50] sm:$0xff]  ;;  %v301_v44 = vadd.f32 %v609_v1, %v265_v31  ;;  %v234_v46 = vld [vmem:[%s598_s23 + $0x58] sm:$0xff]  ;;  %v235_v47 = vld [vmem:[%s598_s23 + $0x60] sm:$0xff] }
  0x15   : > { %v391_v35 = vmax.f32 %v359_v24, 0.0  ;;  %v392_v36 = vmax.f32 %v360_v25, 0.0  ;;  %v363_v38 = vadd.f32 %v331_v20, %v299_v27  ;;  %v393_v42 = vmax.f32 %v361_v29, 0.0  ;;  %v236_v52 = vld [vmem:[%s598_s23 + $0x68] sm:$0xff]  ;;  %v335_v56 = vld [vmem:[%s604_s26 + $0x40] sm:$0xff]  ;;  %v337_v61 = vld [vmem:[%s604_s26 + $0x50] sm:$0xff] }
  0x16   : > { %v364_v43 = vadd.f32 %v332_v28, %v300_v30  ;;  %v302_v45 = vadd.f32 %v609_v1, %v266_v32  ;;  %v394_v48 = vmax.f32 %v362_v37, 0.0  ;;  %v267_v50 = vmul.f32 %v590_v0, %v231_v33  ;;  %v336_v57 = vld [vmem:[%s604_s26 + $0x48] sm:$0xff]  ;;  %v237_v2 = vld [vmem:[%s598_s23 + $0x70] sm:$0xff]  ;;  %v238_v3 = vld [vmem:[%s598_s23 + $0x78] sm:$0xff] }
  0x17   : > { %423 = vst [vmem:[%s640_s5] sm:$0xff] %v391_v35  ;;  %v395_v49 = vmax.f32 %v363_v38, 0.0  ;;  %v268_v51 = vmul.f32 %v590_v0, %v232_v34  ;;  %v365_v54 = vadd.f32 %v333_v39, %v301_v44  ;;  %v269_v58 = vmul.f32 %v590_v0, %v233_v41  ;;  %v338_v7 = vld [vmem:[%s604_s26 + $0x58] sm:$0xff]  ;;  %v339_v8 = vld [vmem:[%s604_s26 + $0x60] sm:$0xff]  ;;  %v340_v14 = vld [vmem:[%s604_s26 + $0x68] sm:$0xff] }
  0x18   : > { %424 = vst [vmem:[%s640_s5 + $0x8] sm:$0xff] %v392_v36  ;;  %v396_v53 = vmax.f32 %v364_v43, 0.0  ;;  %v366_v55 = vadd.f32 %v334_v40, %v302_v45  ;;  %v303_v59 = vadd.f32 %v609_v1, %v267_v50  ;;  %v270_v62 = vmul.f32 %v590_v0, %v234_v46  ;;  %v239_v19 = vld [vmem:[%s598_s23 + $0x80] sm:$0xff]  ;;  %v240_v20 = vld [vmem:[%s598_s23 + $0x88] sm:$0xff]  ;;  %v341_v25 = vld [vmem:[%s604_s26 + $0x70] sm:$0xff] }
  0x19   : > { %425 = vst [vmem:[%s640_s5 + $0x10] sm:$0xff] %v393_v42  ;;  %v304_v60 = vadd.f32 %v609_v1, %v268_v51  ;;  %v271_v63 = vmul.f32 %v590_v0, %v235_v47  ;;  %v397_v4 = vmax.f32 %v365_v54, 0.0  ;;  %v305_v6 = vadd.f32 %v609_v1, %v269_v58  ;;  %v342_v26 = vld [vmem:[%s604_s26 + $0x78] sm:$0xff]  ;;  %v241_v27 = vld [vmem:[%s598_s23 + $0x90] sm:$0xff]  ;;  %v243_v33 = vld [vmem:[%s598_s23 + $0xa0] sm:$0xff] }
  0x1a   : > { %426 = vst [vmem:[%s640_s5 + $0x18] sm:$0xff] %v394_v48  ;;  %v398_v5 = vmax.f32 %v366_v55, 0.0  ;;  %v272_v9 = vmul.f32 %v590_v0, %v236_v52  ;;  %v367_v10 = vadd.f32 %v335_v56, %v303_v59  ;;  %v306_v12 = vadd.f32 %v609_v1, %v270_v62  ;;  %v242_v32 = vld [vmem:[%s598_s23 + $0x98] sm:$0xff]  ;;  %v244_v38 = vld [vmem:[%s598_s23 + $0xa8] sm:$0xff]  ;;  %v343_v42 = vld [vmem:[%s604_s26 + $0x80] sm:$0xff] }
  0x1b   : > { %427 = vst [vmem:[%s640_s5 + $0x20] sm:$0xff] %v395_v49  ;;  %v368_v11 = vadd.f32 %v336_v57, %v304_v60  ;;  %v307_v13 = vadd.f32 %v609_v1, %v271_v63  ;;  %v369_v15 = vadd.f32 %v337_v61, %v305_v6  ;;  %v273_v17 = vmul.f32 %v590_v0, %v237_v2  ;;  %v344_v43 = vld [vmem:[%s604_s26 + $0x88] sm:$0xff]  ;;  %v345_v47 = vld [vmem:[%s604_s26 + $0x90] sm:$0xff]  ;;  %v246_v51 = vld [vmem:[%s598_s23 + $0xb8] sm:$0xff] }
  0x1c   : > { %428 = vst [vmem:[%s640_s5 + $0x28] sm:$0xff] %v396_v53  ;;  %v308_v16 = vadd.f32 %v609_v1, %v272_v9  ;;  %v274_v18 = vmul.f32 %v590_v0, %v238_v3  ;;  %v399_v21 = vmax.f32 %v367_v10, 0.0  ;;  %v370_v23 = vadd.f32 %v338_v7, %v306_v12  ;;  %v245_v50 = vld [vmem:[%s598_s23 + $0xb0] sm:$0xff]  ;;  %v346_v55 = vld [vmem:[%s604_s26 + $0x98] sm:$0xff]  ;;  %v347_v56 = vld [vmem:[%s604_s26 + $0xa0] sm:$0xff] }
  0x1d   : > { %429 = vst [vmem:[%s640_s5 + $0x30] sm:$0xff] %v397_v4  ;;  %v400_v22 = vmax.f32 %v368_v11, 0.0  ;;  %v371_v24 = vadd.f32 %v339_v8, %v307_v13  ;;  %v401_v28 = vmax.f32 %v369_v15, 0.0  ;;  %v309_v30 = vadd.f32 %v609_v1, %v273_v17  ;;  %v348_v62 = vld [vmem:[%s604_s26 + $0xa8] sm:$0xff]  ;;  %v349_v11 = vld [vmem:[%s604_s26 + $0xb0] sm:$0xff]  ;;  %v350_v12 = vld [vmem:[%s604_s26 + $0xb8] sm:$0xff] }
  0x1e   : > { %430 = vst [vmem:[%s640_s5 + $0x38] sm:$0xff] %v398_v5  ;;  %v372_v29 = vadd.f32 %v340_v14, %v308_v16  ;;  %v310_v31 = vadd.f32 %v609_v1, %v274_v18  ;;  %v402_v34 = vmax.f32 %v370_v23, 0.0  ;;  %v275_v36 = vmul.f32 %v590_v0, %v239_v19  ;;  %v247_v5 = vld [vmem:[%s598_s23 + $0xc0] sm:$0xff]  ;;  %v248_v6 = vld [vmem:[%s598_s23 + $0xc8] sm:$0xff]  ;;  %v249_v13 = vld [vmem:[%s598_s23 + $0xd0] sm:$0xff] }
  0x1f   : > { %431 = vst [vmem:[%s640_s5 + $0x40] sm:$0xff] %v399_v21  ;;  %v403_v35 = vmax.f32 %v371_v24, 0.0  ;;  %v276_v37 = vmul.f32 %v590_v0, %v240_v20  ;;  %v373_v40 = vadd.f32 %v341_v25, %v309_v30  ;;  %v277_v44 = vmul.f32 %v590_v0, %v241_v27  ;;  %v250_v18 = vld [vmem:[%s598_s23 + $0xd8] sm:$0xff]  ;;  %v251_v19 = vld [vmem:[%s598_s23 + $0xe0] sm:$0xff]  ;;  %v252_v24 = vld [vmem:[%s598_s23 + $0xe8] sm:$0xff] }
  0x20   : > { %432 = vst [vmem:[%s640_s5 + $0x48] sm:$0xff] %v400_v22  ;;  %v404_v39 = vmax.f32 %v372_v29, 0.0  ;;  %v374_v41 = vadd.f32 %v342_v26, %v310_v31  ;;  %v311_v45 = vadd.f32 %v609_v1, %v275_v36  ;;  %v278_v48 = vmul.f32 %v590_v0, %v242_v32  ;;  %v352_v29 = vld [vmem:[%s604_s26 + $0xc8] sm:$0xff]  ;;  %v253_v36 = vld [vmem:[%s598_s23 + $0xf0] sm:$0xff] }
  0x21   : > { %433 = vst [vmem:[%s640_s5 + $0x50] sm:$0xff] %v401_v28  ;;  %v312_v46 = vadd.f32 %v609_v1, %v276_v37  ;;  %v279_v49 = vmul.f32 %v590_v0, %v243_v33  ;;  %v405_v52 = vmax.f32 %v373_v40, 0.0  ;;  %v313_v54 = vadd.f32 %v609_v1, %v277_v44  ;;  %v351_v28 = vld [vmem:[%s604_s26 + $0xc0] sm:$0xff]  ;;  %v353_v33 = vld [vmem:[%s604_s26 + $0xd0] sm:$0xff]  ;;  %v254_v37 = vld [vmem:[%s598_s23 + $0xf8] sm:$0xff] }
  0x22   : > { %434 = vst [vmem:[%s640_s5 + $0x58] sm:$0xff] %v402_v34  ;;  %v406_v53 = vmax.f32 %v374_v41, 0.0  ;;  %v280_v57 = vmul.f32 %v590_v0, %v244_v38  ;;  %v375_v58 = vadd.f32 %v343_v42, %v311_v45  ;;  %v314_v60 = vadd.f32 %v609_v1, %v278_v48  ;;  %v354_v41 = vld [vmem:[%s604_s26 + $0xd8] sm:$0xff]  ;;  %v355_v42 = vld [vmem:[%s604_s26 + $0xe0] sm:$0xff]  ;;  %v356_v48 = vld [vmem:[%s604_s26 + $0xe8] sm:$0xff] }
  0x23   : > { %435 = vst [vmem:[%s640_s5 + $0x60] sm:$0xff] %v403_v35  ;;  %v376_v59 = vadd.f32 %v344_v43, %v312_v46  ;;  %v315_v61 = vadd.f32 %v609_v1, %v279_v49  ;;  %v377_v63 = vadd.f32 %v345_v47, %v313_v54  ;;  %v281_v3 = vmul.f32 %v590_v0, %v245_v50 }
  0x24   : > { %436 = vst [vmem:[%s640_s5 + $0x68] sm:$0xff] %v404_v39  ;;  %v316_v2 = vadd.f32 %v609_v1, %v280_v57  ;;  %v282_v4 = vmul.f32 %v590_v0, %v246_v51  ;;  %v407_v7 = vmax.f32 %v375_v58, 0.0  ;;  %v378_v9 = vadd.f32 %v346_v55, %v314_v60  ;;  %v357_v57 = vld [vmem:[%s604_s26 + $0xf0] sm:$0xff]  ;;  %v358_v58 = vld [vmem:[%s604_s26 + $0xf8] sm:$0xff] }
  0x25   : > { %437 = vst [vmem:[%s640_s5 + $0x70] sm:$0xff] %v405_v52  ;;  %v408_v8 = vmax.f32 %v376_v59, 0.0  ;;  %v379_v10 = vadd.f32 %v347_v56, %v315_v61  ;;  %v409_v14 = vmax.f32 %v377_v63, 0.0  ;;  %v317_v16 = vadd.f32 %v609_v1, %v281_v3 }
  0x26   : > { %438 = vst [vmem:[%s640_s5 + $0x78] sm:$0xff] %v406_v53  ;;  %v380_v15 = vadd.f32 %v348_v62, %v316_v2  ;;  %v318_v17 = vadd.f32 %v609_v1, %v282_v4  ;;  %v410_v20 = vmax.f32 %v378_v9, 0.0  ;;  %v283_v22 = vmul.f32 %v590_v0, %v247_v5 }
  0x27   : > { %439 = vst [vmem:[%s640_s5 + $0x80] sm:$0xff] %v407_v7  ;;  %v411_v21 = vmax.f32 %v379_v10, 0.0  ;;  %v284_v23 = vmul.f32 %v590_v0, %v248_v6  ;;  %v381_v26 = vadd.f32 %v349_v11, %v317_v16  ;;  %v285_v30 = vmul.f32 %v590_v0, %v249_v13 }
  0x28   : > { %440 = vst [vmem:[%s640_s5 + $0x88] sm:$0xff] %v408_v8  ;;  %v412_v25 = vmax.f32 %v380_v15, 0.0  ;;  %v382_v27 = vadd.f32 %v350_v12, %v318_v17  ;;  %v319_v31 = vadd.f32 %v609_v1, %v283_v22  ;;  %v286_v34 = vmul.f32 %v590_v0, %v250_v18 }
  0x29   : > { %441 = vst [vmem:[%s640_s5 + $0x90] sm:$0xff] %v409_v14  ;;  %v320_v32 = vadd.f32 %v609_v1, %v284_v23  ;;  %v287_v35 = vmul.f32 %v590_v0, %v251_v19  ;;  %v413_v38 = vmax.f32 %v381_v26, 0.0  ;;  %v321_v40 = vadd.f32 %v609_v1, %v285_v30 }
  0x2a   : > { %442 = vst [vmem:[%s640_s5 + $0x98] sm:$0xff] %v410_v20  ;;  %v414_v39 = vmax.f32 %v382_v27, 0.0  ;;  %v288_v43 = vmul.f32 %v590_v0, %v252_v24  ;;  %v383_v44 = vadd.f32 %v351_v28, %v319_v31  ;;  %v322_v46 = vadd.f32 %v609_v1, %v286_v34 }
  0x2b   : > { %443 = vst [vmem:[%s640_s5 + $0xa0] sm:$0xff] %v411_v21  ;;  %v384_v45 = vadd.f32 %v352_v29, %v320_v32  ;;  %v323_v47 = vadd.f32 %v609_v1, %v287_v35  ;;  %v385_v49 = vadd.f32 %v353_v33, %v321_v40  ;;  %v289_v51 = vmul.f32 %v590_v0, %v253_v36 }
  0x2c   : > { %444 = vst [vmem:[%s640_s5 + $0xa8] sm:$0xff] %v412_v25  ;;  %v324_v50 = vadd.f32 %v609_v1, %v288_v43  ;;  %v290_v52 = vmul.f32 %v590_v0, %v254_v37  ;;  %v415_v53 = vmax.f32 %v383_v44, 0.0  ;;  %v386_v55 = vadd.f32 %v354_v41, %v322_v46 }
  0x2d   : > { %445 = vst [vmem:[%s640_s5 + $0xb0] sm:$0xff] %v413_v38  ;;  %v416_v54 = vmax.f32 %v384_v45, 0.0  ;;  %v387_v56 = vadd.f32 %v355_v42, %v323_v47  ;;  %v417_v59 = vmax.f32 %v385_v49, 0.0  ;;  %v325_v61 = vadd.f32 %v609_v1, %v289_v51 }
  0x2e   : > { %446 = vst [vmem:[%s640_s5 + $0xb8] sm:$0xff] %v414_v39  ;;  %v388_v60 = vadd.f32 %v356_v48, %v324_v50  ;;  %v326_v0 = vadd.f32 %v609_v1, %v290_v52  ;;  %v418_v62 = vmax.f32 %v386_v55, 0.0 }
  0x2f   : > { %447 = vst [vmem:[%s640_s5 + $0xc0] sm:$0xff] %v415_v53  ;;  %v419_v63 = vmax.f32 %v387_v56, 0.0  ;;  %v389_v3 = vadd.f32 %v357_v57, %v325_v61 }
  0x30   : > { %448 = vst [vmem:[%s640_s5 + $0xc8] sm:$0xff] %v416_v54  ;;  %v420_v2 = vmax.f32 %v388_v60, 0.0  ;;  %v390_v4 = vadd.f32 %v358_v58, %v326_v0 }
  0x31   : > { %449 = vst [vmem:[%s640_s5 + $0xd0] sm:$0xff] %v417_v59  ;;  %v421_v5 = vmax.f32 %v389_v3, 0.0 }
  0x32   : > { %450 = vst [vmem:[%s640_s5 + $0xd8] sm:$0xff] %v418_v62  ;;  %v422_v6 = vmax.f32 %v390_v4, 0.0 }
  0x33   : > { %451 = vst [vmem:[%s640_s5 + $0xe0] sm:$0xff] %v419_v63 }
  0x34   : > { %452 = vst [vmem:[%s640_s5 + $0xe8] sm:$0xff] %v420_v2 }
  0x35   : > { %453 = vst [vmem:[%s640_s5 + $0xf0] sm:$0xff] %v421_v5 }
  0x36   : > { %454 = vst [vmem:[%s640_s5 + $0xf8] sm:$0xff] %v422_v6 }
  0x37 PF: > { %s14_s15 = sadd.s32 1, %s552_s15  }
  0x38   : > { %p11_p4 = scmp.ge.s32.totalorder %s14_s15, 4  }
  0x3a   :  { %13 = sbr.rel (!%p11_p4) target bundleno = 1 (0x1), region = 69 }

// kernel: bottleneck_forward.5
= control target key start
LH: loop header
LB: loop body
LE: loop exit
PB: predicated region body
PF: predicated region fallthrough
CT: control target
= control target key end

     0   :  { %s5215_s18 = smov 0   ;;  %s6325_s0 = inlined_call_operand.vmem [shape: f32[1,128], index: 0, kind: input, shape index: {}]   ;;  %s6326_s1 = inlined_call_operand.vmem [shape: f32[1,128], index: 1, kind: input, shape index: {}]   ;;  %s6327_s2 = inlined_call_operand.vmem [shape: f32[512,128], index: 2, kind: input, shape index: {}]   ;;  %s6328_s3 = inlined_call_operand.vmem [shape: bf16[3,3,128,128], index: 3, kind: input, shape index: {}]   ;;  %s6329_s4 = inlined_call_operand.vmem [shape: f32[512,128], index: 4, kind: output, shape index: {0}]   ;;  %s6330_s5 = inlined_call_operand.vmem [shape: f32[2,2,128], index: 5, kind: output, shape index: {1}]  }
   0x1 LB: > { %s5221_s19 = sadd.s32 4294967295, %s5180_s18   ;;  %p4350_p0 = scmp.ge.s32.totalorder %s5180_s18, 1  ;;  %s5180_s18 = sphi %s5215_s18, %s16_s18  }
   0x2   : > { %p191_p1 = scmp.lt.s32.totalorder %s5180_s18, 3 }
   0x4   : > { %p192_p2 = pnand %p4350_p0, %p191_p1 }
   0x5   : > { %s4351_s22 = sshll.u32 (!%p192_p2), %s5221_s19, 5  ;;  %p235_p4 = scmp.lt.s32.totalorder (!%p192_p2), %s5221_s19, 1 }
   0x6   : > { %195 = sbr.rel (%p192_p2) target bundleno = 767 (0x2ff), region = 36  ;;  %p224_p3 = scmp.lt.s32.totalorder (!%p192_p2), %s4351_s22, 63 }
   0xb   : > { %v5069_v0 = vld [vmem:[%s6328_s3 + $0x38] sm:$0xff]  ;;  %v5182_v1 = vmov 0.0   ;;  %v5068_v2 = vld [vmem:[%s6328_s3 + $0x30] sm:$0xff]  ;;  %s6446_s22 = smov (!%p224_p3, %s4351_s22), 63  ;;  %v413_v3 = vlaneseq  ;;  %v5237_v4 = vld [vmem:[%s6325_s0] ss:$0 sm:$0xff] }
   0xc   : > { %239 = vst [vmem:[#allocation2] sm:$0xff] %v5182_v1  ;;  %5134 = vmatpush.bf16.msra.mxu1 %v5069_v0  ;;  %5135 = vmatpush.bf16.msra.mxu2 %v5069_v0  ;;  %s4352_s27 = sshll.u32 %s6446_s22, 3  ;;  %v5067_v5 = vld [vmem:[%s6328_s3 + $0x28] sm:$0xff]  ;;  %v5253_v6 = vld [vmem:[%s6326_s1] ss:$0 sm:$0xff]  ;;  %v5065_v41 = vld [vmem:[%s6328_s3 + $0x18] sm:$0xff] }
   0xd   : > { %240 = vst [vmem:[#allocation2 + $0x8] sm:$0xff] %v5182_v1  ;;  %5136 = vmatpush.bf16.msra.mxu3 %v5069_v0  ;;  %1230 = vmatpush.bf16.msra.mxu0 %v5069_v0  ;;  %s5248_s7 = scalar_lea.vmem %s6327_s2, %s4352_s27  ;;  %v5258_v10 = vshrl.u32 %v413_v3, 7  ;;  %v5066_v21 = vld [vmem:[%s6328_s3 + $0x20] sm:$0xff]  ;;  %v5064_v59 = vld [vmem:[%s6328_s3 + $0x10] sm:$0xff]  ;;  %vm6351_vm3 = vmmov 1   ;;  %s5787_s12 = scalar_lea.vmem %s6329_s4, %s4352_s27 }
   0xe   : > { %241 = vst [vmem:[#allocation2 + $0x10] sm:$0xff] %v5182_v1  ;;  %v250_v7 = vld [vmem:[%s5248_s7 + $0x28] sm:$0xff]  ;;  %v251_v8 = vld [vmem:[%s5248_s7 + $0x30] sm:$0xff]  ;;  %v252_v9 = vld [vmem:[%s5248_s7 + $0x38] sm:$0xff]  ;;  %s6448_s19 = smov (!%p235_p4, %s5221_s19), 1 }
   0xf   : > { %242 = vst [vmem:[#allocation2 + $0x118] sm:$0xff] %v5182_v1  ;;  %v286_v11 = vmul.f32 %v5237_v4, %v250_v7  ;;  %v287_v12 = vmul.f32 %v5237_v4, %v251_v8  ;;  %v288_v13 = vmul.f32 %v5237_v4, %v252_v9  ;;  %v258_v14 = vld [vmem:[%s5248_s7 + $0x68] sm:$0xff]  ;;  %v259_v15 = vld [vmem:[%s5248_s7 + $0x70] sm:$0xff]  ;;  %v260_v16 = vld [vmem:[%s5248_s7 + $0x78] sm:$0xff]  ;;  %v422_v26 = vadd.s32 64, %v5258_v10  ;;  %s4355_s11 = sshll.u32 %s6448_s19, 1 }
  0x10   : > { %5137 = vmatpush.bf16.msra.mxu1 %v5068_v2  ;;  %5138 = vmatpush.bf16.msra.mxu2 %v5068_v2  ;;  %243 = vst [vmem:[#allocation2 + $0x120] sm:$0xff] %v5182_v1  ;;  %v294_v17 = vmul.f32 %v5237_v4, %v258_v14  ;;  %v295_v18 = vmul.f32 %v5237_v4, %v259_v15  ;;  %v266_v20 = vld [vmem:[%s5248_s7 + $0xa8] sm:$0xff]  ;;  %v267_v25 = vld [vmem:[%s5248_s7 + $0xb0] sm:$0xff]  ;;  %v268_v30 = vld [vmem:[%s5248_s7 + $0xb8] sm:$0xff]  ;;  %v5286_v38 = vadd.s32 128, %v5258_v10  ;;  %v438_v40 = vadd.s32 192, %v5258_v10  ;;  %s238_s27 = scalar_lea.vmem %s6330_s5, %s4355_s11 }
  0x11   : > { %5139 = vmatpush.bf16.msra.mxu3 %v5068_v2  ;;  %1231 = vmatpush.bf16.msra.mxu0 %v5068_v2  ;;  %244 = vst [vmem:[#allocation2 + $0x128] sm:$0xff] %v5182_v1  ;;  %v296_v19 = vmul.f32 %v5237_v4, %v260_v16  ;;  %v322_v22 = vadd.f32 %v5253_v6, %v286_v11  ;;  %v253_v35 = vld [vmem:[%s5248_s7 + $0x40] sm:$0xff]  ;;  %v254_v36 = vld [vmem:[%s5248_s7 + $0x48] sm:$0xff]  ;;  %v506_v51 = vand.u32 15, %v422_v26  ;;  %v255_v9 = vld [vmem:[%s5248_s7 + $0x50] sm:$0xff] }
  0x12   : > { %v323_v23 = vadd.f32 %v5253_v6, %v287_v12  ;;  %v324_v24 = vadd.f32 %v5253_v6, %v288_v13  ;;  %v330_v27 = vadd.f32 %v5253_v6, %v294_v17  ;;  %v331_v28 = vadd.f32 %v5253_v6, %v295_v18  ;;  %v261_v46 = vld [vmem:[%s5248_s7 + $0x80] sm:$0xff]  ;;  %v262_v50 = vld [vmem:[%s5248_s7 + $0x88] sm:$0xff]  ;;  %v256_v11 = vld [vmem:[%s5248_s7 + $0x58] sm:$0xff] }
  0x13   : > { %v332_v29 = vadd.f32 %v5253_v6, %v296_v19  ;;  %v354_v31 = vmax.f32 %v322_v22, 0.0  ;;  %v302_v34 = vmul.f32 %v5237_v4, %v266_v20  ;;  %v303_v39 = vmul.f32 %v5237_v4, %v267_v25  ;;  %v269_v58 = vld [vmem:[%s5248_s7 + $0xc0] sm:$0xff]  ;;  %v270_v62 = vld [vmem:[%s5248_s7 + $0xc8] sm:$0xff]  ;;  %v264_v25 = vld [vmem:[%s5248_s7 + $0x98] sm:$0xff] }
  0x14   : > { %5140 = vmatpush.bf16.msra.mxu1 %v5067_v5  ;;  %5141 = vmatpush.bf16.msra.mxu2 %v5067_v5  ;;  %v355_v32 = vmax.f32 %v323_v23, 0.0  ;;  %v356_v33 = vmax.f32 %v324_v24, 0.0  ;;  %v362_v37 = vmax.f32 %v330_v27, 0.0  ;;  %v363_v42 = vmax.f32 %v331_v28, 0.0  ;;  %v5063_v15 = vld [vmem:[%s6328_s3 + $0x8] sm:$0xff]  ;;  %v263_v24 = vld [vmem:[%s5248_s7 + $0x90] sm:$0xff] }
  0x15   : > { %5142 = vmatpush.bf16.msra.mxu3 %v5067_v5  ;;  %1232 = vmatpush.bf16.msra.mxu0 %v5067_v5  ;;  %386 = vst [vmem:[#allocation2 + $0x40] sm:$0xff] %v354_v31  ;;  %v364_v43 = vmax.f32 %v332_v29, 0.0  ;;  %v304_v44 = vmul.f32 %v5237_v4, %v268_v30  ;;  %v338_v45 = vadd.f32 %v5253_v6, %v302_v34  ;;  %v562_v63 = vand.u32 15, %v5286_v38  ;;  %v5335_v26 = vld [vmem:[%s6328_s3] sm:$0xff]  ;;  %v5077_v31 = vld [vmem:[%s6328_s3 + $0x78] sm:$0xff]  ;;  %v246_v34 = vld [vmem:[%s5248_s7 + $0x8] sm:$0xff] }
  0x16   : > { %387 = vst [vmem:[#allocation2 + $0x48] sm:$0xff] %v355_v32  ;;  %v339_v47 = vadd.f32 %v5253_v6, %v303_v39  ;;  %v289_v48 = vmul.f32 %v5237_v4, %v253_v35  ;;  %v290_v49 = vmul.f32 %v5237_v4, %v254_v36  ;;  %v297_v57 = vmul.f32 %v5237_v4, %v261_v46  ;;  %v245_v29 = vld [vmem:[%s5248_s7] sm:$0xff]  ;;  %v271_v35 = vld [vmem:[%s5248_s7 + $0xd0] sm:$0xff]  ;;  %v5085_v39 = vld [vmem:[%s6328_s3 + $0xb8] sm:$0xff] }
  0x17   : > { %388 = vst [vmem:[#allocation2 + $0x50] sm:$0xff] %v356_v33  ;;  %v340_v52 = vadd.f32 %v5253_v6, %v304_v44  ;;  %v370_v53 = vmax.f32 %v338_v45, 0.0  ;;  %v298_v61 = vmul.f32 %v5237_v4, %v262_v50  ;;  %v618_v0 = vand.u32 15, %v438_v40 }
  0x18   : > { %5143 = vmatpush.bf16.msra.mxu1 %v5066_v21  ;;  %5144 = vmatpush.bf16.msra.mxu2 %v5066_v21  ;;  %394 = vst [vmem:[#allocation2 + $0x80] sm:$0xff] %v362_v37  ;;  %v371_v54 = vmax.f32 %v339_v47, 0.0  ;;  %v325_v55 = vadd.f32 %v5253_v6, %v289_v48  ;;  %v326_v56 = vadd.f32 %v5253_v6, %v290_v49  ;;  %v902_v3 = vadd.s32 4294967295, %v506_v51 }
  0x19   : > { %5145 = vmatpush.bf16.msra.mxu3 %v5066_v21  ;;  %1233 = vmatpush.bf16.msra.mxu0 %v5066_v21  ;;  %395 = vst [vmem:[#allocation2 + $0x88] sm:$0xff] %v363_v42  ;;  %v372_v60 = vmax.f32 %v340_v52, 0.0  ;;  %v333_v2 = vadd.f32 %v5253_v6, %v297_v57  ;;  %v334_v7 = vadd.f32 %v5253_v6, %v298_v61  ;;  %v450_v17 = vand.u32 15, %v5258_v10  ;;  %v272_v52 = vld [vmem:[%s5248_s7 + $0xd8] sm:$0xff]  ;;  %v862_v57 = vld [vmem:[#allocation2 + $0x7] sm:$0xff] }
  0x1a   : > { %396 = vst [vmem:[#allocation2 + $0x90] sm:$0xff] %v364_v43  ;;  %v357_v1 = vmax.f32 %v325_v55, 0.0  ;;  %v358_v5 = vmax.f32 %v326_v56, 0.0  ;;  %v305_v8 = vmul.f32 %v5237_v4, %v269_v58  ;;  %v306_v13 = vmul.f32 %v5237_v4, %v270_v62  ;;  %v5093_v43 = vld [vmem:[%s6328_s3 + $0xf8] sm:$0xff]  ;;  %v863_v58 = vld [vmem:[#allocation2 + $0xf] sm:$0xff] }
  0x1b   : > { %402 = vst [vmem:[#allocation2 + $0xc0] sm:$0xff] %v370_v53  ;;  %v365_v12 = vmax.f32 %v333_v2, 0.0  ;;  %v291_v14 = vmul.f32 %v5237_v4, %v255_v9  ;;  %v366_v16 = vmax.f32 %v334_v7, 0.0  ;;  %v292_v19 = vmul.f32 %v5237_v4, %v256_v11  ;;  %v5084_v9 = vld [vmem:[%s6328_s3 + $0xb0] sm:$0xff] }
  0x1c   : > { %5146 = vmatpush.bf16.msra.mxu1 %v5065_v41  ;;  %5147 = vmatpush.bf16.msra.mxu2 %v5065_v41  ;;  %403 = vst [vmem:[#allocation2 + $0xc8] sm:$0xff] %v371_v54  ;;  %v341_v18 = vadd.f32 %v5253_v6, %v305_v8  ;;  %v910_v20 = vadd.s32 4294967295, %v562_v63  ;;  %v5324_v21 = vadd.s32 4294967295, %v618_v0  ;;  %v342_v22 = vadd.f32 %v5253_v6, %v306_v13  ;;  %v5092_v13 = vld [vmem:[%s6328_s3 + $0xf0] sm:$0xff] }
  0x1d   : > { %5148 = vmatpush.bf16.msra.mxu3 %v5065_v41  ;;  %1234 = vmatpush.bf16.msra.mxu0 %v5065_v41  ;;  %404 = vst [vmem:[#allocation2 + $0xd0] sm:$0xff] %v372_v60  ;;  %v5328_v23 = vadd.f32 %v5253_v6, %v291_v14  ;;  %vm934_vm0 = vcmp.ge.s32.totalorder %v902_v3, 0  ;;  %v5338_v28 = vadd.f32 %v5253_v6, %v292_v19  ;;  %v5341_v30 = vld [vmem:[#allocation2 + $0x47] sm:$0xff]  ;;  %v5360_v44 = vadd.s32 80, %v5258_v10  ;;  %v5076_v3 = vld [vmem:[%s6328_s3 + $0x70] sm:$0xff] }
  0x1e   : > { %389 = vst [vmem:[#allocation2 + $0x58] sm:$0xff] %v357_v1  ;;  %v373_v27 = vmax.f32 %v341_v18, 0.0  ;;  %v374_v32 = vmax.f32 %v342_v22, 0.0  ;;  %v871_v36 = vld [vmem:[#allocation2 + $0x4f] sm:$0xff]  ;;  %v299_v41 = vmul.f32 %v5237_v4, %v263_v24  ;;  %v300_v42 = vmul.f32 %v5237_v4, %v264_v25  ;;  %vm5364_vm4 = vmpackc.low %vm6351_vm3, %vm934_vm0 }
  0x1f   : > { %390 = vst [vmem:[#allocation2 + $0x60] sm:$0xff] %v358_v5  ;;  %v359_v33 = vmax.f32 %v5328_v23, 0.0  ;;  %v360_v40 = vmax.f32 %v5338_v28, 0.0  ;;  %vm942_vm1 = vcmp.ge.s32.totalorder %v910_v20, 0  ;;  %vm950_vm2 = vcmp.ge.s32.totalorder %v5324_v21, 0  ;;  %v247_v1 = vld [vmem:[%s5248_s7 + $0x10] sm:$0xff] }
  0x20   : > { %5149 = vmatpush.bf16.msra.mxu1 %v5064_v59  ;;  %5150 = vmatpush.bf16.msra.mxu2 %v5064_v59  ;;  %397 = vst [vmem:[#allocation2 + $0x98] sm:$0xff] %v365_v12  ;;  %v878_v37 = vld [vmem:[#allocation2 + $0x87] sm:$0xff]  ;;  %v894_v45 = vadd.s32 4294967295, %v450_v17  ;;  %v6359_v46 = vmov 0  ;;  %v335_v48 = vadd.f32 %v5253_v6, %v299_v41  ;;  %v336_v49 = vadd.f32 %v5253_v6, %v300_v42  ;;  %vm5384_vm5 = vmpackc.low %vm6351_vm3, %vm942_vm1  ;;  %v5101_v5 = vld [vmem:[%s6328_s3 + $0x138] sm:$0xff] }
  0x21   : > { %5151 = vmatpush.bf16.msra.mxu3 %v5064_v59  ;;  %1235 = vmatpush.bf16.msra.mxu0 %v5064_v59  ;;  %v879_v38 = vld [vmem:[#allocation2 + $0x8f] sm:$0xff]  ;;  %398 = vst [vmem:[#allocation2 + $0xa0] sm:$0xff] %v366_v16  ;;  %v6360_v46 = vsel %vm5364_vm4, 4294967295, %v6359_v46  ;;  %v281_v50 = vmul.f32 %v5237_v4, %v245_v29  ;;  %v282_v51 = vmul.f32 %v5237_v4, %v246_v34  ;;  %v5375_v56 = vadd.s32 144, %v5258_v10  ;;  %vm5398_vm6 = vmpackc.low %vm6351_vm3, %vm950_vm2  ;;  %v248_v16 = vld [vmem:[%s5248_s7 + $0x18] sm:$0xff] }
  0x22   : > { %405 = vst [vmem:[#allocation2 + $0xd8] sm:$0xff] %v373_v27  ;;  %v4401_v53 = vpack.c.bf16 %v871_v36, %v5341_v30  ;;  %v4413_v54 = vpack.c.bf16 %v879_v38, %v878_v37  ;;  %v307_v59 = vmul.f32 %v5237_v4, %v271_v35  ;;  %v6361_v60 = vmov 0  ;;  %v5075_v25 = vld [vmem:[%s6328_s3 + $0x68] sm:$0xff]  ;;  %v5100_v29 = vld [vmem:[%s6328_s3 + $0x130] sm:$0xff]  ;;  %v257_v41 = vld [vmem:[%s5248_s7 + $0x60] sm:$0xff] }
  0x23   : > { %v886_v47 = vld [vmem:[#allocation2 + $0xc7] sm:$0xff]  ;;  %406 = vst [vmem:[#allocation2 + $0xe0] sm:$0xff] %v374_v32  ;;  %v6362_v60 = vsel %vm5384_vm5, 4294967295, %v6361_v60  ;;  %v367_v62 = vmax.f32 %v335_v48, 0.0  ;;  %v368_v63 = vmax.f32 %v336_v49, 0.0  ;;  %v5391_v0 = vadd.f32 %v5253_v6, %v281_v50 }
  0x24   : > { %5152 = vmatpush.bf16.msra.mxu1 %v5063_v15  ;;  %5153 = vmatpush.bf16.msra.mxu2 %v5063_v15  ;;  %v887_v55 = vld [vmem:[#allocation2 + $0xcf] sm:$0xff]  ;;  %391 = vst [vmem:[#allocation2 + $0x68] sm:$0xff] %v359_v33  ;;  %v6363_v2 = vmov 0  ;;  %vm926_vm7 = vcmp.ge.s32.totalorder %v894_v45, 0  ;;  %v5409_v7 = vadd.f32 %v5253_v6, %v282_v51  ;;  %v308_v8 = vmul.f32 %v5237_v4, %v272_v52  ;;  %v265_v42 = vld [vmem:[%s5248_s7 + $0xa0] sm:$0xff] }
  0x25   : > { %5154 = vmatpush.bf16.msra.mxu3 %v5063_v15  ;;  %1236 = vmatpush.bf16.msra.mxu0 %v5063_v15  ;;  %v4425_v61 = vpack.c.bf16 %v887_v55, %v886_v47  ;;  %392 = vst [vmem:[#allocation2 + $0x70] sm:$0xff] %v360_v40  ;;  %v6364_v2 = vsel %vm5398_vm6, 4294967295, %v6363_v2  ;;  %v4389_v11 = vpack.c.bf16 %v863_v58, %v862_v57  ;;  %v440_v12 = vadd.s32 208, %v5258_v10  ;;  %vm5436_vm8 = vmpackc.low %vm6351_vm3, %vm926_vm7  ;;  %v5083_v32 = vld [vmem:[%s6328_s3 + $0xa8] sm:$0xff]  ;;  %v249_v57 = vld [vmem:[%s5248_s7 + $0x20] sm:$0xff] }
  0x26   : > { %399 = vst [vmem:[#allocation2 + $0xa8] sm:$0xff] %v367_v62  ;;  %v349_v14 = vmax.f32 %v5391_v0, 0.0  ;;  %v343_v15 = vadd.f32 %v5253_v6, %v307_v59  ;;  %v520_v17 = vand.u32 15, %v5360_v44  ;;  %v350_v18 = vmax.f32 %v5409_v7, 0.0  ;;  %v5091_v35 = vld [vmem:[%s6328_s3 + $0xe8] sm:$0xff]  ;;  %v5074_v44 = vld [vmem:[%s6328_s3 + $0x60] sm:$0xff] }
  0x27   : > { %400 = vst [vmem:[#allocation2 + $0xb0] sm:$0xff] %v368_v63  ;;  %v344_v19 = vadd.f32 %v5253_v6, %v308_v8  ;;  %v283_v20 = vmul.f32 %v5237_v4, %v247_v1  ;;  %v576_v21 = vand.u32 15, %v5375_v56  ;;  %v6365_v22 = vmov 0  ;;  %v5099_v47 = vld [vmem:[%s6328_s3 + $0x128] sm:$0xff]  ;;  %v872_v58 = vld [vmem:[#allocation2 + $0x57] sm:$0xff]  ;;  %v873_v62 = vld [vmem:[#allocation2 + $0x5f] sm:$0xff] }
  0x28   : > { %5155 = vmatpush.bf16.msra.mxu1 %v5335_v26  ;;  %5156 = vmatpush.bf16.msra.mxu2 %v5335_v26  ;;  %v6366_v22 = vsel %vm5436_vm8, 4294967295, %v6365_v22  ;;  %381 = vst [vmem:[#allocation2 + $0x18] sm:$0xff] %v349_v14  ;;  %v375_v24 = vmax.f32 %v343_v15, 0.0  ;;  %v284_v30 = vmul.f32 %v5237_v4, %v248_v16  ;;  %v632_v34 = vand.u32 15, %v440_v12  ;;  %v274_v51 = vld [vmem:[%s5248_s7 + $0xe8] sm:$0xff]  ;;  %v880_v63 = vld [vmem:[#allocation2 + $0x97] sm:$0xff] }
  0x29   : > { %5157 = vmatpush.bf16.msra.mxu3 %v5335_v26  ;;  %1237 = vmatpush.bf16.msra.mxu0 %v5335_v26  ;;  %382 = vst [vmem:[#allocation2 + $0x20] sm:$0xff] %v350_v18  ;;  %v416_v26 = vadd.s32 16, %v5258_v10  ;;  %v376_v27 = vmax.f32 %v344_v19, 0.0  ;;  %v904_v36 = vadd.s32 4294967295, %v520_v17  ;;  %v293_v48 = vmul.f32 %v5237_v4, %v257_v41  ;;  %v881_v1 = vld [vmem:[#allocation2 + $0x9f] sm:$0xff] }
  0x2a   : > { %407 = vst [vmem:[#allocation2 + $0xe8] sm:$0xff] %v375_v24  ;;  %v5464_v37 = vadd.f32 %v5253_v6, %v284_v30  ;;  %v301_v49 = vmul.f32 %v5237_v4, %v265_v42  ;;  %v920_v52 = vadd.s32 4294967295, %v632_v34  ;;  %v310_v56 = vmul.f32 %v5237_v4, %v274_v51  ;;  %v5073_v12 = vld [vmem:[%s6328_s3 + $0x58] sm:$0xff]  ;;  %v5080_v42 = vld [vmem:[%s6328_s3 + $0x90] sm:$0xff]  ;;  %v5071_v51 = vld [vmem:[%s6328_s3 + $0x48] sm:$0xff] }
  0x2b   : > { %4402 = vmatmul.msk.bf16.vlgmr.msra.gmra.mxu1 %vm5364_vm4, %v4401_v53  ;;  %4414 = vmatmul.msk.bf16.vlgmr.msra.gmra.mxu2 %vm5384_vm5, %v4413_v54  ;;  %408 = vst [vmem:[#allocation2 + $0xf0] sm:$0xff] %v376_v27  ;;  %v464_v45 = vand.u32 15, %v416_v26  ;;  %v5082_v53 = vld [vmem:[%s6328_s3 + $0xa0] sm:$0xff]  ;;  %vm936_vm9 = vcmp.ge.s32.totalorder %v904_v36, 0  ;;  %v5492_v59 = vadd.f32 %v5253_v6, %v293_v48  ;;  %v285_v8 = vmul.f32 %v5237_v4, %v249_v57  ;;  %v5081_v17 = vld [vmem:[%s6328_s3 + $0x98] sm:$0xff] }
  0x2c   : > { %1528 = vmatpush.bf16.msrb.mxu1 %v5077_v31  ;;  %2050 = vmatpush.bf16.msrb.mxu2 %v5085_v39  ;;  %v5453_v31 = vadd.f32 %v5253_v6, %v283_v20  ;;  %v912_v39 = vadd.s32 4294967295, %v576_v21  ;;  %v352_v50 = vmax.f32 %v5464_v37, 0.0  ;;  %v5090_v54 = vld [vmem:[%s6328_s3 + $0xe0] sm:$0xff]  ;;  %vm952_vm11 = vcmp.ge.s32.totalorder %v920_v52, 0  ;;  %vm5515_vm12 = vmpackc.low %vm6351_vm3, %vm936_vm9  ;;  %v5108_v37 = vld [vmem:[%s6328_s3 + $0x170] sm:$0xff] }
  0x2d   : > { %2380 = vmatpush.bf16.msrb.mxu3 %v5093_v43  ;;  %2678 = vmatpush.bf16.msrb.mxu0 %v5101_v5  ;;  %v273_v43 = vld [vmem:[%s5248_s7 + $0xe0] sm:$0xff]  ;;  %v346_v5 = vadd.f32 %v5253_v6, %v310_v56  ;;  %v361_v15 = vmax.f32 %v5492_v59, 0.0  ;;  %v5511_v21 = vadd.f32 %v5253_v6, %v285_v8  ;;  %v6367_v24 = vmov 0  ;;  %vm5534_vm14 = vmpackc.low %vm6351_vm3, %vm952_vm11  ;;  %v5097_v56 = vld [vmem:[%s6328_s3 + $0x118] sm:$0xff] }
  0x2e   : > { %4426 = vmatmul.msk.bf16.vlgmr.msra.gmra.mxu3 %vm5398_vm6, %v4425_v61  ;;  %4390 = vmatmul.msk.bf16.vlgmr.msra.gmra.mxu0 %vm5436_vm8, %v4389_v11  ;;  %v351_v38 = vmax.f32 %v5453_v31, 0.0  ;;  %v309_v55 = vmul.f32 %v5237_v4, %v273_v43  ;;  %v337_v61 = vadd.f32 %v5253_v6, %v301_v49  ;;  %384 = vst [vmem:[#allocation2 + $0x30] sm:$0xff] %v352_v50  ;;  %vm944_vm10 = vcmp.ge.s32.totalorder %v912_v39, 0  ;;  %v889_v11 = vld [vmem:[#allocation2 + $0xdf] sm:$0xff]  ;;  %v5072_v39 = vld [vmem:[%s6328_s3 + $0x50] sm:$0xff] }
  0x2f   : > { %v5089_v4 = vld [vmem:[%s6328_s3 + $0xd8] sm:$0xff]  ;;  %v378_v20 = vmax.f32 %v346_v5, 0.0  ;;  %v6368_v24 = vsel %vm5515_vm12, 4294967295, %v6367_v24  ;;  %v4416_v26 = vpack.c.bf16 %v881_v1, %v880_v63  ;;  %v426_v27 = vadd.s32 96, %v5258_v10  ;;  %393 = vst [vmem:[#allocation2 + $0x78] sm:$0xff] %v361_v15  ;;  %vm5526_vm13 = vmpackc.low %vm6351_vm3, %vm944_vm10  ;;  %v5098_v43 = vld [vmem:[%s6328_s3 + $0x120] sm:$0xff] }
  0x30   : > { %1529 = vmatpush.bf16.msrb.mxu1 %v5076_v3  ;;  %2051 = vmatpush.bf16.msrb.mxu2 %v5084_v9  ;;  %383 = vst [vmem:[#allocation2 + $0x28] sm:$0xff] %v351_v38  ;;  %v345_v3 = vadd.f32 %v5253_v6, %v309_v55  ;;  %v888_v9 = vld [vmem:[#allocation2 + $0xd7] sm:$0xff]  ;;  %v369_v16 = vmax.f32 %v337_v61, 0.0  ;;  %v434_v30 = vadd.s32 160, %v5258_v10  ;;  %v865_v34 = vld [vmem:[#allocation2 + $0x1f] sm:$0xff]  ;;  %v6371_v36 = vmov 0 }
  0x31   : > { %2381 = vmatpush.bf16.msrb.mxu3 %v5092_v13  ;;  %2679 = vmatpush.bf16.msrb.mxu0 %v5100_v29  ;;  %v896_v13 = vadd.s32 4294967295, %v464_v45  ;;  %v6369_v29 = vmov 0  ;;  %v4428_v6 = vpack.c.bf16 %v889_v11, %v888_v9  ;;  %v6372_v36 = vsel %vm5534_vm14, 4294967295, %v6371_v36  ;;  %410 = vst [vmem:[#allocation2 + $0x100] sm:$0xff] %v378_v20  ;;  %v5088_v49 = vld [vmem:[%s6328_s3 + $0xd0] sm:$0xff]  ;;  %v5087_v55 = vld [vmem:[%s6328_s3 + $0xc8] sm:$0xff] }
  0x32   : > { %v377_v19 = vmax.f32 %v345_v3, 0.0  ;;  %v6370_v29 = vsel %vm5526_vm13, 4294967295, %v6369_v29  ;;  %401 = vst [vmem:[#allocation2 + $0xb8] sm:$0xff] %v369_v16  ;;  %v442_v41 = vadd.s32 224, %v5258_v10  ;;  %v418_v52 = vadd.s32 32, %v5258_v10  ;;  %v5078_v1 = vld [vmem:[%s6328_s3 + $0x80] sm:$0xff] }
  0x33   : > { %vm928_vm15 = vcmp.ge.s32.totalorder %v896_v13, 0  ;;  %v5096_v3 = vld [vmem:[%s6328_s3 + $0x110] sm:$0xff]  ;;  %v874_v5 = vld [vmem:[#allocation2 + $0x67] sm:$0xff]  ;;  %v6377_v20 = vmov 0  ;;  %v417_v31 = vadd.s32 24, %v5258_v10  ;;  %v5113_v59 = vld [vmem:[%s6328_s3 + $0x198] sm:$0xff] }
  0x34   : > { %1530 = vmatpush.bf16.msrb.mxu1 %v5075_v25  ;;  %2052 = vmatpush.bf16.msrb.mxu2 %v5083_v32  ;;  %v5519_v25 = vpack.c.bf16 %v873_v62, %v872_v58  ;;  %v864_v32 = vld [vmem:[#allocation2 + $0x17] sm:$0xff]  ;;  %409 = vst [vmem:[#allocation2 + $0xf8] sm:$0xff] %v377_v19  ;;  %vm5561_vm0 = vmpackc.low %vm6351_vm3, %vm928_vm15  ;;  %v478_v61 = vand.u32 15, %v418_v52  ;;  %v5070_v62 = vld [vmem:[%s6328_s3 + $0x40] sm:$0xff]  ;;  %v6381_v52 = vmov 0 }
  0x35   : > { %2382 = vmatpush.bf16.msrb.mxu3 %v5091_v35  ;;  %2680 = vmatpush.bf16.msrb.mxu0 %v5099_v47  ;;  %v353_v35 = vmax.f32 %v5511_v21, 0.0  ;;  %v5553_v45 = vpack.c.bf16 %v865_v34, %v864_v32  ;;  %v590_v47 = vand.u32 15, %v434_v30  ;;  %v875_v8 = vld [vmem:[#allocation2 + $0x6f] sm:$0xff]  ;;  %v882_v9 = vld [vmem:[#allocation2 + $0xa7] sm:$0xff] }
  0x36   : > { %v883_v11 = vld [vmem:[#allocation2 + $0xaf] sm:$0xff]  ;;  %v898_v16 = vadd.s32 4294967295, %v478_v61  ;;  %v5601_v19 = vpack.c.bf16 %v875_v8, %v874_v5  ;;  %v5086_v34 = vld [vmem:[%s6328_s3 + $0xc0] sm:$0xff]  ;;  %v6383_v8 = vmov 0 }
  0x37   : > { %385 = vst [vmem:[#allocation2 + $0x38] sm:$0xff] %v353_v35  ;;  %v914_v58 = vadd.s32 4294967295, %v590_v47  ;;  %v891_v13 = vld [vmem:[#allocation2 + $0xef] sm:$0xff]  ;;  %v866_v30 = vld [vmem:[#allocation2 + $0x27] sm:$0xff]  ;;  %v5109_v47 = vld [vmem:[%s6328_s3 + $0x178] sm:$0xff] }
  0x38   : > { %1531 = vmatpush.bf16.msrb.mxu1 %v5074_v44  ;;  %2053 = vmatpush.bf16.msrb.mxu2 %v5082_v53  ;;  %v534_v44 = vand.u32 15, %v426_v27  ;;  %v646_v53 = vand.u32 15, %v442_v41  ;;  %v867_v32 = vld [vmem:[#allocation2 + $0x2f] sm:$0xff]  ;;  %v436_v41 = vadd.s32 176, %v5258_v10  ;;  %vm930_vm15 = vcmp.ge.s32.totalorder %v898_v16, 0  ;;  %v877_v7 = vld [vmem:[#allocation2 + $0x7f] sm:$0xff] }
  0x39   : > { %2383 = vmatpush.bf16.msrb.mxu3 %v5090_v54  ;;  %2681 = vmatpush.bf16.msrb.mxu0 %v5098_v43  ;;  %v5079_v54 = vld [vmem:[%s6328_s3 + $0x88] sm:$0xff]  ;;  %vm946_vm2 = vcmp.ge.s32.totalorder %v914_v58, 0  ;;  %v5094_v43 = vld [vmem:[%s6328_s3 + $0x100] sm:$0xff] }
  0x3a   : > { %v906_v57 = vadd.s32 4294967295, %v534_v44  ;;  %v922_v63 = vadd.s32 4294967295, %v646_v53  ;;  %vm5604_vm10 = vmpackc.low %vm6351_vm3, %vm946_vm2  ;;  %v5627_v44 = vpack.c.bf16 %v867_v32, %v866_v30  ;;  %v5125_v53 = vld [vmem:[%s6328_s3 + $0x1f8] sm:$0xff]  ;;  %v1688_v21 = vld [vmem:[#allocation2 + $0x41] sm:$0xff] }
  0x3b   : > { %4405 = vmatmul.msk.bf16.gmra.mxu1 %vm5515_vm12, %v5519_v25  ;;  %4417 = vmatmul.msk.bf16.gmra.mxu2 %vm5526_vm13, %v4416_v26  ;;  %v6378_v20 = vsel %vm5604_vm10, 4294967295, %v6377_v20  ;;  %v4419_v26 = vpack.c.bf16 %v883_v11, %v882_v9  ;;  %v5133_v32 = vld [vmem:[%s6328_s3 + $0x238] sm:$0xff] }
  0x3c   : > { %1532 = vmatpush.bf16.msrb.mxu1 %v5073_v12  ;;  %2054 = vmatpush.bf16.msrb.mxu2 %v5081_v17  ;;  %vm938_vm1 = vcmp.ge.s32.totalorder %v906_v57, 0  ;;  %v890_v12 = vld [vmem:[#allocation2 + $0xe7] sm:$0xff]  ;;  %v6375_v17 = vmov 0  ;;  %vm954_vm9 = vcmp.ge.s32.totalorder %v922_v63, 0  ;;  %v876_v63 = vld [vmem:[#allocation2 + $0x77] sm:$0xff] }
  0x3d   : > { %2384 = vmatpush.bf16.msrb.mxu3 %v5089_v4  ;;  %2682 = vmatpush.bf16.msrb.mxu0 %v5097_v56  ;;  %vm5594_vm7 = vmpackc.low %vm6351_vm3, %vm938_vm1  ;;  %v5095_v4 = vld [vmem:[%s6328_s3 + $0x108] sm:$0xff]  ;;  %v4431_v27 = vpack.c.bf16 %v891_v13, %v890_v12  ;;  %v420_v56 = vadd.s32 48, %v5258_v10  ;;  %v5660_v9 = vpack.c.bf16 %v877_v7, %v876_v63  ;;  %v6385_v12 = vmov 0 }
  0x3e   : > { %4429 = vmatmul.msk.bf16.gmra.mxu3 %vm5534_vm14, %v4428_v6  ;;  %4393 = vmatmul.msk.bf16.gmra.mxu0 %vm5561_vm0, %v5553_v45  ;;  %v6376_v17 = vsel %vm5594_vm7, 4294967295, %v6375_v17  ;;  %v428_v6 = vadd.s32 112, %v5258_v10  ;;  %vm5613_vm11 = vmpackc.low %vm6351_vm3, %vm954_vm9  ;;  %v868_v16 = vld [vmem:[#allocation2 + $0x37] sm:$0xff]  ;;  %v1685_v7 = vld [vmem:[#allocation2 + $0x29] sm:$0xff] }
  0x3f   : > { %vm5638_vm1 = vmpackc.low %vm6351_vm3, %vm930_vm15 }
  0x40   : > { %1533 = vmatpush.bf16.msrb.mxu1 %v5072_v39  ;;  %2055 = vmatpush.bf16.msrb.mxu2 %v5080_v42  ;;  %v6379_v39 = vmov 0  ;;  %v444_v42 = vadd.s32 240, %v5258_v10  ;;  %v6382_v52 = vsel %vm5638_vm1, 4294967295, %v6381_v52 }
  0x41   : > { %2385 = vmatpush.bf16.msrb.mxu3 %v5088_v49  ;;  %2683 = vmatpush.bf16.msrb.mxu0 %v5096_v3  ;;  %v6380_v39 = vsel %vm5613_vm11, 4294967295, %v6379_v39  ;;  %v5117_v49 = vld [vmem:[%s6328_s3 + $0x1b8] sm:$0xff] }
  0x42   : > { %v660_v57 = vand.u32 15, %v444_v42  ;;  %v893_v3 = vld [vmem:[#allocation2 + $0xff] sm:$0xff] }
  0x44   : > { %1534 = vmatpush.bf16.msrb.mxu1 %v5071_v51  ;;  %2056 = vmatpush.bf16.msrb.mxu2 %v5079_v54  ;;  %v548_v51 = vand.u32 15, %v428_v6  ;;  %v5649_v54 = vpack.c.bf16 %v350_v18, %v349_v14  ;;  %v924_v0 = vadd.s32 4294967295, %v660_v57  ;;  %v884_v14 = vld [vmem:[#allocation2 + $0xb7] sm:$0xff]  ;;  %v885_v18 = vld [vmem:[#allocation2 + $0xbf] sm:$0xff] }
  0x45   : > { %2386 = vmatpush.bf16.msrb.mxu3 %v5087_v55  ;;  %2684 = vmatpush.bf16.msrb.mxu0 %v5095_v4  ;;  %v604_v55 = vand.u32 15, %v436_v41  ;;  %v4422_v11 = vpack.c.bf16 %v885_v18, %v884_v14  ;;  %v869_v4 = vld [vmem:[#allocation2 + $0x3f] sm:$0xff]  ;;  %v1686_v14 = vld [vmem:[#allocation2 + $0x31] sm:$0xff] }
  0x46   : > { %v908_v58 = vadd.s32 4294967295, %v548_v51  ;;  %vm956_vm15 = vcmp.ge.s32.totalorder %v924_v0, 0  ;;  %v4398_v6 = vpack.c.bf16 %v869_v4, %v868_v16  ;;  %v6391_v51 = vmov 0  ;;  %v1683_v57 = vld [vmem:[#allocation2 + $0x19] sm:$0xff]  ;;  %v5115_v4 = vld [vmem:[%s6328_s3 + $0x1a8] sm:$0xff] }
  0x47   : > { %v916_v61 = vadd.s32 4294967295, %v604_v55  ;;  %vm5668_vm6 = vmpackc.low %vm6351_vm3, %vm956_vm15  ;;  %v471_v55 = vand.u32 15, %v417_v31  ;;  %v4539_v18 = vpack.c.bf16 %v1686_v14, %v1685_v7  ;;  %v5106_v7 = vld [vmem:[%s6328_s3 + $0x160] sm:$0xff] }
  0x48   : > { %1535 = vmatpush.bf16.msrb.mxu1 %v5070_v62  ;;  %2057 = vmatpush.bf16.msrb.mxu2 %v5078_v1  ;;  %v492_v62 = vand.u32 15, %v420_v56  ;;  %vm940_vm2 = vcmp.ge.s32.totalorder %v908_v58, 0  ;;  %v892_v1 = vld [vmem:[#allocation2 + $0xf7] sm:$0xff]  ;;  %v1684_v58 = vld [vmem:[#allocation2 + $0x21] sm:$0xff] }
  0x49   : > { %2387 = vmatpush.bf16.msrb.mxu3 %v5086_v34  ;;  %2685 = vmatpush.bf16.msrb.mxu0 %v5094_v43  ;;  %vm948_vm9 = vcmp.ge.s32.totalorder %v916_v61, 0  ;;  %v4434_v13 = vpack.c.bf16 %v893_v3, %v892_v1  ;;  %v1449_v34 = vpack.c.bf16 %v352_v50, %v351_v38  ;;  %v1681_v43 = vld [vmem:[#allocation2 + $0x9] sm:$0xff]  ;;  %v1716_v56 = vadd.s32 1, %v471_v55 }
  0x4a   : > { %v900_v5 = vadd.s32 4294967295, %v492_v62  ;;  %vm5663_vm14 = vmpackc.low %vm6351_vm3, %vm948_vm9  ;;  %v5116_v38 = vld [vmem:[%s6328_s3 + $0x1b0] sm:$0xff]  ;;  %v4536_v61 = vpack.c.bf16 %v1684_v58, %v1683_v57  ;;  %v6395_v1 = vmov 0  ;;  %v421_v3 = vadd.s32 56, %v5258_v10  ;;  %v1393_v58 = vld [vmem:[#allocation2 + $0x58] sm:$0xff] }
  0x4b   : > { %4408 = vmatmul.msk.bf16.gmra.mxu1 %vm5594_vm7, %v5601_v19  ;;  %4420 = vmatmul.msk.bf16.gmra.mxu2 %vm5604_vm10, %v4419_v26  ;;  %v6386_v12 = vsel %vm5663_vm14, 4294967295, %v6385_v12  ;;  %v5124_v50 = vld [vmem:[%s6328_s3 + $0x1f0] sm:$0xff] }
  0x4c   : > { %3008 = vmatpush.bf16.msra.mxu1 %v5109_v47  ;;  %3338 = vmatpush.bf16.msra.mxu2 %v5117_v49  ;;  %v1682_v47 = vld [vmem:[#allocation2 + $0x11] sm:$0xff] }
  0x4d   : > { %3636 = vmatpush.bf16.msra.mxu3 %v5125_v53  ;;  %3966 = vmatpush.bf16.msra.mxu0 %v5133_v32  ;;  %v4533_v49 = vpack.c.bf16 %v1682_v47, %v1681_v43  ;;  %v5184_v53 = vmov 0.0|0.0   ;;  %v2210_v32 = vld [vmem:[#allocation2 + $0x4f] sm:$0xff]  ;;  %v423_v47 = vadd.s32 72, %v5258_v10 }
  0x4e   : > { %4432 = vmatmul.msk.bf16.gmra.mxu3 %vm5613_vm11, %v4431_v27  ;;  %4396 = vmatmul.msk.bf16.gmra.mxu0 %vm5638_vm1, %v5627_v44  ;;  %vm5656_vm11 = vmpackc.low %vm6351_vm3, %vm940_vm2  ;;  %v415_v27 = vadd.s32 8, %v5258_v10  ;;  %vm932_vm2 = vcmp.ge.s32.totalorder %v900_v5, 0  ;;  %v5132_v5 = vld [vmem:[%s6328_s3 + $0x230] sm:$0xff] }
  0x4f   : > { %v6384_v8 = vsel %vm5656_vm11, 4294967295, %v6383_v8  ;;  %vm5681_vm9 = vmpackc.low %vm6351_vm3, %vm932_vm2  ;;  %v1392_v43 = vld [vmem:[#allocation2 + $0x50] sm:$0xff] }
  0x50   : > { %v457_v41 = vand.u32 15, %v415_v27  ;;  %3009 = vmatpush.bf16.msra.mxu1 %v5108_v37  ;;  %3339 = vmatpush.bf16.msra.mxu2 %v5116_v38  ;;  %v1687_v27 = vld [vmem:[#allocation2 + $0x39] sm:$0xff]  ;;  %v1689_v38 = vld [vmem:[#allocation2 + $0x49] sm:$0xff] }
  0x51   : > { %3637 = vmatpush.bf16.msra.mxu3 %v5124_v50  ;;  %3967 = vmatpush.bf16.msra.mxu0 %v5132_v5  ;;  %v1690_v50 = vld [vmem:[#allocation2 + $0x51] sm:$0xff] }
  0x52   : > { %v1714_v42 = vadd.s32 1, %v457_v41  ;;  %v4545_v55 = vpack.c.bf16 %v1690_v50, %v1689_v38 }
  0x54   : > { %vm1778_vm15 = vcmp.lt.s32.totalorder %v1714_v42, 16  ;;  %3340 = vmatpush.bf16.msra.mxu2 %v5115_v4  ;;  %v1391_v42 = vld [vmem:[#allocation2 + $0x48] sm:$0xff]  ;;  %v1691_v4 = vld [vmem:[#allocation2 + $0x59] sm:$0xff] }
  0x55   : > { %vm5695_vm2 = vmpackc.low %vm1778_vm15, %vm6351_vm3  ;;  %vm1780_vm15 = vcmp.lt.s32.totalorder %v1716_v56, 16  ;;  %v1451_v31 = vpack.c.bf16 %v1392_v43, %v1391_v42 }
  0x56   : > { %v6392_v51 = vsel %vm5695_vm2, 4294967295, %v6391_v51 }
  0x5b   : > { %4411 = vmatmul.msk.bf16.gmra.mxu1 %vm5656_vm11, %v5660_v9  ;;  %4423 = vmatmul.msk.bf16.gmra.mxu2 %vm5663_vm14, %v4422_v11  ;;  %v5107_v11 = vld [vmem:[%s6328_s3 + $0x168] sm:$0xff] }
  0x5c   : > { %3010 = vmatpush.bf16.msra.mxu1 %v5107_v11 }
  0x5e   : > { %4435 = vmatmul.msk.bf16.gmra.mxu3 %vm5668_vm6, %v4434_v13  ;;  %4399 = vmatmul.msk.bf16.gmra.mxu0 %vm5681_vm9, %v4398_v6  ;;  %v499_v13 = vand.u32 15, %v421_v3  ;;  %v5789_v3 = vld [vmem:[#allocation2] sm:$0xff] }
  0x60   : > { %v1720_v16 = vadd.s32 1, %v499_v13  ;;  %3011 = vmatpush.bf16.msra.mxu1 %v5106_v7 }
  0x6b   : > { %1536 = vmatmul.bf16.vlgmr.msrb.gmra.mxu1 %v5184_v53  ;;  %4534 = vmatmul.msk.bf16.vlgmr.msrb.gmra.mxu2 %vm5695_vm2, %v4533_v49  ;;  %vm5716_vm2 = vmpackc.low %vm1780_vm15, %vm6351_vm3  ;;  %v5123_v49 = vld [vmem:[%s6328_s3 + $0x1e8] sm:$0xff]  ;;  %v513_v53 = vand.u32 15, %v423_v47 }
  0x6c   : > { %3638 = vmatpush.bf16.msra.mxu3 %v5123_v49  ;;  %v427_v49 = vadd.s32 104, %v5258_v10 }
  0x6d   : > { %v1722_v37 = vadd.s32 1, %v513_v53  ;;  %v1453_v53 = vpack.c.bf16 %v360_v40, %v359_v33  ;;  %v1693_v33 = vld [vmem:[#allocation2 + $0x69] sm:$0xff]  ;;  %v1694_v40 = vld [vmem:[#allocation2 + $0x71] sm:$0xff] }
  0x6e   : > { %4630 = vmatmul.msk.bf16.vlgmr.msrb.gmra.mxu3 %vm5436_vm8, %v5553_v45  ;;  %2686 = vmatmul.bf16.vlgmr.msrb.gmra.mxu0 %v5649_v54  ;;  %v419_v45 = vadd.s32 40, %v5258_v10  ;;  %v541_v38 = vand.u32 15, %v427_v49  ;;  %v1695_v49 = vld [vmem:[#allocation2 + $0x79] sm:$0xff] }
  0x70   : > { %v485_v0 = vand.u32 15, %v419_v45  ;;  %v425_v45 = vadd.s32 88, %v5258_v10  ;;  %v1726_v28 = vadd.s32 1, %v541_v38  ;;  %v2217_v38 = vld [vmem:[#allocation2 + $0x87] sm:$0xff] }
  0x72   : > { %v1718_v63 = vadd.s32 1, %v485_v0  ;;  %v5131_v0 = vld [vmem:[%s6328_s3 + $0x228] sm:$0xff] }
  0x73   : > { %3968 = vmatpush.bf16.msra.mxu0 %v5131_v0 }
  0x74   : > { %vm1782_vm15 = vcmp.lt.s32.totalorder %v1718_v63, 16 }
  0x75   : > { %vm5728_vm8 = vmpackc.low %vm1782_vm15, %vm6351_vm3  ;;  %vm1784_vm15 = vcmp.lt.s32.totalorder %v1720_v16, 16  ;;  %v5114_v16 = vld [vmem:[%s6328_s3 + $0x1a0] sm:$0xff] }
  0x76   : > { %v6396_v1 = vsel %vm5728_vm8, 4294967295, %v6395_v1  ;;  %3341 = vmatpush.bf16.msra.mxu2 %v5114_v16 }
  0x7a   : > { %3342 = vmatpush.bf16.msra.mxu2 %v5113_v59 }
  0x7b   : > { %1541 = vmatmul.bf16.gmra.mxu1 %v5649_v54  ;;  %4537 = vmatmul.msk.bf16.gmra.mxu2 %vm5716_vm2, %v4536_v61  ;;  %v1390_v54 = vld [vmem:[#allocation2 + $0x40] sm:$0xff] }
  0x7c   : > { %v1394_v61 = vld [vmem:[#allocation2 + $0x60] sm:$0xff] }
  0x7d   : > { %v1452_v63 = vpack.c.bf16 %v1394_v61, %v1393_v58 }
  0x7e   : > { %4633 = vmatmul.msk.bf16.gmra.mxu3 %vm5561_vm0, %v5627_v44  ;;  %2691 = vmatmul.bf16.gmra.mxu0 %v1449_v34  ;;  %v1450_v44 = vpack.c.bf16 %v1390_v54, %v353_v35  ;;  %v2209_v35 = vld [vmem:[#allocation2 + $0x47] sm:$0xff] }
  0x8b   : > { %1546 = vmatmul.bf16.gmra.mxu1 %v1449_v34  ;;  %4540 = vmatmul.msk.bf16.gmra.mxu2 %vm5728_vm8, %v4539_v18  ;;  %v4542_v34 = vpack.c.bf16 %v1688_v21, %v1687_v27  ;;  %vm5749_vm8 = vmpackc.low %vm1784_vm15, %vm6351_vm3  ;;  %vm1786_vm15 = vcmp.lt.s32.totalorder %v1722_v37, 16  ;;  %v527_v18 = vand.u32 15, %v425_v45  ;;  %v1692_v27 = vld [vmem:[#allocation2 + $0x61] sm:$0xff] }
  0x8d   : > { %v1724_v13 = vadd.s32 1, %v527_v18 }
  0x8e   : > { %4636 = vmatmul.msk.bf16.gmra.mxu3 %vm5638_vm1, %v4398_v6  ;;  %2696 = vmatmul.bf16.gmra.mxu0 %v1450_v44  ;;  %v4638_v6 = vpack.c.bf16 %v2210_v32, %v2209_v35  ;;  %vm5764_vm1 = vmpackc.low %vm1786_vm15, %vm6351_vm3 }
  0x8f   : > { %vm1788_vm15 = vcmp.lt.s32.totalorder %v1724_v13, 16  ;;  %v5130_v13 = vld [vmem:[%s6328_s3 + $0x220] sm:$0xff] }
  0x90   : > { %3969 = vmatpush.bf16.msra.mxu0 %v5130_v13 }
  0x9b   : > { %1551 = vmatmul.bf16.gmra.mxu1 %v1450_v44  ;;  %4543 = vmatmul.msk.bf16.gmra.mxu2 %vm5749_vm8, %v4542_v34  ;;  %v4548_v34 = vpack.c.bf16 %v1692_v27, %v1691_v4  ;;  %v5105_v4 = vld [vmem:[%s6328_s3 + $0x158] sm:$0xff] }
  0x9c   : > { %3012 = vmatpush.bf16.msra.mxu1 %v5105_v4 }
  0x9e   : > { %4639 = vmatmul.msk.bf16.gmra.mxu3 %vm5681_vm9, %v4638_v6  ;;  %2701 = vmatmul.bf16.gmra.mxu0 %v1451_v31 }
  0xa8   : > { %v5761_v56 = vpop.f32.mrf.mxu1 }
  0xab   : > { %1556 = vmatmul.bf16.gmra.mxu1 %v1451_v31  ;;  %4546 = vmatmul.msk.bf16.gmra.mxu2 %vm5764_vm1, %v4545_v55  ;;  %v5780_v14 = vpop.f32.mrf.mxu0  ;;  %v5122_v31 = vld [vmem:[%s6328_s3 + $0x1e0] sm:$0xff] }
  0xac   : > { %3639 = vmatpush.bf16.msra.mxu3 %v5122_v31  ;;  %v1696_v31 = vld [vmem:[#allocation2 + $0x81] sm:$0xff] }
  0xae   : > { %4642 = vmatmul.msk.bf16.gmra.mxu3 %vm5364_vm4, %v5519_v25  ;;  %v1279_v54 = vpop.f32.mrf.mxu2  ;;  %2706 = vmatmul.bf16.gmra.mxu0 %v1452_v63  ;;  %vm5806_vm4 = vmpackc.low %vm1788_vm15, %vm6351_vm3  ;;  %vm1790_vm15 = vcmp.lt.s32.totalorder %v1726_v28, 16 }
  0xaf   : > { %v1335_v5 = vadd.f32 %v5789_v3, %v1279_v54 }
  0xb0   : > { %v5792_v25 = vpop.f32.mrf.mxu1 }
  0xb1   : > { %v1299_v44 = vpop.f32.mrf.mxu3  ;;  %1367 = vst [vmem:[%s5787_s12 + $0x80] sm:$0xff] %v1335_v5 }
  0xb2   : > { %v1343_v11 = vadd.f32 %v5789_v3, %v1299_v44  ;;  %v1398_v44 = vld [vmem:[#allocation2 + $0x80] sm:$0xff] }
  0xb3   : > { %v5800_v21 = vpop.f32.mrf.mxu0  ;;  %v1454_v16 = vpack.c.bf16 %v1398_v44, %v361_v15  ;;  %v5121_v44 = vld [vmem:[%s6328_s3 + $0x1d8] sm:$0xff] }
  0xb4   : > { %1375 = vst [vmem:[%s5787_s12 + $0xc0] sm:$0xff] %v1343_v11  ;;  %v429_v11 = vadd.s32 120, %v5258_v10  ;;  %3640 = vmatpush.bf16.msra.mxu3 %v5121_v44  ;;  %v433_v44 = vadd.s32 152, %v5258_v10 }
  0xb6   : > { %v1281_v35 = vpop.f32.mrf.mxu2 }
  0xb7   : > { %v1336_v32 = vadd.f32 %v5789_v3, %v1281_v35  ;;  %v555_v35 = vand.u32 15, %v429_v11 }
  0xb8   : > { %v5803_v42 = vpop.f32.mrf.mxu1 }
  0xb9   : > { %v1301_v6 = vpop.f32.mrf.mxu3  ;;  %1368 = vst [vmem:[%s5787_s12 + $0x88] sm:$0xff] %v1336_v32 }
  0xba   : > { %v1344_v47 = vadd.f32 %v5789_v3, %v1301_v6 }
  0xbb   : > { %1561 = vmatmul.bf16.gmra.mxu1 %v1452_v63  ;;  %4549 = vmatmul.msk.bf16.gmra.mxu2 %vm5806_vm4, %v4548_v34  ;;  %v5826_v37 = vpop.f32.mrf.mxu0  ;;  %v4551_v63 = vpack.c.bf16 %v1694_v40, %v1693_v33 }
  0xbc   : > { %1376 = vst [vmem:[%s5787_s12 + $0xc8] sm:$0xff] %v1344_v47 }
  0xbe   : > { %4645 = vmatmul.msk.bf16.gmra.mxu3 %vm5515_vm12, %v5601_v19  ;;  %v1284_v50 = vpop.f32.mrf.mxu2  ;;  %2711 = vmatmul.bf16.gmra.mxu0 %v1453_v53  ;;  %vm5840_vm12 = vmpackc.low %vm1790_vm15, %vm6351_vm3 }
  0xbf   : > { %v1337_v55 = vadd.f32 %v5789_v3, %v1284_v50  ;;  %v2218_v50 = vld [vmem:[#allocation2 + $0x8f] sm:$0xff] }
  0xc0   : > { %v5829_v61 = vpop.f32.mrf.mxu1 }
  0xc1   : > { %v1304_v58 = vpop.f32.mrf.mxu3  ;;  %1369 = vst [vmem:[%s5787_s12 + $0x90] sm:$0xff] %v1337_v55 }
  0xc2   : > { %v1345_v23 = vadd.f32 %v5789_v3, %v1304_v58 }
  0xc3   : > { %v5834_v19 = vpop.f32.mrf.mxu0 }
  0xc4   : > { %1377 = vst [vmem:[%s5787_s12 + $0xd0] sm:$0xff] %v1345_v23  ;;  %v4554_v23 = vpack.c.bf16 %v1696_v31, %v1695_v49  ;;  %v2219_v31 = vld [vmem:[#allocation2 + $0x97] sm:$0xff] }
  0xc6   : > { %v1286_v45 = vpop.f32.mrf.mxu2 }
  0xc7   : > { %v1338_v0 = vadd.f32 %v5789_v3, %v1286_v45 }
  0xc8   : > { %v5837_v18 = vpop.f32.mrf.mxu1 }
  0xc9   : > { %v1306_v7 = vpop.f32.mrf.mxu3  ;;  %1370 = vst [vmem:[%s5787_s12 + $0x98] sm:$0xff] %v1338_v0  ;;  %v4650_v0 = vpack.c.bf16 %v2218_v50, %v2217_v38  ;;  %v2220_v38 = vld [vmem:[#allocation2 + $0x9f] sm:$0xff] }
  0xca   : > { %v1346_v5 = vadd.f32 %v5789_v3, %v1306_v7  ;;  %v1400_v7 = vld [vmem:[#allocation2 + $0x90] sm:$0xff] }
  0xcb   : > { %1566 = vmatmul.bf16.gmra.mxu1 %v1453_v53  ;;  %4552 = vmatmul.msk.bf16.gmra.mxu2 %vm5840_vm12, %v4551_v63  ;;  %v5861_v27 = vpop.f32.mrf.mxu0  ;;  %v1399_v63 = vld [vmem:[#allocation2 + $0x88] sm:$0xff] }
  0xcc   : > { %1378 = vst [vmem:[%s5787_s12 + $0xd8] sm:$0xff] %v1346_v5  ;;  %v431_v5 = vadd.s32 136, %v5258_v10  ;;  %v1455_v11 = vpack.c.bf16 %v1400_v7, %v1399_v63  ;;  %v4653_v63 = vpack.c.bf16 %v2220_v38, %v2219_v31  ;;  %v1401_v7 = vld [vmem:[#allocation2 + $0x98] sm:$0xff]  ;;  %v5112_v31 = vld [vmem:[%s6328_s3 + $0x190] sm:$0xff] }
  0xcd   : > { %3343 = vmatpush.bf16.msra.mxu2 %v5112_v31  ;;  %v435_v31 = vadd.s32 168, %v5258_v10 }
  0xce   : > { %4648 = vmatmul.msk.bf16.gmra.mxu3 %vm5594_vm7, %v5660_v9  ;;  %v1289_v32 = vpop.f32.mrf.mxu2  ;;  %2716 = vmatmul.bf16.gmra.mxu0 %v1454_v16  ;;  %v1728_v9 = vadd.s32 1, %v555_v35  ;;  %v569_v4 = vand.u32 15, %v431_v5  ;;  %v1402_v5 = vld [vmem:[#allocation2 + $0xa0] sm:$0xff] }
  0xcf   : > { %v1339_v34 = vadd.f32 %v5789_v3, %v1289_v32 }
  0xd0   : > { %v5867_v15 = vpop.f32.mrf.mxu1  ;;  %vm1792_vm15 = vcmp.lt.s32.totalorder %v1728_v9, 16  ;;  %v1730_v59 = vadd.s32 1, %v569_v4  ;;  %v1698_v9 = vld [vmem:[#allocation2 + $0x91] sm:$0xff] }
  0xd1   : > { %v1309_v6 = vpop.f32.mrf.mxu3  ;;  %1371 = vst [vmem:[%s5787_s12 + $0xa0] sm:$0xff] %v1339_v34  ;;  %vm5878_vm7 = vmpackc.low %vm1792_vm15, %vm6351_vm3  ;;  %v5129_v4 = vld [vmem:[%s6328_s3 + $0x218] sm:$0xff] }
  0xd2   : > { %v1347_v47 = vadd.f32 %v5789_v3, %v1309_v6  ;;  %vm1794_vm15 = vcmp.lt.s32.totalorder %v1730_v59, 16  ;;  %3970 = vmatpush.bf16.msra.mxu0 %v5129_v4  ;;  %v1434_v48 = vld [vmem:[%s5787_s12 + $0x98] sm:$0xff] }
  0xd3   : > { %v5872_v53 = vpop.f32.mrf.mxu0 }
  0xd4   : > { %1379 = vst [vmem:[%s5787_s12 + $0xe0] sm:$0xff] %v1347_v47  ;;  %v1697_v47 = vld [vmem:[#allocation2 + $0x89] sm:$0xff] }
  0xd6   : > { %v1291_v55 = vpop.f32.mrf.mxu2 }
  0xd7   : > { %v1340_v58 = vadd.f32 %v5789_v3, %v1291_v55 }
  0xd8   : > { %v5875_v33 = vpop.f32.mrf.mxu1 }
  0xd9   : > { %v1311_v28 = vpop.f32.mrf.mxu3  ;;  %1372 = vst [vmem:[%s5787_s12 + $0xa8] sm:$0xff] %v1340_v58  ;;  %v4557_v58 = vpack.c.bf16 %v1698_v9, %v1697_v47  ;;  %v583_v47 = vand.u32 15, %v433_v44  ;;  %v2222_v44 = vld [vmem:[#allocation2 + $0xaf] sm:$0xff] }
  0xda   : > { %v1348_v45 = vadd.f32 %v5789_v3, %v1311_v28 }
  0xdb   : > { %1571 = vmatmul.bf16.gmra.mxu1 %v1454_v16  ;;  %4555 = vmatmul.msk.bf16.gmra.mxu2 %vm5878_vm7, %v4554_v23  ;;  %v5893_v13 = vpop.f32.mrf.mxu0 }
  0xdc   : > { %1380 = vst [vmem:[%s5787_s12 + $0xe8] sm:$0xff] %v1348_v45 }
  0xde   : > { %4651 = vmatmul.msk.bf16.gmra.mxu3 %vm5656_vm11, %v4650_v0  ;;  %v1294_v35 = vpop.f32.mrf.mxu2  ;;  %2721 = vmatmul.bf16.gmra.mxu0 %v1455_v11  ;;  %vm5905_vm11 = vmpackc.low %vm1794_vm15, %vm6351_vm3 }
  0xdf   : > { %v1341_v32 = vadd.f32 %v5789_v3, %v1294_v35  ;;  %v1319_v35 = vadd.f32 %v5789_v3, %v5780_v14 }
  0xe0   : > { %v5896_v6 = vpop.f32.mrf.mxu1 }
  0xe1   : > { %v1314_v34 = vpop.f32.mrf.mxu3  ;;  %1373 = vst [vmem:[%s5787_s12 + $0xb0] sm:$0xff] %v1341_v32  ;;  %v1456_v32 = vpack.c.bf16 %v1402_v5, %v1401_v7  ;;  %v2221_v5 = vld [vmem:[#allocation2 + $0xa7] sm:$0xff] }
  0xe2   : > { %v1349_v16 = vadd.f32 %v5789_v3, %v1314_v34  ;;  %v5104_v34 = vld [vmem:[%s6328_s3 + $0x150] sm:$0xff] }
  0xe3   : > { %v5901_v49 = vpop.f32.mrf.mxu0  ;;  %3013 = vmatpush.bf16.msra.mxu1 %v5104_v34 }
  0xe4   : > { %1381 = vst [vmem:[%s5787_s12 + $0xf0] sm:$0xff] %v1349_v16 }
  0xe6   : > { %v1296_v50 = vpop.f32.mrf.mxu2 }
  0xe7   : > { %v1342_v55 = vadd.f32 %v5789_v3, %v1296_v50 }
  0xe8   : > { %v1537_v28 = vpop.f32.mrf.mxu1 }
  0xe9   : > { %v1316_v23 = vpop.f32.mrf.mxu3  ;;  %1374 = vst [vmem:[%s5787_s12 + $0xb8] sm:$0xff] %v1342_v55  ;;  %v1617_v59 = vadd.f32 %v1537_v28, %v1319_v35  ;;  %v1732_v55 = vadd.s32 1, %v583_v47  ;;  %v1699_v28 = vld [vmem:[#allocation2 + $0x99] sm:$0xff] }
  0xea   : > { %v1350_v0 = vadd.f32 %v5789_v3, %v1316_v23 }
  0xeb   : > { %1576 = vmatmul.bf16.gmra.mxu1 %v1455_v11  ;;  %4558 = vmatmul.msk.bf16.gmra.mxu2 %vm5905_vm11, %v4557_v58  ;;  %v2687_v16 = vpop.f32.mrf.mxu0  ;;  %v1320_v58 = vadd.f32 %v5789_v3, %v5800_v21  ;;  %vm1796_vm15 = vcmp.lt.s32.totalorder %v1732_v55, 16  ;;  %v4656_v21 = vpack.c.bf16 %v2222_v44, %v2221_v5 }
  0xec   : > { %1382 = vst [vmem:[%s5787_s12 + $0xf8] sm:$0xff] %v1350_v0  ;;  %v1700_v0 = vld [vmem:[#allocation2 + $0xa1] sm:$0xff] }
  0xed   : > { %v4560_v34 = vpack.c.bf16 %v1700_v0, %v1699_v28  ;;  %v597_v0 = vand.u32 15, %v435_v31 }
  0xee   : > { %4654 = vmatmul.msk.bf16.gmra.mxu3 %vm5384_vm5, %v4653_v63  ;;  %v2059_v9 = vpop.f32.mrf.mxu2  ;;  %2726 = vmatmul.bf16.gmra.mxu0 %v1456_v32  ;;  %vm5932_vm5 = vmpackc.low %vm1796_vm15, %vm6351_vm3 }
  0xef   : > { %v2139_v14 = vadd.f32 %v2059_v9, %v1617_v59 }
  0xf0   : > { %v1539_v38 = vpop.f32.mrf.mxu1  ;;  %v1438_v30 = vld [vmem:[%s5787_s12 + $0xb8] sm:$0xff] }
  0xf1   : > { %v2389_v11 = vpop.f32.mrf.mxu3  ;;  %v1618_v7 = vadd.f32 %v1539_v38, %v1320_v58  ;;  %v5120_v38 = vld [vmem:[%s6328_s3 + $0x1d0] sm:$0xff] }
  0xf2   : > { %v2469_v50 = vadd.f32 %v2389_v11, %v2139_v14  ;;  %v1404_v14 = vld [vmem:[#allocation2 + $0xb0] sm:$0xff]  ;;  %3641 = vmatpush.bf16.msra.mxu3 %v5120_v38 }
  0xf3   : > { %v2689_v63 = vpop.f32.mrf.mxu0 }
  0xf4   : > { %v2767_v23 = vadd.f32 %v2687_v16, %v2469_v50  ;;  %v1403_v16 = vld [vmem:[#allocation2 + $0xa8] sm:$0xff]  ;;  %v1321_v50 = vadd.f32 %v5789_v3, %v5826_v37 }
  0xf5   : > { %v1457_v58 = vpack.c.bf16 %v1404_v14, %v1403_v16  ;;  %v2224_v14 = vld [vmem:[#allocation2 + $0xbf] sm:$0xff] }
  0xf6   : > { %2799 = vst [vmem:[%s5787_s12] sm:$0xff] %v2767_v23  ;;  %v2061_v4 = vpop.f32.mrf.mxu2 }
  0xf7   : > { %v2140_v35 = vadd.f32 %v2061_v4, %v1618_v7  ;;  %v1734_v4 = vadd.s32 1, %v597_v0  ;;  %v1406_v0 = vld [vmem:[#allocation2 + $0xc0] sm:$0xff] }
  0xf8   : > { %v1542_v9 = vpop.f32.mrf.mxu1 }
  0xf9   : > { %v2391_v59 = vpop.f32.mrf.mxu3  ;;  %v1619_v28 = vadd.f32 %v1542_v9, %v1321_v50  ;;  %vm1798_vm15 = vcmp.lt.s32.totalorder %v1734_v4, 16  ;;  %v2223_v9 = vld [vmem:[#allocation2 + $0xb7] sm:$0xff] }
  0xfa   : > { %v2470_v11 = vadd.f32 %v2391_v59, %v2140_v35  ;;  %v1702_v59 = vld [vmem:[#allocation2 + $0xb1] sm:$0xff] }
  0xfb   : > { %1581 = vmatmul.bf16.gmra.mxu1 %v1456_v32  ;;  %4561 = vmatmul.msk.bf16.gmra.mxu2 %vm5932_vm5, %v4560_v34  ;;  %v2692_v23 = vpop.f32.mrf.mxu0  ;;  %v1701_v34 = vld [vmem:[#allocation2 + $0xa9] sm:$0xff] }
  0xfc   : > { %v2768_v55 = vadd.f32 %v2689_v63, %v2470_v11  ;;  %v1322_v63 = vadd.f32 %v5789_v3, %v5834_v19  ;;  %v4563_v38 = vpack.c.bf16 %v1702_v59, %v1701_v34  ;;  %v4659_v19 = vpack.c.bf16 %v2224_v14, %v2223_v9 }
  0xfe   : > { %4657 = vmatmul.msk.bf16.gmra.mxu3 %vm5526_vm13, %v4656_v21  ;;  %2800 = vst [vmem:[%s5787_s12 + $0x8] sm:$0xff] %v2768_v55  ;;  %v2064_v7 = vpop.f32.mrf.mxu2  ;;  %2731 = vmatmul.bf16.gmra.mxu0 %v1457_v58  ;;  %vm5951_vm13 = vmpackc.low %vm1798_vm15, %vm6351_vm3 }
  0xff   : > { %v2141_v5 = vadd.f32 %v2064_v7, %v1619_v28 }
 0x100   : > { %v1544_v37 = vpop.f32.mrf.mxu1 }
 0x101   : > { %v2394_v44 = vpop.f32.mrf.mxu3  ;;  %v1620_v16 = vadd.f32 %v1544_v37, %v1322_v63  ;;  %v1323_v37 = vadd.f32 %v5789_v3, %v5861_v27  ;;  %v5103_v63 = vld [vmem:[%s6328_s3 + $0x148] sm:$0xff] }
 0x102   : > { %v2471_v32 = vadd.f32 %v2394_v44, %v2141_v5  ;;  %v437_v5 = vadd.s32 184, %v5258_v10  ;;  %v5128_v44 = vld [vmem:[%s6328_s3 + $0x210] sm:$0xff]  ;;  %3014 = vmatpush.bf16.msra.mxu1 %v5103_v63 }
 0x103   : > { %v2694_v21 = vpop.f32.mrf.mxu0  ;;  %3971 = vmatpush.bf16.msra.mxu0 %v5128_v44 }
 0x104   : > { %v2769_v35 = vadd.f32 %v2692_v23, %v2471_v32  ;;  %v1405_v23 = vld [vmem:[#allocation2 + $0xb8] sm:$0xff]  ;;  %v611_v59 = vand.u32 15, %v437_v5 }
 0x105   : > { %v1458_v4 = vpack.c.bf16 %v1406_v0, %v1405_v23  ;;  %v2225_v0 = vld [vmem:[#allocation2 + $0xc7] sm:$0xff] }
 0x106   : > { %2801 = vst [vmem:[%s5787_s12 + $0x10] sm:$0xff] %v2769_v35  ;;  %v2066_v11 = vpop.f32.mrf.mxu2 }
 0x107   : > { %v2142_v31 = vadd.f32 %v2066_v11, %v1620_v16  ;;  %v1736_v11 = vadd.s32 1, %v611_v59  ;;  %v1408_v59 = vld [vmem:[#allocation2 + $0xd0] sm:$0xff] }
 0x108   : > { %v1547_v55 = vpop.f32.mrf.mxu1 }
 0x109   : > { %v2396_v50 = vpop.f32.mrf.mxu3  ;;  %v1621_v34 = vadd.f32 %v1547_v55, %v1323_v37  ;;  %v1704_v55 = vld [vmem:[#allocation2 + $0xc1] sm:$0xff]  ;;  %vm1800_vm15 = vcmp.lt.s32.totalorder %v1736_v11, 16 }
 0x10a   : > { %v2472_v7 = vadd.f32 %v2396_v50, %v2142_v31  ;;  %v1324_v31 = vadd.f32 %v5789_v3, %v5872_v53  ;;  %v1703_v50 = vld [vmem:[#allocation2 + $0xb9] sm:$0xff] }
 0x10b   : > { %1586 = vmatmul.bf16.gmra.mxu1 %v1457_v58  ;;  %4564 = vmatmul.msk.bf16.gmra.mxu2 %vm5951_vm13, %v4563_v38  ;;  %v2697_v35 = vpop.f32.mrf.mxu0  ;;  %v4566_v37 = vpack.c.bf16 %v1704_v55, %v1703_v50 }
 0x10c   : > { %v2770_v32 = vadd.f32 %v2694_v21, %v2472_v7  ;;  %v5111_v21 = vld [vmem:[%s6328_s3 + $0x188] sm:$0xff] }
 0x10d   : > { %3344 = vmatpush.bf16.msra.mxu2 %v5111_v21  ;;  %v2226_v7 = vld [vmem:[#allocation2 + $0xcf] sm:$0xff]  ;;  %v1325_v21 = vadd.f32 %v5789_v3, %v5893_v13 }
 0x10e   : > { %4660 = vmatmul.msk.bf16.gmra.mxu3 %vm5604_vm10, %v4659_v19  ;;  %2802 = vst [vmem:[%s5787_s12 + $0x18] sm:$0xff] %v2770_v32  ;;  %v2069_v27 = vpop.f32.mrf.mxu2  ;;  %2736 = vmatmul.bf16.gmra.mxu0 %v1458_v4  ;;  %vm5976_vm10 = vmpackc.low %vm1800_vm15, %vm6351_vm3  ;;  %v4662_v53 = vpack.c.bf16 %v2226_v7, %v2225_v0 }
 0x10f   : > { %v2143_v58 = vadd.f32 %v2069_v27, %v1621_v34 }
 0x110   : > { %v1549_v9 = vpop.f32.mrf.mxu1 }
 0x111   : > { %v2399_v16 = vpop.f32.mrf.mxu3  ;;  %v1622_v23 = vadd.f32 %v1549_v9, %v1324_v31 }
 0x112   : > { %v2473_v14 = vadd.f32 %v2399_v16, %v2143_v58  ;;  %v439_v58 = vadd.s32 200, %v5258_v10  ;;  %v5119_v16 = vld [vmem:[%s6328_s3 + $0x1c8] sm:$0xff] }
 0x113   : > { %v2699_v19 = vpop.f32.mrf.mxu0  ;;  %3642 = vmatpush.bf16.msra.mxu3 %v5119_v16 }
 0x114   : > { %v2771_v38 = vadd.f32 %v2697_v35, %v2473_v14  ;;  %v1407_v35 = vld [vmem:[#allocation2 + $0xc8] sm:$0xff] }
 0x115   : > { %v1459_v14 = vpack.c.bf16 %v1408_v59, %v1407_v35 }
 0x116   : > { %2803 = vst [vmem:[%s5787_s12 + $0x20] sm:$0xff] %v2771_v38  ;;  %v2071_v5 = vpop.f32.mrf.mxu2  ;;  %v625_v38 = vand.u32 15, %v439_v58 }
 0x117   : > { %v2144_v44 = vadd.f32 %v2071_v5, %v1622_v23  ;;  %v1705_v5 = vld [vmem:[#allocation2 + $0xc9] sm:$0xff] }
 0x118   : > { %v1552_v63 = vpop.f32.mrf.mxu1  ;;  %v1738_v0 = vadd.s32 1, %v625_v38  ;;  %v441_v38 = vadd.s32 216, %v5258_v10 }
 0x119   : > { %v2401_v32 = vpop.f32.mrf.mxu3  ;;  %v1623_v31 = vadd.f32 %v1552_v63, %v1325_v21  ;;  %v2227_v63 = vld [vmem:[#allocation2 + $0xd7] sm:$0xff]  ;;  %v6415_v21 = vmov 0 }
 0x11a   : > { %v2474_v27 = vadd.f32 %v2401_v32, %v2144_v44  ;;  %v1706_v44 = vld [vmem:[#allocation2 + $0xd1] sm:$0xff]  ;;  %vm1802_vm15 = vcmp.lt.s32.totalorder %v1738_v0, 16 }
 0x11b   : > { %1591 = vmatmul.bf16.gmra.mxu1 %v1458_v4  ;;  %4567 = vmatmul.msk.bf16.gmra.mxu2 %vm5976_vm10, %v4566_v37  ;;  %v2702_v11 = vpop.f32.mrf.mxu0 }
 0x11c   : > { %v2772_v9 = vadd.f32 %v2699_v19, %v2474_v27  ;;  %v1326_v19 = vadd.f32 %v5789_v3, %v5901_v49  ;;  %v4569_v27 = vpack.c.bf16 %v1706_v44, %v1705_v5  ;;  %v5171_v44 = vld [vmem:[%s6325_s0] ss:$0 sm:$0xff] }
 0x11e   : > { %4663 = vmatmul.msk.bf16.gmra.mxu3 %vm5663_vm14, %v4662_v53  ;;  %2804 = vst [vmem:[%s5787_s12 + $0x28] sm:$0xff] %v2772_v9  ;;  %v2074_v50 = vpop.f32.mrf.mxu2  ;;  %2741 = vmatmul.bf16.gmra.mxu0 %v1459_v14  ;;  %v2228_v53 = vld [vmem:[#allocation2 + $0xdf] sm:$0xff]  ;;  %vm5995_vm14 = vmpackc.low %vm1802_vm15, %vm6351_vm3  ;;  %vm6417_vm15 = vnez %v6364_v2 }
 0x11f   : > { %v2145_v55 = vadd.f32 %v2074_v50, %v1623_v31  ;;  %v6416_v21 = vsel %vm5995_vm14, 4294967295, %v6415_v21  ;;  %v4665_v49 = vpack.c.bf16 %v2228_v53, %v2227_v63  ;;  %v1409_v9 = vld [vmem:[#allocation2 + $0xd8] sm:$0xff]  ;;  %v5127_v50 = vld [vmem:[%s6328_s3 + $0x208] sm:$0xff] }
 0x120   : > { %v1554_v13 = vpop.f32.mrf.mxu1  ;;  %3972 = vmatpush.bf16.msra.mxu0 %v5127_v50 }
 0x121   : > { %v2404_v23 = vpop.f32.mrf.mxu3  ;;  %v1624_v32 = vadd.f32 %v1554_v13, %v1326_v19 }
 0x122   : > { %v2475_v4 = vadd.f32 %v2404_v23, %v2145_v55  ;;  %v1327_v55 = vadd.f32 %v5789_v3, %v5761_v56  ;;  %v275_v56 = vld [vmem:[%s5248_s7 + $0xf0] sm:$0xff] }
 0x123   : > { %v2704_v37 = vpop.f32.mrf.mxu0 }
 0x124   : > { %v2773_v7 = vadd.f32 %v2702_v11, %v2475_v4  ;;  %v1410_v11 = vld [vmem:[#allocation2 + $0xe0] sm:$0xff] }
 0x125   : > { %v1460_v13 = vpack.c.bf16 %v1410_v11, %v1409_v9  ;;  %v5102_v4 = vld [vmem:[%s6328_s3 + $0x140] sm:$0xff] }
 0x126   : > { %2805 = vst [vmem:[%s5787_s12 + $0x30] sm:$0xff] %v2773_v7  ;;  %v2076_v35 = vpop.f32.mrf.mxu2  ;;  %v639_v7 = vand.u32 15, %v441_v38  ;;  %3015 = vmatpush.bf16.msra.mxu1 %v5102_v4  ;;  %v1328_v38 = vadd.f32 %v5789_v3, %v5792_v25 }
 0x127   : > { %v2146_v59 = vadd.f32 %v2076_v35, %v1624_v32  ;;  %v5110_v35 = vld [vmem:[%s6328_s3 + $0x180] sm:$0xff] }
 0x128   : > { %v1557_v16 = vpop.f32.mrf.mxu1  ;;  %v1740_v9 = vadd.s32 1, %v639_v7  ;;  %3345 = vmatpush.bf16.msra.mxu2 %v5110_v35  ;;  %v2230_v7 = vld [vmem:[#allocation2 + $0xef] sm:$0xff] }
 0x129   : > { %v2406_v58 = vpop.f32.mrf.mxu3  ;;  %v1625_v19 = vadd.f32 %v1557_v16, %v1327_v55  ;;  %v1707_v55 = vld [vmem:[#allocation2 + $0xd9] sm:$0xff] }
 0x12a   : > { %v2476_v31 = vadd.f32 %v2406_v58, %v2146_v59  ;;  %vm1804_vm3 = vcmp.lt.s32.totalorder %v1740_v9, 16 }
 0x12b   : > { %1596 = vmatmul.bf16.gmra.mxu1 %v1459_v14  ;;  %4570 = vmatmul.msk.bf16.gmra.mxu2 %vm5995_vm14, %v4569_v27  ;;  %v2707_v0 = vpop.f32.mrf.mxu0  ;;  %v276_v14 = vld [vmem:[%s5248_s7 + $0xf8] sm:$0xff]  ;;  %v5172_v27 = vld [vmem:[%s6326_s1] ss:$0 sm:$0xff] }
 0x12c   : > { %v2774_v23 = vadd.f32 %v2704_v37, %v2476_v31  ;;  %v311_v37 = vmul.f32 %v5171_v44, %v275_v56  ;;  %v312_v32 = vmul.f32 %v5171_v44, %v276_v14  ;;  %v2229_v56 = vld [vmem:[#allocation2 + $0xe7] sm:$0xff] }
 0x12e   : > { %4666 = vmatmul.msk.bf16.gmra.mxu3 %vm6417_vm15, %v4665_v49  ;;  %2806 = vst [vmem:[%s5787_s12 + $0x38] sm:$0xff] %v2774_v23  ;;  %v2079_v5 = vpop.f32.mrf.mxu2  ;;  %2746 = vmatmul.bf16.gmra.mxu0 %v1460_v13  ;;  %v6024_v58 = vadd.f32 %v5172_v27, %v311_v37  ;;  %v6026_v16 = vadd.f32 %v5172_v27, %v312_v32  ;;  %v1708_v23 = vld [vmem:[#allocation2 + $0xe1] sm:$0xff]  ;;  %vm6418_vm15 = vmmov 1  }
 0x12f   : > { %v2147_v63 = vadd.f32 %v2079_v5, %v1625_v19  ;;  %v4572_v44 = vpack.c.bf16 %v1708_v23, %v1707_v55  ;;  %vm6038_vm14 = vmpackc.low %vm1804_vm3, %vm6418_vm15  ;;  %v4668_v32 = vpack.c.bf16 %v2230_v7, %v2229_v56  ;;  %v5118_v27 = vld [vmem:[%s6328_s3 + $0x1c0] sm:$0xff]  ;;  %vm6421_vm3 = vnez %v6372_v36 }
 0x130   : > { %v1559_v59 = vpop.f32.mrf.mxu1  ;;  %v379_v11 = vmax.f32 %v6024_v58, 0.0  ;;  %v380_v31 = vmax.f32 %v6026_v16, 0.0  ;;  %3643 = vmatpush.bf16.msra.mxu3 %v5118_v27  ;;  %v2831_v58 = vld [vmem:[#allocation2 + $0x19] sm:$0xff]  ;;  %v2832_v16 = vld [vmem:[#allocation2 + $0x21] sm:$0xff] }
 0x131   : > { %v2409_v53 = vpop.f32.mrf.mxu3  ;;  %v1626_v19 = vadd.f32 %v1559_v59, %v1328_v38  ;;  %v443_v59 = vadd.s32 232, %v5258_v10 }
 0x132   : > { %v2477_v49 = vadd.f32 %v2409_v53, %v2147_v63  ;;  %411 = vst [vmem:[#allocation2 + $0x108] sm:$0xff] %v379_v11  ;;  %v1411_v63 = vld [vmem:[#allocation2 + $0xe8] sm:$0xff]  ;;  %v1412_v53 = vld [vmem:[#allocation2 + $0xf0] sm:$0xff] }
 0x133   : > { %v2709_v4 = vpop.f32.mrf.mxu0  ;;  %412 = vst [vmem:[#allocation2 + $0x110] sm:$0xff] %v380_v31  ;;  %v1461_v38 = vpack.c.bf16 %v1412_v53, %v1411_v63  ;;  %v653_v23 = vand.u32 15, %v443_v59  ;;  %v2232_v53 = vld [vmem:[#allocation2 + $0xff] sm:$0xff] }
 0x134   : > { %v2775_v50 = vadd.f32 %v2707_v0, %v2477_v49  ;;  %v6419_v0 = vmov 0  ;;  %v1329_v49 = vadd.f32 %v5789_v3, %v5803_v42 }
 0x135   : > { %v6420_v0 = vsel %vm6038_vm14, 4294967295, %v6419_v0 }
 0x136   : > { %2807 = vst [vmem:[%s5787_s12 + $0x40] sm:$0xff] %v2775_v50  ;;  %v2081_v14 = vpop.f32.mrf.mxu2 }
 0x137   : > { %v2148_v5 = vadd.f32 %v2081_v14, %v1626_v19  ;;  %v1742_v14 = vadd.s32 1, %v653_v23  ;;  %v1414_v23 = vld [vmem:[#allocation2 + $0x100] sm:$0xff] }
 0x138   : > { %v1562_v25 = vpop.f32.mrf.mxu1 }
 0x139   : > { %v2411_v37 = vpop.f32.mrf.mxu3  ;;  %v1627_v55 = vadd.f32 %v1562_v25, %v1329_v49  ;;  %v2231_v25 = vld [vmem:[#allocation2 + $0xf7] sm:$0xff] }
 0x13a   : > { %v2478_v35 = vadd.f32 %v2411_v37, %v2148_v5  ;;  %v1710_v37 = vld [vmem:[#allocation2 + $0xf1] sm:$0xff] }
 0x13b   : > { %1601 = vmatmul.bf16.gmra.mxu1 %v1460_v13  ;;  %4573 = vmatmul.msk.bf16.gmra.mxu2 %vm6038_vm14, %v4572_v44  ;;  %v2712_v50 = vpop.f32.mrf.mxu0  ;;  %v1709_v44 = vld [vmem:[#allocation2 + $0xe9] sm:$0xff] }
 0x13c   : > { %v2776_v9 = vadd.f32 %v2709_v4, %v2478_v35  ;;  %v1330_v4 = vadd.f32 %v5789_v3, %v5829_v61  ;;  %v4575_v27 = vpack.c.bf16 %v1710_v37, %v1709_v44  ;;  %v4671_v61 = vpack.c.bf16 %v2232_v53, %v2231_v25 }
 0x13e   : > { %4669 = vmatmul.msk.bf16.gmra.mxu3 %vm6421_vm3, %v4668_v32  ;;  %2808 = vst [vmem:[%s5787_s12 + $0x48] sm:$0xff] %v2776_v9  ;;  %v2084_v19 = vpop.f32.mrf.mxu2  ;;  %2751 = vmatmul.bf16.gmra.mxu0 %v1461_v38  ;;  %vm1806_vm3 = vcmp.lt.s32.totalorder %v1742_v14, 16 }
 0x13f   : > { %v2149_v56 = vadd.f32 %v2084_v19, %v1627_v55  ;;  %vm6057_vm14 = vmpackc.low %vm1806_vm3, %vm6418_vm15  ;;  %v6422_v55 = vmov 0  ;;  %vm6424_vm3 = vnez %v6380_v39 }
 0x140   : > { %v1564_v42 = vpop.f32.mrf.mxu1  ;;  %v6423_v55 = vsel %vm6057_vm14, 4294967295, %v6422_v55 }
 0x141   : > { %v2414_v7 = vpop.f32.mrf.mxu3  ;;  %v1628_v63 = vadd.f32 %v1564_v42, %v1330_v4  ;;  %v1331_v42 = vadd.f32 %v5789_v3, %v5837_v18 }
 0x142   : > { %v2479_v13 = vadd.f32 %v2414_v7, %v2149_v56  ;;  %v445_v56 = vadd.s32 248, %v5258_v10  ;;  %v5126_v7 = vld [vmem:[%s6328_s3 + $0x200] sm:$0xff] }
 0x143   : > { %v2714_v32 = vpop.f32.mrf.mxu0  ;;  %3973 = vmatpush.bf16.msra.mxu0 %v5126_v7 }
 0x144   : > { %v2777_v5 = vadd.f32 %v2712_v50, %v2479_v13  ;;  %v1413_v50 = vld [vmem:[#allocation2 + $0xf8] sm:$0xff]  ;;  %v667_v10 = vand.u32 15, %v445_v56 }
 0x145   : > { %v1462_v14 = vpack.c.bf16 %v1414_v23, %v1413_v50 }
 0x146   : > { %2809 = vst [vmem:[%s5787_s12 + $0x50] sm:$0xff] %v2777_v5  ;;  %v2086_v35 = vpop.f32.mrf.mxu2  ;;  %v1744_v25 = vadd.s32 1, %v667_v10  ;;  %v2612_v10 = vpack.c.bf16 %v380_v31, %v379_v11  ;;  %v3161_v11 = vld [vmem:[#allocation2 + $0x27] sm:$0xff]  ;;  %v3162_v31 = vld [vmem:[#allocation2 + $0x2f] sm:$0xff] }
 0x147   : > { %v2150_v59 = vadd.f32 %v2086_v35, %v1628_v63  ;;  %v1711_v35 = vld [vmem:[#allocation2 + $0xf9] sm:$0xff] }
 0x148   : > { %v1567_v9 = vpop.f32.mrf.mxu1 }
 0x149   : > { %v2416_v49 = vpop.f32.mrf.mxu3  ;;  %v1629_v5 = vadd.f32 %v1567_v9, %v1331_v42  ;;  %v2233_v9 = vld [vmem:[#allocation2 + $0x107] sm:$0xff] }
 0x14a   : > { %v2480_v19 = vadd.f32 %v2416_v49, %v2150_v59  ;;  %v1712_v59 = vld [vmem:[#allocation2 + $0x101] sm:$0xff] }
 0x14b   : > { %1606 = vmatmul.bf16.gmra.mxu1 %v1461_v38  ;;  %4576 = vmatmul.msk.bf16.gmra.mxu2 %vm6057_vm14, %v4575_v27  ;;  %v2717_v4 = vpop.f32.mrf.mxu0 }
 0x14c   : > { %v2778_v13 = vadd.f32 %v2714_v32, %v2480_v19  ;;  %v1332_v32 = vadd.f32 %v5789_v3, %v5867_v15  ;;  %v4578_v19 = vpack.c.bf16 %v1712_v59, %v1711_v35  ;;  %v3491_v59 = vld [vmem:[#allocation2 + $0x28] sm:$0xff] }
 0x14e   : > { %4672 = vmatmul.msk.bf16.gmra.mxu3 %vm6424_vm3, %v4671_v61  ;;  %2810 = vst [vmem:[%s5787_s12 + $0x58] sm:$0xff] %v2778_v13  ;;  %v2089_v44 = vpop.f32.mrf.mxu2  ;;  %2756 = vmatmul.bf16.gmra.mxu0 %v1462_v14  ;;  %vm1808_vm3 = vcmp.lt.s32.totalorder %v1744_v25, 16  ;;  %v2234_v61 = vld [vmem:[#allocation2 + $0x10f] sm:$0xff]  ;;  %v1334_v25 = vadd.f32 %v5789_v3, %v5896_v6 }
 0x14f   : > { %v2151_v37 = vadd.f32 %v2089_v44, %v1629_v5  ;;  %vm6076_vm14 = vmpackc.low %vm1808_vm3, %vm6418_vm15  ;;  %v4674_v15 = vpack.c.bf16 %v2234_v61, %v2233_v9  ;;  %v4773_v61 = vpack.c.bf16 %v2832_v16, %v2831_v58  ;;  %v2834_v6 = vld [vmem:[#allocation2 + $0x31] sm:$0xff]  ;;  %vm6427_vm15 = vnez %v6392_v51 }
 0x150   : > { %v1569_v18 = vpop.f32.mrf.mxu1  ;;  %vm6428_vm3 = vnez %v6366_v22  ;;  %v1432_v22 = vld [vmem:[%s5787_s12 + $0x88] sm:$0xff]  ;;  %v3493_v16 = vld [vmem:[#allocation2 + $0x38] sm:$0xff] }
 0x151   : > { %v2419_v63 = vpop.f32.mrf.mxu3  ;;  %v1630_v49 = vadd.f32 %v1569_v18, %v1332_v32 }
 0x152   : > { %v2481_v38 = vadd.f32 %v2419_v63, %v2151_v37 }
 0x153   : > { %v2719_v27 = vpop.f32.mrf.mxu0 }
 0x154   : > { %v2779_v53 = vadd.f32 %v2717_v4, %v2481_v38  ;;  %v1333_v4 = vadd.f32 %v5789_v3, %v5875_v33  ;;  %v2833_v3 = vld [vmem:[#allocation2 + $0x29] sm:$0xff] }
 0x156   : > { %2811 = vst [vmem:[%s5787_s12 + $0x60] sm:$0xff] %v2779_v53  ;;  %v2091_v50 = vpop.f32.mrf.mxu2 }
 0x157   : > { %v2152_v23 = vadd.f32 %v2091_v50, %v1630_v49  ;;  %v4869_v50 = vpack.c.bf16 %v3162_v31, %v3161_v11  ;;  %v3494_v11 = vld [vmem:[#allocation2 + $0x40] sm:$0xff] }
 0x158   : > { %v1572_v7 = vpop.f32.mrf.mxu1  ;;  %v3556_v51 = vpack.c.bf16 %v3494_v11, %v3493_v16  ;;  %v2838_v16 = vld [vmem:[#allocation2 + $0x51] sm:$0xff] }
 0x159   : > { %v2421_v56 = vpop.f32.mrf.mxu3  ;;  %v1631_v37 = vadd.f32 %v1572_v7, %v1333_v4  ;;  %v1431_v4 = vld [vmem:[%s5787_s12 + $0x80] sm:$0xff] }
 0x15a   : > { %v2482_v13 = vadd.f32 %v2421_v56, %v2152_v23 }
 0x15b   : > { %1611 = vmatmul.bf16.gmra.mxu1 %v1462_v14  ;;  %4579 = vmatmul.msk.bf16.gmra.mxu2 %vm6076_vm14, %v4578_v19  ;;  %v2722_v44 = vpop.f32.mrf.mxu0 }
 0x15c   : > { %v2780_v5 = vadd.f32 %v2719_v27, %v2482_v13  ;;  %v3492_v27 = vld [vmem:[#allocation2 + $0x30] sm:$0xff]  ;;  %v4776_v13 = vpack.c.bf16 %v2834_v6, %v2833_v3 }
 0x15d   : > { %v3555_v56 = vpack.c.bf16 %v3492_v27, %v3491_v59 }
 0x15e   : > { %4675 = vmatmul.msk.bf16.gmra.mxu3 %vm5668_vm6, %v4674_v15  ;;  %2812 = vst [vmem:[%s5787_s12 + $0x68] sm:$0xff] %v2780_v5  ;;  %v2094_v63 = vpop.f32.mrf.mxu2  ;;  %2761 = vmatmul.bf16.gmra.mxu0 %v2612_v10 }
 0x15f   : > { %v2153_v18 = vadd.f32 %v2094_v63, %v1631_v37 }
 0x160   : > { %v1574_v14 = vpop.f32.mrf.mxu1 }
 0x161   : > { %v2424_v33 = vpop.f32.mrf.mxu3  ;;  %v1632_v35 = vadd.f32 %v1574_v14, %v1334_v25  ;;  %v3164_v25 = vld [vmem:[#allocation2 + $0x3f] sm:$0xff] }
 0x162   : > { %v2483_v38 = vadd.f32 %v2424_v33, %v2153_v18 }
 0x163   : > { %v2724_v53 = vpop.f32.mrf.mxu0 }
 0x164   : > { %v2781_v32 = vadd.f32 %v2722_v44, %v2483_v38  ;;  %v3163_v38 = vld [vmem:[#allocation2 + $0x37] sm:$0xff] }
 0x166   : > { %2813 = vst [vmem:[%s5787_s12 + $0x70] sm:$0xff] %v2781_v32  ;;  %v2096_v49 = vpop.f32.mrf.mxu2 }
 0x167   : > { %v2154_v9 = vadd.f32 %v2096_v49, %v1632_v35  ;;  %v4872_v35 = vpack.c.bf16 %v3164_v25, %v3163_v38  ;;  %v2835_v49 = vld [vmem:[#allocation2 + $0x39] sm:$0xff] }
 0x168   : > { %v1577_v19 = vpop.f32.mrf.mxu1 }
 0x169   : > { %v2426_v23 = vpop.f32.mrf.mxu3  ;;  %v1633_v10 = vadd.f32 %v1577_v19, %v1431_v4  ;;  %v1433_v19 = vld [vmem:[%s5787_s12 + $0x90] sm:$0xff] }
 0x16a   : > { %v2484_v7 = vadd.f32 %v2426_v23, %v2154_v9  ;;  %v2836_v9 = vld [vmem:[#allocation2 + $0x41] sm:$0xff] }
 0x16b   : > { %4774 = vmatmul.msk.bf16.vlgmr.msra.gmra.mxu1 %vm6427_vm15, %v4773_v61  ;;  %4870 = vmatmul.msk.bf16.vlgmr.msra.gmra.mxu2 %vm6428_vm3, %v4869_v50  ;;  %v2727_v5 = vpop.f32.mrf.mxu0  ;;  %v4779_v23 = vpack.c.bf16 %v2836_v9, %v2835_v49  ;;  %vm6442_vm3 = vnez %v6372_v36 }
 0x16c   : > { %v2782_v15 = vadd.f32 %v2724_v53, %v2484_v7 }
 0x16e   : > { %3644 = vmatmul.bf16.vlgmr.msra.gmra.mxu3 %v3555_v56  ;;  %2814 = vst [vmem:[%s5787_s12 + $0x78] sm:$0xff] %v2782_v15  ;;  %v2099_v44 = vpop.f32.mrf.mxu2  ;;  %5014 = vmatmul.msk.bf16.vlgmr.msra.gmra.mxu0 %vm6427_vm15, %v4776_v13  ;;  %vm6441_vm15 = vnez %v6420_v0 }
 0x16f   : > { %v2155_v37 = vadd.f32 %v2099_v44, %v1633_v10  ;;  %v3165_v10 = vld [vmem:[#allocation2 + $0x47] sm:$0xff]  ;;  %v3166_v44 = vld [vmem:[#allocation2 + $0x4f] sm:$0xff] }
 0x170   : > { %v1579_v18 = vpop.f32.mrf.mxu1  ;;  %v4875_v38 = vpack.c.bf16 %v3166_v44, %v3165_v10  ;;  %v2839_v44 = vld [vmem:[#allocation2 + $0x59] sm:$0xff] }
 0x171   : > { %v2429_v63 = vpop.f32.mrf.mxu3  ;;  %v1634_v32 = vadd.f32 %v1579_v18, %v1432_v22  ;;  %v3495_v18 = vld [vmem:[#allocation2 + $0x48] sm:$0xff] }
 0x172   : > { %v2485_v33 = vadd.f32 %v2429_v63, %v2155_v37 }
 0x173   : > { %v2729_v58 = vpop.f32.mrf.mxu0 }
 0x174   : > { %v2783_v14 = vadd.f32 %v2727_v5, %v2485_v33  ;;  %v3496_v33 = vld [vmem:[#allocation2 + $0x50] sm:$0xff] }
 0x175   : > { %v3557_v62 = vpack.c.bf16 %v3496_v33, %v3495_v18 }
 0x176   : > { %2815 = vst [vmem:[%s5787_s12 + $0x80] sm:$0xff] %v2783_v14  ;;  %v2101_v31 = vpop.f32.mrf.mxu2 }
 0x177   : > { %v2156_v53 = vadd.f32 %v2101_v31, %v1634_v32  ;;  %v2837_v32 = vld [vmem:[#allocation2 + $0x49] sm:$0xff] }
 0x178   : > { %v1582_v27 = vpop.f32.mrf.mxu1 }
 0x179   : > { %v2431_v59 = vpop.f32.mrf.mxu3  ;;  %v1635_v3 = vadd.f32 %v1582_v27, %v1433_v19  ;;  %v3167_v19 = vld [vmem:[#allocation2 + $0x57] sm:$0xff] }
 0x17a   : > { %v2486_v61 = vadd.f32 %v2431_v59, %v2156_v53  ;;  %v4782_v53 = vpack.c.bf16 %v2838_v16, %v2837_v32 }
 0x17b   : > { %4777 = vmatmul.msk.bf16.gmra.mxu1 %vm5716_vm2, %v4776_v13  ;;  %4873 = vmatmul.msk.bf16.gmra.mxu2 %vm5561_vm0, %v4872_v35  ;;  %v2732_v56 = vpop.f32.mrf.mxu0  ;;  %vm6429_vm0 = vnez %v6396_v1  ;;  %v1435_v35 = vld [vmem:[%s5787_s12 + $0xa0] sm:$0xff] }
 0x17c   : > { %v2784_v50 = vadd.f32 %v2729_v58, %v2486_v61 }
 0x17e   : > { %3649 = vmatmul.bf16.gmra.mxu3 %v3556_v51  ;;  %2816 = vst [vmem:[%s5787_s12 + $0x88] sm:$0xff] %v2784_v50  ;;  %v2104_v6 = vpop.f32.mrf.mxu2  ;;  %5017 = vmatmul.msk.bf16.gmra.mxu0 %vm5716_vm2, %v4779_v23  ;;  %vm6430_vm2 = vnez %v6382_v52  ;;  %v1436_v52 = vld [vmem:[%s5787_s12 + $0xa8] sm:$0xff] }
 0x17f   : > { %v2157_v7 = vadd.f32 %v2104_v6, %v1635_v3 }
 0x180   : > { %v1584_v4 = vpop.f32.mrf.mxu1 }
 0x181   : > { %v2434_v15 = vpop.f32.mrf.mxu3  ;;  %v1636_v63 = vadd.f32 %v1584_v4, %v1434_v48 }
 0x182   : > { %v2487_v13 = vadd.f32 %v2434_v15, %v2157_v7  ;;  %v3497_v7 = vld [vmem:[#allocation2 + $0x58] sm:$0xff]  ;;  %v3498_v15 = vld [vmem:[#allocation2 + $0x60] sm:$0xff] }
 0x183   : > { %v2734_v37 = vpop.f32.mrf.mxu0  ;;  %v3558_v1 = vpack.c.bf16 %v3498_v15, %v3497_v7  ;;  %v1439_v7 = vld [vmem:[%s5787_s12 + $0xc0] sm:$0xff] }
 0x184   : > { %v2785_v5 = vadd.f32 %v2732_v56, %v2487_v13  ;;  %v3168_v56 = vld [vmem:[#allocation2 + $0x5f] sm:$0xff] }
 0x186   : > { %2817 = vst [vmem:[%s5787_s12 + $0x90] sm:$0xff] %v2785_v5  ;;  %v2106_v14 = vpop.f32.mrf.mxu2  ;;  %v4878_v5 = vpack.c.bf16 %v3168_v56, %v3167_v19  ;;  %v2842_v19 = vld [vmem:[#allocation2 + $0x71] sm:$0xff] }
 0x187   : > { %v2158_v22 = vadd.f32 %v2106_v14, %v1636_v63  ;;  %v1437_v14 = vld [vmem:[%s5787_s12 + $0xb0] sm:$0xff] }
 0x188   : > { %v1587_v58 = vpop.f32.mrf.mxu1 }
 0x189   : > { %v2436_v25 = vpop.f32.mrf.mxu3  ;;  %v1637_v27 = vadd.f32 %v1587_v58, %v1435_v35 }
 0x18a   : > { %v2488_v11 = vadd.f32 %v2436_v25, %v2158_v22 }
 0x18b   : > { %4780 = vmatmul.msk.bf16.gmra.mxu1 %vm6429_vm0, %v4779_v23  ;;  %4876 = vmatmul.msk.bf16.gmra.mxu2 %vm6430_vm2, %v4875_v38  ;;  %v2737_v59 = vpop.f32.mrf.mxu0  ;;  %vm6444_vm2 = vnez %v6380_v39 }
 0x18c   : > { %v2786_v31 = vadd.f32 %v2734_v37, %v2488_v11  ;;  %v2840_v37 = vld [vmem:[#allocation2 + $0x61] sm:$0xff] }
 0x18d   : > { %v4785_v33 = vpack.c.bf16 %v2840_v37, %v2839_v44  ;;  %v3171_v37 = vld [vmem:[#allocation2 + $0x77] sm:$0xff] }
 0x18e   : > { %3654 = vmatmul.bf16.gmra.mxu3 %v3557_v62  ;;  %2818 = vst [vmem:[%s5787_s12 + $0x98] sm:$0xff] %v2786_v31  ;;  %v2109_v51 = vpop.f32.mrf.mxu2  ;;  %5020 = vmatmul.msk.bf16.gmra.mxu0 %vm6429_vm0, %v4782_v53  ;;  %v3169_v31 = vld [vmem:[#allocation2 + $0x67] sm:$0xff]  ;;  %vm6443_vm0 = vnez %v6423_v55 }
 0x18f   : > { %v2159_v49 = vadd.f32 %v2109_v51, %v1637_v27  ;;  %v3499_v27 = vld [vmem:[#allocation2 + $0x68] sm:$0xff]  ;;  %v3500_v51 = vld [vmem:[#allocation2 + $0x70] sm:$0xff] }
 0x190   : > { %v1589_v61 = vpop.f32.mrf.mxu1  ;;  %v3559_v41 = vpack.c.bf16 %v3500_v51, %v3499_v27 }
 0x191   : > { %v2439_v9 = vpop.f32.mrf.mxu3  ;;  %v1638_v6 = vadd.f32 %v1589_v61, %v1436_v52  ;;  %v2841_v52 = vld [vmem:[#allocation2 + $0x69] sm:$0xff] }
 0x192   : > { %v2489_v50 = vadd.f32 %v2439_v9, %v2159_v49 }
 0x193   : > { %v2739_v3 = vpop.f32.mrf.mxu0 }
 0x194   : > { %v2787_v23 = vadd.f32 %v2737_v59, %v2489_v50 }
 0x196   : > { %2819 = vst [vmem:[%s5787_s12 + $0xa0] sm:$0xff] %v2787_v23  ;;  %v2111_v4 = vpop.f32.mrf.mxu2 }
 0x197   : > { %v2160_v13 = vadd.f32 %v2111_v4, %v1638_v6  ;;  %v4788_v6 = vpack.c.bf16 %v2842_v19, %v2841_v52  ;;  %v3174_v52 = vld [vmem:[#allocation2 + $0x8f] sm:$0xff] }
 0x198   : > { %v1592_v10 = vpop.f32.mrf.mxu1 }
 0x199   : > { %v2441_v48 = vpop.f32.mrf.mxu3  ;;  %v1639_v38 = vadd.f32 %v1592_v10, %v1437_v14  ;;  %v3501_v14 = vld [vmem:[#allocation2 + $0x78] sm:$0xff] }
 0x19a   : > { %v2490_v63 = vadd.f32 %v2441_v48, %v2160_v13 }
 0x19b   : > { %4783 = vmatmul.msk.bf16.gmra.mxu1 %vm5749_vm8, %v4782_v53  ;;  %4879 = vmatmul.msk.bf16.gmra.mxu2 %vm5681_vm9, %v4878_v5  ;;  %v2742_v22 = vpop.f32.mrf.mxu0  ;;  %v3170_v53 = vld [vmem:[#allocation2 + $0x6f] sm:$0xff]  ;;  %vm6440_vm9 = vnez %v6364_v2 }
 0x19c   : > { %v2788_v18 = vadd.f32 %v2739_v3, %v2490_v63  ;;  %v4881_v61 = vpack.c.bf16 %v3170_v53, %v3169_v31  ;;  %v3172_v63 = vld [vmem:[#allocation2 + $0x7f] sm:$0xff] }
 0x19e   : > { %3659 = vmatmul.bf16.gmra.mxu3 %v3558_v1  ;;  %2820 = vst [vmem:[%s5787_s12 + $0xa8] sm:$0xff] %v2788_v18  ;;  %v2114_v25 = vpop.f32.mrf.mxu2  ;;  %5023 = vmatmul.msk.bf16.gmra.mxu0 %vm5749_vm8, %v4785_v33  ;;  %vm6431_vm8 = vnez %v6360_v46  ;;  %v1440_v46 = vld [vmem:[%s5787_s12 + $0xc8] sm:$0xff] }
 0x19f   : > { %v2161_v58 = vadd.f32 %v2114_v25, %v1639_v38 }
 0x1a0   : > { %v1594_v32 = vpop.f32.mrf.mxu1 }
 0x1a1   : > { %v2444_v62 = vpop.f32.mrf.mxu3  ;;  %v1640_v59 = vadd.f32 %v1594_v32, %v1438_v30 }
 0x1a2   : > { %v2491_v16 = vadd.f32 %v2444_v62, %v2161_v58  ;;  %v4884_v58 = vpack.c.bf16 %v3172_v63, %v3171_v37  ;;  %v1443_v37 = vld [vmem:[%s5787_s12 + $0xe0] sm:$0xff] }
 0x1a3   : > { %v2744_v35 = vpop.f32.mrf.mxu0 }
 0x1a4   : > { %v2789_v11 = vadd.f32 %v2742_v22, %v2491_v16  ;;  %v3502_v22 = vld [vmem:[#allocation2 + $0x80] sm:$0xff] }
 0x1a5   : > { %v3560_v57 = vpack.c.bf16 %v3502_v22, %v3501_v14  ;;  %v2843_v16 = vld [vmem:[#allocation2 + $0x79] sm:$0xff] }
 0x1a6   : > { %2821 = vst [vmem:[%s5787_s12 + $0xb0] sm:$0xff] %v2789_v11  ;;  %v2116_v49 = vpop.f32.mrf.mxu2  ;;  %v2844_v11 = vld [vmem:[#allocation2 + $0x81] sm:$0xff] }
 0x1a7   : > { %v2162_v9 = vadd.f32 %v2116_v49, %v1640_v59  ;;  %v4791_v53 = vpack.c.bf16 %v2844_v11, %v2843_v16  ;;  %v3505_v11 = vld [vmem:[#allocation2 + $0x98] sm:$0xff] }
 0x1a8   : > { %v1597_v23 = vpop.f32.mrf.mxu1 }
 0x1a9   : > { %v2446_v50 = vpop.f32.mrf.mxu3  ;;  %v1641_v4 = vadd.f32 %v1597_v23, %v1439_v7 }
 0x1aa   : > { %v2492_v56 = vadd.f32 %v2446_v50, %v2162_v9 }
 0x1ab   : > { %4786 = vmatmul.msk.bf16.gmra.mxu1 %vm5764_vm1, %v4785_v33  ;;  %4882 = vmatmul.msk.bf16.gmra.mxu2 %vm6431_vm8, %v4881_v61  ;;  %v2747_v15 = vpop.f32.mrf.mxu0 }
 0x1ac   : > { %v2790_v3 = vadd.f32 %v2744_v35, %v2492_v56  ;;  %v1441_v35 = vld [vmem:[%s5787_s12 + $0xd0] sm:$0xff] }
 0x1ae   : > { %3664 = vmatmul.bf16.gmra.mxu3 %v3559_v41  ;;  %2822 = vst [vmem:[%s5787_s12 + $0xb8] sm:$0xff] %v2790_v3  ;;  %v2119_v13 = vpop.f32.mrf.mxu2  ;;  %5026 = vmatmul.msk.bf16.gmra.mxu0 %vm5764_vm1, %v4788_v6  ;;  %vm6432_vm1 = vnez %v6368_v24  ;;  %v1442_v24 = vld [vmem:[%s5787_s12 + $0xd8] sm:$0xff]  ;;  %v3173_v41 = vld [vmem:[#allocation2 + $0x87] sm:$0xff] }
 0x1af   : > { %v2163_v5 = vadd.f32 %v2119_v13, %v1641_v4  ;;  %v3503_v3 = vld [vmem:[#allocation2 + $0x88] sm:$0xff]  ;;  %v4887_v4 = vpack.c.bf16 %v3174_v52, %v3173_v41 }
 0x1b0   : > { %v1599_v10 = vpop.f32.mrf.mxu1 }
 0x1b1   : > { %v2449_v48 = vpop.f32.mrf.mxu3  ;;  %v1642_v33 = vadd.f32 %v1599_v10, %v1440_v46  ;;  %v2846_v10 = vld [vmem:[#allocation2 + $0x91] sm:$0xff] }
 0x1b2   : > { %v2493_v1 = vadd.f32 %v2449_v48, %v2163_v5  ;;  %v2845_v48 = vld [vmem:[#allocation2 + $0x89] sm:$0xff] }
 0x1b3   : > { %v2749_v18 = vpop.f32.mrf.mxu0  ;;  %v4794_v46 = vpack.c.bf16 %v2846_v10, %v2845_v48  ;;  %v3508_v48 = vld [vmem:[#allocation2 + $0xb0] sm:$0xff] }
 0x1b4   : > { %v2791_v44 = vadd.f32 %v2747_v15, %v2493_v1 }
 0x1b6   : > { %2823 = vst [vmem:[%s5787_s12 + $0xc0] sm:$0xff] %v2791_v44  ;;  %v2121_v38 = vpop.f32.mrf.mxu2 }
 0x1b7   : > { %v2164_v25 = vadd.f32 %v2121_v38, %v1642_v33 }
 0x1b8   : > { %v1602_v32 = vpop.f32.mrf.mxu1 }
 0x1b9   : > { %v2451_v62 = vpop.f32.mrf.mxu3  ;;  %v1643_v27 = vadd.f32 %v1602_v32, %v1441_v35  ;;  %v3176_v32 = vld [vmem:[#allocation2 + $0x9f] sm:$0xff] }
 0x1ba   : > { %v2494_v30 = vadd.f32 %v2451_v62, %v2164_v25  ;;  %v3175_v62 = vld [vmem:[#allocation2 + $0x97] sm:$0xff] }
 0x1bb   : > { %4789 = vmatmul.msk.bf16.gmra.mxu1 %vm5806_vm4, %v4788_v6  ;;  %4885 = vmatmul.msk.bf16.gmra.mxu2 %vm6432_vm1, %v4884_v58  ;;  %v2752_v59 = vpop.f32.mrf.mxu0  ;;  %v3504_v6 = vld [vmem:[#allocation2 + $0x90] sm:$0xff]  ;;  %v4890_v35 = vpack.c.bf16 %v3176_v32, %v3175_v62 }
 0x1bc   : > { %v2792_v31 = vadd.f32 %v2749_v18, %v2494_v30  ;;  %v3561_v43 = vpack.c.bf16 %v3504_v6, %v3503_v3  ;;  %v3506_v30 = vld [vmem:[#allocation2 + $0xa0] sm:$0xff] }
 0x1bd   : > { %v3562_v54 = vpack.c.bf16 %v3506_v30, %v3505_v11  ;;  %v3179_v30 = vld [vmem:[#allocation2 + $0xb7] sm:$0xff] }
 0x1be   : > { %3669 = vmatmul.bf16.gmra.mxu3 %v3560_v57  ;;  %2824 = vst [vmem:[%s5787_s12 + $0xc8] sm:$0xff] %v2792_v31  ;;  %v2124_v51 = vpop.f32.mrf.mxu2  ;;  %5029 = vmatmul.msk.bf16.gmra.mxu0 %vm5806_vm4, %v4791_v53  ;;  %vm6433_vm4 = vnez %v6376_v17  ;;  %v1444_v17 = vld [vmem:[%s5787_s12 + $0xe8] sm:$0xff] }
 0x1bf   : > { %v2165_v49 = vadd.f32 %v2124_v51, %v1643_v27  ;;  %v2847_v51 = vld [vmem:[#allocation2 + $0x99] sm:$0xff] }
 0x1c0   : > { %v1604_v61 = vpop.f32.mrf.mxu1 }
 0x1c1   : > { %v2454_v9 = vpop.f32.mrf.mxu3  ;;  %v1644_v56 = vadd.f32 %v1604_v61, %v1442_v24 }
 0x1c2   : > { %v2495_v50 = vadd.f32 %v2454_v9, %v2165_v49  ;;  %v2848_v49 = vld [vmem:[#allocation2 + $0xa1] sm:$0xff] }
 0x1c3   : > { %v2754_v19 = vpop.f32.mrf.mxu0 }
 0x1c4   : > { %v2793_v23 = vadd.f32 %v2752_v59, %v2495_v50  ;;  %v4797_v50 = vpack.c.bf16 %v2848_v49, %v2847_v51 }
 0x1c6   : > { %2825 = vst [vmem:[%s5787_s12 + $0xd0] sm:$0xff] %v2793_v23  ;;  %v2126_v7 = vpop.f32.mrf.mxu2  ;;  %v1445_v23 = vld [vmem:[%s5787_s12 + $0xf0] sm:$0xff] }
 0x1c7   : > { %v2166_v15 = vadd.f32 %v2126_v7, %v1644_v56 }
 0x1c8   : > { %v1607_v5 = vpop.f32.mrf.mxu1 }
 0x1c9   : > { %v2456_v13 = vpop.f32.mrf.mxu3  ;;  %v1645_v18 = vadd.f32 %v1607_v5, %v1443_v37 }
 0x1ca   : > { %v2496_v1 = vadd.f32 %v2456_v13, %v2166_v15  ;;  %v3177_v15 = vld [vmem:[#allocation2 + $0xa7] sm:$0xff] }
 0x1cb   : > { %4792 = vmatmul.msk.bf16.gmra.mxu1 %vm5840_vm12, %v4791_v53  ;;  %4888 = vmatmul.msk.bf16.gmra.mxu2 %vm6433_vm4, %v4887_v4  ;;  %v2757_v63 = vpop.f32.mrf.mxu0  ;;  %v3178_v4 = vld [vmem:[#allocation2 + $0xaf] sm:$0xff] }
 0x1cc   : > { %v2794_v44 = vadd.f32 %v2754_v19, %v2496_v1 }
 0x1ce   : > { %3674 = vmatmul.bf16.gmra.mxu3 %v3561_v43  ;;  %2826 = vst [vmem:[%s5787_s12 + $0xd8] sm:$0xff] %v2794_v44  ;;  %v2129_v33 = vpop.f32.mrf.mxu2  ;;  %5032 = vmatmul.msk.bf16.gmra.mxu0 %vm5840_vm12, %v4794_v46  ;;  %vm6434_vm12 = vnez %v6384_v8  ;;  %v1446_v8 = vld [vmem:[%s5787_s12 + $0xf8] sm:$0xff]  ;;  %v3507_v43 = vld [vmem:[#allocation2 + $0xa8] sm:$0xff]  ;;  %v4893_v44 = vpack.c.bf16 %v3178_v4, %v3177_v15 }
 0x1cf   : > { %v2167_v14 = vadd.f32 %v2129_v33, %v1645_v18  ;;  %v3563_v40 = vpack.c.bf16 %v3508_v48, %v3507_v43  ;;  %v2850_v18 = vld [vmem:[#allocation2 + $0xb1] sm:$0xff] }
 0x1d0   : > { %v1609_v38 = vpop.f32.mrf.mxu1 }
 0x1d1   : > { %v2459_v22 = vpop.f32.mrf.mxu3  ;;  %v1646_v16 = vadd.f32 %v1609_v38, %v1444_v17  ;;  %v2895_v38 = vld [vmem:[%s5787_s12] sm:$0xff] }
 0x1d2   : > { %v2497_v25 = vadd.f32 %v2459_v22, %v2167_v14 }
 0x1d3   : > { %v2759_v57 = vpop.f32.mrf.mxu0 }
 0x1d4   : > { %v2795_v58 = vadd.f32 %v2757_v63, %v2497_v25  ;;  %v2849_v63 = vld [vmem:[#allocation2 + $0xa9] sm:$0xff] }
 0x1d5   : > { %v4800_v22 = vpack.c.bf16 %v2850_v18, %v2849_v63  ;;  %v3511_v18 = vld [vmem:[#allocation2 + $0xc8] sm:$0xff] }
 0x1d6   : > { %2827 = vst [vmem:[%s5787_s12 + $0xe0] sm:$0xff] %v2795_v58  ;;  %v2131_v31 = vpop.f32.mrf.mxu2 }
 0x1d7   : > { %v2168_v53 = vadd.f32 %v2131_v31, %v1646_v16  ;;  %v3180_v31 = vld [vmem:[#allocation2 + $0xbf] sm:$0xff] }
 0x1d8   : > { %v1612_v27 = vpop.f32.mrf.mxu1  ;;  %v4896_v49 = vpack.c.bf16 %v3180_v31, %v3179_v30 }
 0x1d9   : > { %v2461_v59 = vpop.f32.mrf.mxu3  ;;  %v1647_v41 = vadd.f32 %v1612_v27, %v1445_v23  ;;  %v3510_v27 = vld [vmem:[#allocation2 + $0xc0] sm:$0xff] }
 0x1da   : > { %v2498_v9 = vadd.f32 %v2461_v59, %v2168_v53  ;;  %v3509_v59 = vld [vmem:[#allocation2 + $0xb8] sm:$0xff]  ;;  %v2852_v23 = vld [vmem:[#allocation2 + $0xc1] sm:$0xff] }
 0x1db   : > { %4795 = vmatmul.msk.bf16.gmra.mxu1 %vm5878_vm7, %v4794_v46  ;;  %4891 = vmatmul.msk.bf16.gmra.mxu2 %vm6434_vm12, %v4890_v35  ;;  %v2762_v24 = vpop.f32.mrf.mxu0  ;;  %v3564_v45 = vpack.c.bf16 %v3510_v27, %v3509_v59 }
 0x1dc   : > { %v2796_v61 = vadd.f32 %v2759_v57, %v2498_v9 }
 0x1de   : > { %3679 = vmatmul.bf16.gmra.mxu3 %v3562_v54  ;;  %2828 = vst [vmem:[%s5787_s12 + $0xe8] sm:$0xff] %v2796_v61  ;;  %v2134_v52 = vpop.f32.mrf.mxu2  ;;  %5035 = vmatmul.msk.bf16.gmra.mxu0 %vm5878_vm7, %v4797_v50  ;;  %vm6435_vm7 = vnez %v6362_v60  ;;  %v2896_v60 = vld [vmem:[%s5787_s12 + $0x8] sm:$0xff] }
 0x1df   : > { %v2169_v19 = vadd.f32 %v2134_v52, %v1647_v41 }
 0x1e0   : > { %v1614_v3 = vpop.f32.mrf.mxu1 }
 0x1e1   : > { %v2464_v56 = vpop.f32.mrf.mxu3  ;;  %v1648_v5 = vadd.f32 %v1614_v3, %v1446_v8 }
 0x1e2   : > { %v2499_v6 = vadd.f32 %v2464_v56, %v2169_v19  ;;  %v2897_v19 = vld [vmem:[%s5787_s12 + $0x10] sm:$0xff] }
 0x1e3   : > { %v2764_v13 = vpop.f32.mrf.mxu0 }
 0x1e4   : > { %v2797_v7 = vadd.f32 %v2762_v24, %v2499_v6 }
 0x1e6   : > { %2829 = vst [vmem:[%s5787_s12 + $0xf0] sm:$0xff] %v2797_v7  ;;  %v2136_v10 = vpop.f32.mrf.mxu2 }
 0x1e7   : > { %v2170_v1 = vadd.f32 %v2136_v10, %v1648_v5  ;;  %v2898_v10 = vld [vmem:[%s5787_s12 + $0x18] sm:$0xff] }
 0x1e8   : > { %v3017_v37 = vpop.f32.mrf.mxu1 }
 0x1e9   : > { %v2466_v46 = vpop.f32.mrf.mxu3  ;;  %v3097_v58 = vadd.f32 %v3017_v37, %v2895_v38 }
 0x1ea   : > { %v2500_v33 = vadd.f32 %v2466_v46, %v2170_v1  ;;  %v3181_v1 = vld [vmem:[#allocation2 + $0xc7] sm:$0xff] }
 0x1eb   : > { %4798 = vmatmul.msk.bf16.gmra.mxu1 %vm5905_vm11, %v4797_v50  ;;  %4894 = vmatmul.msk.bf16.gmra.mxu2 %vm6435_vm7, %v4893_v44  ;;  %v3975_v25 = vpop.f32.mrf.mxu0  ;;  %v2851_v50 = vld [vmem:[#allocation2 + $0xb9] sm:$0xff]  ;;  %v3182_v44 = vld [vmem:[#allocation2 + $0xcf] sm:$0xff] }
 0x1ec   : > { %v2798_v14 = vadd.f32 %v2764_v13, %v2500_v33  ;;  %v4803_v52 = vpack.c.bf16 %v2852_v23, %v2851_v50  ;;  %v3512_v33 = vld [vmem:[#allocation2 + $0xd0] sm:$0xff]  ;;  %v4899_v38 = vpack.c.bf16 %v3182_v44, %v3181_v1  ;;  %v3184_v50 = vld [vmem:[#allocation2 + $0xdf] sm:$0xff] }
 0x1ee   : > { %3684 = vmatmul.bf16.gmra.mxu3 %v3563_v40  ;;  %2830 = vst [vmem:[%s5787_s12 + $0xf8] sm:$0xff] %v2798_v14  ;;  %v3347_v17 = vpop.f32.mrf.mxu2  ;;  %5038 = vmatmul.msk.bf16.gmra.mxu0 %vm5905_vm11, %v4800_v22  ;;  %vm6436_vm11 = vnez %v6370_v29 }
 0x1ef   : > { %v3427_v62 = vadd.f32 %v3347_v17, %v3097_v58  ;;  %v3565_v17 = vpack.c.bf16 %v3512_v33, %v3511_v18 }
 0x1f0   : > { %v3019_v57 = vpop.f32.mrf.mxu1 }
 0x1f1   : > { %v3645_v32 = vpop.f32.mrf.mxu3  ;;  %v3098_v35 = vadd.f32 %v3019_v57, %v2896_v60  ;;  %v2899_v60 = vld [vmem:[%s5787_s12 + $0x20] sm:$0xff] }
 0x1f2   : > { %v3725_v16 = vadd.f32 %v3645_v32, %v3427_v62  ;;  %v2853_v62 = vld [vmem:[#allocation2 + $0xc9] sm:$0xff]  ;;  %v2854_v32 = vld [vmem:[#allocation2 + $0xd1] sm:$0xff] }
 0x1f3   : > { %v3977_v53 = vpop.f32.mrf.mxu0 }
 0x1f4   : > { %v4055_v11 = vadd.f32 %v3975_v25, %v3725_v16 }
 0x1f6   : > { %4087 = vst [vmem:[%s5787_s12] sm:$0xff] %v4055_v11  ;;  %v3349_v54 = vpop.f32.mrf.mxu2  ;;  %v4189_v6 = vmul.f32 %v4055_v11, %v4055_v11 }
 0x1f7   : > { %v3428_v51 = vadd.f32 %v3349_v54, %v3098_v35 }
 0x1f8   : > { %v3022_v61 = vpop.f32.mrf.mxu1 }
 0x1f9   : > { %v3647_v9 = vpop.f32.mrf.mxu3  ;;  %v3099_v3 = vadd.f32 %v3022_v61, %v2897_v19  ;;  %v2900_v61 = vld [vmem:[%s5787_s12 + $0x28] sm:$0xff]  ;;  %v3513_v19 = vld [vmem:[#allocation2 + $0xd8] sm:$0xff] }
 0x1fa   : > { %v3726_v24 = vadd.f32 %v3647_v9, %v3428_v51 }
 0x1fb   : > { %4801 = vmatmul.msk.bf16.gmra.mxu1 %vm5932_vm5, %v4800_v22  ;;  %4897 = vmatmul.msk.bf16.gmra.mxu2 %vm6436_vm11, %v4896_v49  ;;  %v3980_v56 = vpop.f32.mrf.mxu0 }
 0x1fc   : > { %v4056_v41 = vadd.f32 %v3977_v53, %v3726_v24 }
 0x1fe   : > { %3689 = vmatmul.bf16.gmra.mxu3 %v3564_v45  ;;  %4088 = vst [vmem:[%s5787_s12 + $0x8] sm:$0xff] %v4056_v41  ;;  %v4151_v7 = vadd.f32 %v4056_v41, %v4055_v11  ;;  %v4190_v8 = vmul.f32 %v4056_v41, %v4056_v41  ;;  %v3352_v15 = vpop.f32.mrf.mxu2  ;;  %5041 = vmatmul.msk.bf16.gmra.mxu0 %vm5932_vm5, %v4803_v52  ;;  %vm6437_vm5 = vnez %v6378_v20  ;;  %v3183_v45 = vld [vmem:[#allocation2 + $0xd7] sm:$0xff] }
 0x1ff   : > { %v3429_v4 = vadd.f32 %v3352_v15, %v3099_v3  ;;  %v4806_v11 = vpack.c.bf16 %v2854_v32, %v2853_v62 }
 0x200   : > { %v4221_v5 = vadd.f32 %v4190_v8, %v4189_v6  ;;  %v3024_v29 = vpop.f32.mrf.mxu1 }
 0x201   : > { %v3650_v13 = vpop.f32.mrf.mxu3  ;;  %v3100_v37 = vadd.f32 %v3024_v29, %v2898_v10  ;;  %v2901_v10 = vld [vmem:[%s5787_s12 + $0x30] sm:$0xff] }
 0x202   : > { %v3727_v43 = vadd.f32 %v3650_v13, %v3429_v4  ;;  %v2855_v13 = vld [vmem:[#allocation2 + $0xd9] sm:$0xff] }
 0x203   : > { %v3982_v46 = vpop.f32.mrf.mxu0 }
 0x204   : > { %v4057_v48 = vadd.f32 %v3980_v56, %v3727_v43  ;;  %v3514_v56 = vld [vmem:[#allocation2 + $0xe0] sm:$0xff] }
 0x205   : > { %v3566_v4 = vpack.c.bf16 %v3514_v56, %v3513_v19 }
 0x206   : > { %4089 = vst [vmem:[%s5787_s12 + $0x10] sm:$0xff] %v4057_v48  ;;  %v4152_v40 = vadd.f32 %v4151_v7, %v4057_v48  ;;  %v4191_v63 = vmul.f32 %v4057_v48, %v4057_v48  ;;  %v3354_v14 = vpop.f32.mrf.mxu2  ;;  %v4902_v7 = vpack.c.bf16 %v3184_v50, %v3183_v45 }
 0x207   : > { %v3430_v22 = vadd.f32 %v3354_v14, %v3100_v37 }
 0x208   : > { %v4222_v25 = vadd.f32 %v4221_v5, %v4191_v63  ;;  %v3027_v58 = vpop.f32.mrf.mxu1  ;;  %v2856_v5 = vld [vmem:[#allocation2 + $0xe1] sm:$0xff] }
 0x209   : > { %v3652_v47 = vpop.f32.mrf.mxu3  ;;  %v3101_v31 = vadd.f32 %v3027_v58, %v2899_v60  ;;  %v4809_v48 = vpack.c.bf16 %v2856_v5, %v2855_v13  ;;  %v3517_v13 = vld [vmem:[#allocation2 + $0xf8] sm:$0xff]  ;;  %v3518_v5 = vld [vmem:[#allocation2 + $0x100] sm:$0xff] }
 0x20a   : > { %v3728_v57 = vadd.f32 %v3652_v47, %v3430_v22  ;;  %v3185_v47 = vld [vmem:[#allocation2 + $0xe7] sm:$0xff] }
 0x20b   : > { %4804 = vmatmul.msk.bf16.gmra.mxu1 %vm5951_vm13, %v4803_v52  ;;  %4900 = vmatmul.msk.bf16.gmra.mxu2 %vm6437_vm5, %v4899_v38  ;;  %v3985_v30 = vpop.f32.mrf.mxu0  ;;  %v2902_v38 = vld [vmem:[%s5787_s12 + $0x38] sm:$0xff] }
 0x20c   : > { %v4058_v16 = vadd.f32 %v3982_v46, %v3728_v57  ;;  %v3515_v57 = vld [vmem:[#allocation2 + $0xe8] sm:$0xff] }
 0x20e   : > { %3694 = vmatmul.bf16.gmra.mxu3 %v3565_v17  ;;  %4090 = vst [vmem:[%s5787_s12 + $0x18] sm:$0xff] %v4058_v16  ;;  %v4153_v53 = vadd.f32 %v4152_v40, %v4058_v16  ;;  %v4192_v35 = vmul.f32 %v4058_v16, %v4058_v16  ;;  %v3357_v59 = vpop.f32.mrf.mxu2  ;;  %5044 = vmatmul.msk.bf16.gmra.mxu0 %vm5951_vm13, %v4806_v11  ;;  %vm6438_vm13 = vnez %v6386_v12  ;;  %v3516_v16 = vld [vmem:[#allocation2 + $0xf0] sm:$0xff] }
 0x20f   : > { %v3431_v27 = vadd.f32 %v3357_v59, %v3101_v31  ;;  %v2857_v59 = vld [vmem:[#allocation2 + $0xe9] sm:$0xff] }
 0x210   : > { %v4223_v51 = vadd.f32 %v4222_v25, %v4192_v35  ;;  %v3029_v20 = vpop.f32.mrf.mxu1  ;;  %v3186_v25 = vld [vmem:[#allocation2 + $0xef] sm:$0xff]  ;;  %v3567_v35 = vpack.c.bf16 %v3516_v16, %v3515_v57  ;;  %v2906_v57 = vld [vmem:[%s5787_s12 + $0x58] sm:$0xff]  ;;  %v3189_v16 = vld [vmem:[#allocation2 + $0x107] sm:$0xff] }
 0x211   : > { %v3655_v54 = vpop.f32.mrf.mxu3  ;;  %v3102_v24 = vadd.f32 %v3029_v20, %v2900_v61 }
 0x212   : > { %v3729_v49 = vadd.f32 %v3655_v54, %v3431_v27  ;;  %v2858_v27 = vld [vmem:[#allocation2 + $0xf1] sm:$0xff] }
 0x213   : > { %v3987_v23 = vpop.f32.mrf.mxu0  ;;  %v4812_v20 = vpack.c.bf16 %v2858_v27, %v2857_v59 }
 0x214   : > { %v4059_v9 = vadd.f32 %v3985_v30, %v3729_v49  ;;  %v4905_v30 = vpack.c.bf16 %v3186_v25, %v3185_v47  ;;  %v2903_v49 = vld [vmem:[%s5787_s12 + $0x40] sm:$0xff] }
 0x216   : > { %4091 = vst [vmem:[%s5787_s12 + $0x20] sm:$0xff] %v4059_v9  ;;  %v4154_v41 = vadd.f32 %v4153_v53, %v4059_v9  ;;  %v4193_v52 = vmul.f32 %v4059_v9, %v4059_v9  ;;  %v3359_v3 = vpop.f32.mrf.mxu2 }
 0x217   : > { %v3432_v6 = vadd.f32 %v3359_v3, %v3102_v24  ;;  %v2904_v3 = vld [vmem:[%s5787_s12 + $0x48] sm:$0xff] }
 0x218   : > { %v4224_v8 = vadd.f32 %v4223_v51, %v4193_v52  ;;  %v3032_v15 = vpop.f32.mrf.mxu1 }
 0x219   : > { %v3657_v28 = vpop.f32.mrf.mxu3  ;;  %v3103_v44 = vadd.f32 %v3032_v15, %v2901_v10 }
 0x21a   : > { %v3730_v29 = vadd.f32 %v3657_v28, %v3432_v6  ;;  %v3187_v6 = vld [vmem:[#allocation2 + $0xf7] sm:$0xff] }
 0x21b   : > { %4807 = vmatmul.msk.bf16.gmra.mxu1 %vm5976_vm10, %v4806_v11  ;;  %4903 = vmatmul.msk.bf16.gmra.mxu2 %vm6438_vm13, %v4902_v7  ;;  %v3990_v1 = vpop.f32.mrf.mxu0  ;;  %v3188_v7 = vld [vmem:[#allocation2 + $0xff] sm:$0xff] }
 0x21c   : > { %v4060_v43 = vadd.f32 %v3987_v23, %v3730_v29 }
 0x21e   : > { %3699 = vmatmul.bf16.gmra.mxu3 %v3566_v4  ;;  %4092 = vst [vmem:[%s5787_s12 + $0x28] sm:$0xff] %v4060_v43  ;;  %v4155_v46 = vadd.f32 %v4154_v41, %v4060_v43  ;;  %v4194_v37 = vmul.f32 %v4060_v43, %v4060_v43  ;;  %v3362_v40 = vpop.f32.mrf.mxu2  ;;  %5047 = vmatmul.msk.bf16.gmra.mxu0 %vm5976_vm10, %v4809_v48  ;;  %vm6439_vm10 = vnez %v6416_v21 }
 0x21f   : > { %v3433_v63 = vadd.f32 %v3362_v40, %v3103_v44  ;;  %v3568_v44 = vpack.c.bf16 %v3518_v5, %v3517_v13  ;;  %v3192_v13 = vld [vmem:[#allocation2 + $0x11f] sm:$0xff] }
 0x220   : > { %v4225_v33 = vadd.f32 %v4224_v8, %v4194_v37  ;;  %v3034_v12 = vpop.f32.mrf.mxu1  ;;  %v2860_v37 = vld [vmem:[#allocation2 + $0x101] sm:$0xff] }
 0x221   : > { %v3660_v18 = vpop.f32.mrf.mxu3  ;;  %v3104_v17 = vadd.f32 %v3034_v12, %v2902_v38 }
 0x222   : > { %v3731_v14 = vadd.f32 %v3660_v18, %v3433_v63 }
 0x223   : > { %v3992_v58 = vpop.f32.mrf.mxu0 }
 0x224   : > { %v4061_v22 = vadd.f32 %v3990_v1, %v3731_v14 }
 0x226   : > { %4093 = vst [vmem:[%s5787_s12 + $0x30] sm:$0xff] %v4061_v22  ;;  %v4156_v62 = vadd.f32 %v4155_v46, %v4061_v22  ;;  %v4195_v32 = vmul.f32 %v4061_v22, %v4061_v22  ;;  %v3364_v11 = vpop.f32.mrf.mxu2  ;;  %v2859_v46 = vld [vmem:[#allocation2 + $0xf9] sm:$0xff] }
 0x227   : > { %v3434_v60 = vadd.f32 %v3364_v11, %v3104_v17  ;;  %v4815_v18 = vpack.c.bf16 %v2860_v37, %v2859_v46  ;;  %v3190_v11 = vld [vmem:[#allocation2 + $0x10f] sm:$0xff]  ;;  %v5173_v37 = vld [vmem:[#allocation2] sm:$0xff] }
 0x228   : > { %v4226_v31 = vadd.f32 %v4225_v33, %v4195_v32  ;;  %v3037_v53 = vpop.f32.mrf.mxu1  ;;  %v2905_v33 = vld [vmem:[%s5787_s12 + $0x50] sm:$0xff] }
 0x229   : > { %v3662_v34 = vpop.f32.mrf.mxu3  ;;  %v3105_v61 = vadd.f32 %v3037_v53, %v2903_v49  ;;  %v3519_v53 = vld [vmem:[#allocation2 + $0x108] sm:$0xff] }
 0x22a   : > { %v3732_v54 = vadd.f32 %v3662_v34, %v3434_v60 }
 0x22b   : > { %4810 = vmatmul.msk.bf16.gmra.mxu1 %vm6439_vm10, %v4809_v48  ;;  %4906 = vmatmul.msk.bf16.gmra.mxu2 %vm6440_vm9, %v4905_v30  ;;  %v3995_v9 = vpop.f32.mrf.mxu0  ;;  %v4908_v48 = vpack.c.bf16 %v3188_v7, %v3187_v6 }
 0x22c   : > { %v4062_v51 = vadd.f32 %v3992_v58, %v3732_v54  ;;  %v4911_v54 = vpack.c.bf16 %v3190_v11, %v3189_v16  ;;  %v2910_v11 = vld [vmem:[%s5787_s12 + $0x78] sm:$0xff] }
 0x22e   : > { %3704 = vmatmul.bf16.gmra.mxu3 %v3567_v35  ;;  %4094 = vst [vmem:[%s5787_s12 + $0x38] sm:$0xff] %v4062_v51  ;;  %v4157_v45 = vadd.f32 %v4156_v62, %v4062_v51  ;;  %v4196_v50 = vmul.f32 %v4062_v51, %v4062_v51  ;;  %v3367_v23 = vpop.f32.mrf.mxu2  ;;  %5050 = vmatmul.msk.bf16.gmra.mxu0 %vm6439_vm10, %v4812_v20  ;;  %v3520_v35 = vld [vmem:[#allocation2 + $0x110] sm:$0xff] }
 0x22f   : > { %v3435_v24 = vadd.f32 %v3367_v23, %v3105_v61  ;;  %v3569_v49 = vpack.c.bf16 %v3520_v35, %v3519_v53  ;;  %v2862_v61 = vld [vmem:[#allocation2 + $0x111] sm:$0xff] }
 0x230   : > { %v4227_v52 = vadd.f32 %v4226_v31, %v4196_v50  ;;  %v3039_v2 = vpop.f32.mrf.mxu1 }
 0x231   : > { %v3665_v41 = vpop.f32.mrf.mxu3  ;;  %v3106_v8 = vadd.f32 %v3039_v2, %v2904_v3 }
 0x232   : > { %v3733_v19 = vadd.f32 %v3665_v41, %v3435_v24  ;;  %v2907_v24 = vld [vmem:[%s5787_s12 + $0x60] sm:$0xff] }
 0x233   : > { %v3997_v28 = vpop.f32.mrf.mxu0 }
 0x234   : > { %v4063_v56 = vadd.f32 %v3995_v9, %v3733_v19  ;;  %v2861_v9 = vld [vmem:[#allocation2 + $0x109] sm:$0xff] }
 0x235   : > { %v4818_v23 = vpack.c.bf16 %v2862_v61, %v2861_v9 }
 0x236   : > { %4095 = vst [vmem:[%s5787_s12 + $0x40] sm:$0xff] %v4063_v56  ;;  %v4158_v15 = vadd.f32 %v4157_v45, %v4063_v56  ;;  %v4197_v4 = vmul.f32 %v4063_v56, %v4063_v56  ;;  %v3369_v29 = vpop.f32.mrf.mxu2 }
 0x237   : > { %v3436_v43 = vadd.f32 %v3369_v29, %v3106_v8 }
 0x238   : > { %v4228_v10 = vadd.f32 %v4227_v52, %v4197_v4  ;;  %v3042_v1 = vpop.f32.mrf.mxu1  ;;  %v3191_v4 = vld [vmem:[#allocation2 + $0x117] sm:$0xff] }
 0x239   : > { %v3667_v21 = vpop.f32.mrf.mxu3  ;;  %v3107_v14 = vadd.f32 %v3042_v1, %v2905_v33  ;;  %v4914_v1 = vpack.c.bf16 %v3192_v13, %v3191_v4 }
 0x23a   : > { %v3734_v40 = vadd.f32 %v3667_v21, %v3436_v43 }
 0x23b   : > { %4813 = vmatmul.msk.bf16.gmra.mxu1 %vm6441_vm15, %v4812_v20  ;;  %4909 = vmatmul.msk.bf16.gmra.mxu2 %vm6442_vm3, %v4908_v48  ;;  %v4000_v12 = vpop.f32.mrf.mxu0 }
 0x23c   : > { %v4064_v63 = vadd.f32 %v3997_v28, %v3734_v40  ;;  %v3570_v40 = vpack.c.bf16 %v5173_v37, %v5173_v37 }
 0x23e   : > { %3709 = vmatmul.bf16.gmra.mxu3 %v3568_v44  ;;  %4096 = vst [vmem:[%s5787_s12 + $0x48] sm:$0xff] %v4064_v63  ;;  %v4159_v22 = vadd.f32 %v4158_v15, %v4064_v63  ;;  %v4198_v38 = vmul.f32 %v4064_v63, %v4064_v63  ;;  %v3372_v47 = vpop.f32.mrf.mxu2  ;;  %5053 = vmatmul.msk.bf16.gmra.mxu0 %vm6441_vm15, %v4815_v18  ;;  %v2908_v15 = vld [vmem:[%s5787_s12 + $0x68] sm:$0xff]  ;;  %v3819_v63 = vld [vmem:[#allocation2 + $0x119] sm:$0xff] }
 0x23f   : > { %v3437_v25 = vadd.f32 %v3372_v47, %v3107_v14 }
 0x240   : > { %v4229_v17 = vadd.f32 %v4228_v10, %v4198_v38  ;;  %v3044_v36 = vpop.f32.mrf.mxu1 }
 0x241   : > { %v3670_v58 = vpop.f32.mrf.mxu3  ;;  %v3108_v30 = vadd.f32 %v3044_v36, %v2906_v57 }
 0x242   : > { %v3735_v62 = vadd.f32 %v3670_v58, %v3437_v25 }
 0x243   : > { %v4002_v60 = vpop.f32.mrf.mxu0 }
 0x244   : > { %v4065_v32 = vadd.f32 %v4000_v12, %v3735_v62 }
 0x246   : > { %4097 = vst [vmem:[%s5787_s12 + $0x50] sm:$0xff] %v4065_v32  ;;  %v4160_v34 = vadd.f32 %v4159_v22, %v4065_v32  ;;  %v4199_v31 = vmul.f32 %v4065_v32, %v4065_v32  ;;  %v3374_v59 = vpop.f32.mrf.mxu2  ;;  %v2909_v22 = vld [vmem:[%s5787_s12 + $0x70] sm:$0xff] }
 0x247   : > { %v3438_v27 = vadd.f32 %v3374_v59, %v3108_v30 }
 0x248   : > { %v4230_v51 = vadd.f32 %v4229_v17, %v4199_v31  ;;  %v3047_v20 = vpop.f32.mrf.mxu1 }
 0x249   : > { %v3672_v0 = vpop.f32.mrf.mxu3  ;;  %v3109_v52 = vadd.f32 %v3047_v20, %v2907_v24 }
 0x24a   : > { %v3736_v45 = vadd.f32 %v3672_v0, %v3438_v27 }
 0x24b   : > { %4816 = vmatmul.msk.bf16.gmra.mxu1 %vm6443_vm0, %v4815_v18  ;;  %4912 = vmatmul.msk.bf16.gmra.mxu2 %vm6444_vm2, %v4911_v54  ;;  %v4005_v41 = vpop.f32.mrf.mxu0  ;;  %v3820_v18 = vld [vmem:[#allocation2 + $0x121] sm:$0xff] }
 0x24c   : > { %v4066_v50 = vadd.f32 %v4002_v60, %v3736_v45  ;;  %v5058_v14 = vpack.c.bf16 %v3820_v18, %v3819_v63  ;;  %v2914_v18 = vld [vmem:[%s5787_s12 + $0x98] sm:$0xff] }
 0x24e   : > { %3714 = vmatmul.bf16.gmra.mxu3 %v3569_v49  ;;  %4098 = vst [vmem:[%s5787_s12 + $0x58] sm:$0xff] %v4066_v50  ;;  %v4161_v2 = vadd.f32 %v4160_v34, %v4066_v50  ;;  %v4200_v19 = vmul.f32 %v4066_v50, %v4066_v50  ;;  %v3377_v56 = vpop.f32.mrf.mxu2  ;;  %5056 = vmatmul.msk.bf16.gmra.mxu0 %vm6443_vm0, %v4818_v23 }
 0x24f   : > { %v3439_v3 = vadd.f32 %v3377_v56, %v3109_v52 }
 0x250   : > { %v4231_v7 = vadd.f32 %v4230_v51, %v4200_v19  ;;  %v3049_v39 = vpop.f32.mrf.mxu1  ;;  %v2911_v51 = vld [vmem:[%s5787_s12 + $0x80] sm:$0xff]  ;;  %v2912_v19 = vld [vmem:[%s5787_s12 + $0x88] sm:$0xff] }
 0x251   : > { %v3675_v6 = vpop.f32.mrf.mxu3  ;;  %v3110_v29 = vadd.f32 %v3049_v39, %v2908_v15 }
 0x252   : > { %v3737_v28 = vadd.f32 %v3675_v6, %v3439_v3 }
 0x253   : > { %v4007_v5 = vpop.f32.mrf.mxu0 }
 0x254   : > { %v4067_v8 = vadd.f32 %v4005_v41, %v3737_v28 }
 0x256   : > { %4099 = vst [vmem:[%s5787_s12 + $0x60] sm:$0xff] %v4067_v8  ;;  %v4162_v43 = vadd.f32 %v4161_v2, %v4067_v8  ;;  %v4201_v48 = vmul.f32 %v4067_v8, %v4067_v8  ;;  %v3379_v21 = vpop.f32.mrf.mxu2 }
 0x257   : > { %v3440_v10 = vadd.f32 %v3379_v21, %v3110_v29  ;;  %v2913_v29 = vld [vmem:[%s5787_s12 + $0x90] sm:$0xff] }
 0x258   : > { %v4232_v46 = vadd.f32 %v4231_v7, %v4201_v48  ;;  %v3052_v55 = vpop.f32.mrf.mxu1 }
 0x259   : > { %v3677_v44 = vpop.f32.mrf.mxu3  ;;  %v3111_v47 = vadd.f32 %v3052_v55, %v2909_v22 }
 0x25a   : > { %v3738_v33 = vadd.f32 %v3677_v44, %v3440_v10 }
 0x25b   : > { %4819 = vmatmul.msk.bf16.gmra.mxu1 %vm6076_vm14, %v4818_v23  ;;  %4915 = vmatmul.msk.bf16.gmra.mxu2 %vm5668_vm6, %v4914_v1  ;;  %v4010_v38 = vpop.f32.mrf.mxu0 }
 0x25c   : > { %v4068_v12 = vadd.f32 %v4007_v5, %v3738_v33 }
 0x25e   : > { %3719 = vmatmul.bf16.gmra.mxu3 %v3570_v40  ;;  %4100 = vst [vmem:[%s5787_s12 + $0x68] sm:$0xff] %v4068_v12  ;;  %v4163_v25 = vadd.f32 %v4162_v43, %v4068_v12  ;;  %v4202_v58 = vmul.f32 %v4068_v12, %v4068_v12  ;;  %v3382_v17 = vpop.f32.mrf.mxu2  ;;  %5059 = vmatmul.msk.bf16.gmra.mxu0 %vm6076_vm14, %v5058_v14 }
 0x25f   : > { %v3441_v36 = vadd.f32 %v3382_v17, %v3111_v47 }
 0x260   : > { %v4233_v32 = vadd.f32 %v4232_v46, %v4202_v58  ;;  %v3054_v26 = vpop.f32.mrf.mxu1 }
 0x261   : > { %v3680_v62 = vpop.f32.mrf.mxu3  ;;  %v3112_v30 = vadd.f32 %v3054_v26, %v2910_v11 }
 0x262   : > { %v3739_v57 = vadd.f32 %v3680_v62, %v3441_v36 }
 0x263   : > { %v4012_v60 = vpop.f32.mrf.mxu0 }
 0x264   : > { %v4069_v16 = vadd.f32 %v4010_v38, %v3739_v57 }
 0x266   : > { %4101 = vst [vmem:[%s5787_s12 + $0x70] sm:$0xff] %v4069_v16  ;;  %v4164_v34 = vadd.f32 %v4163_v25, %v4069_v16  ;;  %v4203_v31 = vmul.f32 %v4069_v16, %v4069_v16  ;;  %v3384_v53 = vpop.f32.mrf.mxu2 }
 0x267   : > { %v3442_v35 = vadd.f32 %v3384_v53, %v3112_v30 }
 0x268   : > { %v4234_v27 = vadd.f32 %v4233_v32, %v4203_v31  ;;  %v3057_v54 = vpop.f32.mrf.mxu1  ;;  %v2915_v32 = vld [vmem:[%s5787_s12 + $0xa0] sm:$0xff] }
 0x269   : > { %v3682_v59 = vpop.f32.mrf.mxu3  ;;  %v3113_v49 = vadd.f32 %v3057_v54, %v2911_v51 }
 0x26a   : > { %v3740_v0 = vadd.f32 %v3682_v59, %v3442_v35 }
 0x26b   : > { %v4015_v20 = vpop.f32.mrf.mxu0 }
 0x26c   : > { %v4070_v42 = vadd.f32 %v4012_v60, %v3740_v0 }
 0x26e   : > { %4102 = vst [vmem:[%s5787_s12 + $0x78] sm:$0xff] %v4070_v42  ;;  %v4165_v9 = vadd.f32 %v4164_v34, %v4070_v42  ;;  %v4204_v61 = vmul.f32 %v4070_v42, %v4070_v42  ;;  %v3387_v45 = vpop.f32.mrf.mxu2 }
 0x26f   : > { %v3443_v50 = vadd.f32 %v3387_v45, %v3113_v49 }
 0x270   : > { %v4235_v24 = vadd.f32 %v4234_v27, %v4204_v61  ;;  %v3059_v41 = vpop.f32.mrf.mxu1  ;;  %v2916_v27 = vld [vmem:[%s5787_s12 + $0xa8] sm:$0xff] }
 0x271   : > { %v3685_v23 = vpop.f32.mrf.mxu3  ;;  %v3114_v3 = vadd.f32 %v3059_v41, %v2912_v19 }
 0x272   : > { %v3741_v52 = vadd.f32 %v3685_v23, %v3443_v50 }
 0x273   : > { %v4017_v56 = vpop.f32.mrf.mxu0 }
 0x274   : > { %v4071_v2 = vadd.f32 %v4015_v20, %v3741_v52 }
 0x276   : > { %4103 = vst [vmem:[%s5787_s12 + $0x80] sm:$0xff] %v4071_v2  ;;  %v4166_v6 = vadd.f32 %v4165_v9, %v4071_v2  ;;  %v4205_v7 = vmul.f32 %v4071_v2, %v4071_v2  ;;  %v3389_v39 = vpop.f32.mrf.mxu2 }
 0x277   : > { %v3444_v28 = vadd.f32 %v3389_v39, %v3114_v3  ;;  %v2918_v39 = vld [vmem:[%s5787_s12 + $0xb8] sm:$0xff] }
 0x278   : > { %v4236_v15 = vadd.f32 %v4235_v24, %v4205_v7  ;;  %v3062_v4 = vpop.f32.mrf.mxu1  ;;  %v2917_v24 = vld [vmem:[%s5787_s12 + $0xb0] sm:$0xff] }
 0x279   : > { %v3687_v8 = vpop.f32.mrf.mxu3  ;;  %v3115_v48 = vadd.f32 %v3062_v4, %v2913_v29 }
 0x27a   : > { %v3742_v13 = vadd.f32 %v3687_v8, %v3444_v28 }
 0x27b   : > { %v4020_v43 = vpop.f32.mrf.mxu0 }
 0x27c   : > { %v4072_v5 = vadd.f32 %v4017_v56, %v3742_v13 }
 0x27e   : > { %4104 = vst [vmem:[%s5787_s12 + $0x88] sm:$0xff] %v4072_v5  ;;  %v4167_v21 = vadd.f32 %v4166_v6, %v4072_v5  ;;  %v4206_v10 = vmul.f32 %v4072_v5, %v4072_v5  ;;  %v3392_v1 = vpop.f32.mrf.mxu2 }
 0x27f   : > { %v3445_v44 = vadd.f32 %v3392_v1, %v3115_v48  ;;  %v2919_v48 = vld [vmem:[%s5787_s12 + $0xc0] sm:$0xff] }
 0x280   : > { %v4237_v55 = vadd.f32 %v4236_v15, %v4206_v10  ;;  %v3064_v37 = vpop.f32.mrf.mxu1 }
 0x281   : > { %v3690_v46 = vpop.f32.mrf.mxu3  ;;  %v3116_v12 = vadd.f32 %v3064_v37, %v2914_v18 }
 0x282   : > { %v3743_v40 = vadd.f32 %v3690_v46, %v3445_v44 }
 0x283   : > { %v4022_v33 = vpop.f32.mrf.mxu0 }
 0x284   : > { %v4073_v63 = vadd.f32 %v4020_v43, %v3743_v40 }
 0x286   : > { %4105 = vst [vmem:[%s5787_s12 + $0x90] sm:$0xff] %v4073_v63  ;;  %v4168_v14 = vadd.f32 %v4167_v21, %v4073_v63  ;;  %v4207_v22 = vmul.f32 %v4073_v63, %v4073_v63  ;;  %v3394_v38 = vpop.f32.mrf.mxu2  ;;  %v2920_v63 = vld [vmem:[%s5787_s12 + $0xc8] sm:$0xff] }
 0x287   : > { %v3446_v47 = vadd.f32 %v3394_v38, %v3116_v12 }
 0x288   : > { %v4238_v58 = vadd.f32 %v4237_v55, %v4207_v22  ;;  %v3067_v17 = vpop.f32.mrf.mxu1 }
 0x289   : > { %v3692_v25 = vpop.f32.mrf.mxu3  ;;  %v3117_v57 = vadd.f32 %v3067_v17, %v2915_v32 }
 0x28a   : > { %v3744_v36 = vadd.f32 %v3692_v25, %v3446_v47 }
 0x28b   : > { %v4025_v26 = vpop.f32.mrf.mxu0 }
 0x28c   : > { %v4074_v62 = vadd.f32 %v4022_v33, %v3744_v36 }
 0x28e   : > { %4106 = vst [vmem:[%s5787_s12 + $0x98] sm:$0xff] %v4074_v62  ;;  %v4169_v16 = vadd.f32 %v4168_v14, %v4074_v62  ;;  %v4208_v11 = vmul.f32 %v4074_v62, %v4074_v62  ;;  %v3397_v60 = vpop.f32.mrf.mxu2 }
 0x28f   : > { %v3447_v30 = vadd.f32 %v3397_v60, %v3117_v57  ;;  %v2922_v60 = vld [vmem:[%s5787_s12 + $0xd8] sm:$0xff] }
 0x290   : > { %v4239_v31 = vadd.f32 %v4238_v58, %v4208_v11  ;;  %v3069_v53 = vpop.f32.mrf.mxu1  ;;  %v2921_v58 = vld [vmem:[%s5787_s12 + $0xd0] sm:$0xff] }
 0x291   : > { %v3695_v34 = vpop.f32.mrf.mxu3  ;;  %v3118_v0 = vadd.f32 %v3069_v53, %v2916_v27 }
 0x292   : > { %v3745_v35 = vadd.f32 %v3695_v34, %v3447_v30 }
 0x293   : > { %v4027_v54 = vpop.f32.mrf.mxu0 }
 0x294   : > { %v4075_v59 = vadd.f32 %v4025_v26, %v3745_v35 }
 0x296   : > { %4107 = vst [vmem:[%s5787_s12 + $0xa0] sm:$0xff] %v4075_v59  ;;  %v6266_v42 = vadd.f32 %v4169_v16, %v4075_v59  ;;  %v4209_v51 = vmul.f32 %v4075_v59, %v4075_v59  ;;  %v3399_v20 = vpop.f32.mrf.mxu2 }
 0x297   : > { %v3448_v49 = vadd.f32 %v3399_v20, %v3118_v0  ;;  %v2923_v0 = vld [vmem:[%s5787_s12 + $0xe0] sm:$0xff] }
 0x298   : > { %v6268_v61 = vadd.f32 %v4239_v31, %v4209_v51  ;;  %v3072_v45 = vpop.f32.mrf.mxu1 }
 0x299   : > { %v3697_v9 = vpop.f32.mrf.mxu3  ;;  %v3119_v52 = vadd.f32 %v3072_v45, %v2917_v24 }
 0x29a   : > { %v3746_v50 = vadd.f32 %v3697_v9, %v3448_v49 }
 0x29b   : > { %v4030_v41 = vpop.f32.mrf.mxu0 }
 0x29c   : > { %v6270_v23 = vadd.f32 %v4027_v54, %v3746_v50 }
 0x29e   : > { %4108 = vst [vmem:[%s5787_s12 + $0xa8] sm:$0xff] %v6270_v23  ;;  %v3402_v2 = vpop.f32.mrf.mxu2 }
 0x29f   : > { %v3449_v19 = vadd.f32 %v3402_v2, %v3119_v52  ;;  %v2924_v52 = vld [vmem:[%s5787_s12 + $0xe8] sm:$0xff] }
 0x2a0   : > { %v3074_v3 = vpop.f32.mrf.mxu1 }
 0x2a1   : > { %v3700_v56 = vpop.f32.mrf.mxu3  ;;  %v3120_v8 = vadd.f32 %v3074_v3, %v2918_v39  ;;  %v4210_v3 = vmul.f32 %v6270_v23, %v6270_v23 }
 0x2a2   : > { %v3747_v6 = vadd.f32 %v3700_v56, %v3449_v19 }
 0x2a3   : > { %v4032_v28 = vpop.f32.mrf.mxu0 }
 0x2a4   : > { %v6275_v7 = vadd.f32 %v4030_v41, %v3747_v6 }
 0x2a6   : > { %4109 = vst [vmem:[%s5787_s12 + $0xb0] sm:$0xff] %v6275_v7  ;;  %v3404_v15 = vpop.f32.mrf.mxu2 }
 0x2a7   : > { %v3450_v4 = vadd.f32 %v3404_v15, %v3120_v8  ;;  %v4171_v8 = vadd.f32 %v6266_v42, %v6270_v23  ;;  %v4211_v15 = vmul.f32 %v6275_v7, %v6275_v7 }
 0x2a8   : > { %v3077_v5 = vpop.f32.mrf.mxu1 }
 0x2a9   : > { %v3702_v13 = vpop.f32.mrf.mxu3  ;;  %v3121_v10 = vadd.f32 %v3077_v5, %v2919_v48  ;;  %v4172_v5 = vadd.f32 %v4171_v8, %v6275_v7 }
 0x2aa   : > { %v3748_v29 = vadd.f32 %v3702_v13, %v3450_v4  ;;  %v4241_v13 = vadd.f32 %v6268_v61, %v4210_v3 }
 0x2ab   : > { %v4035_v21 = vpop.f32.mrf.mxu0 }
 0x2ac   : > { %v6280_v43 = vadd.f32 %v4032_v28, %v3748_v29 }
 0x2ae   : > { %4110 = vst [vmem:[%s5787_s12 + $0xb8] sm:$0xff] %v6280_v43  ;;  %v3407_v1 = vpop.f32.mrf.mxu2  ;;  %v4212_v29 = vmul.f32 %v6280_v43, %v6280_v43 }
 0x2af   : > { %v3451_v44 = vadd.f32 %v3407_v1, %v3121_v10  ;;  %v4242_v10 = vadd.f32 %v4241_v13, %v4211_v15  ;;  %v4173_v1 = vadd.f32 %v4172_v5, %v6280_v43 }
 0x2b0   : > { %v3079_v55 = vpop.f32.mrf.mxu1 }
 0x2b1   : > { %v3705_v46 = vpop.f32.mrf.mxu3  ;;  %v3122_v33 = vadd.f32 %v3079_v55, %v2920_v63 }
 0x2b2   : > { %v3749_v37 = vadd.f32 %v3705_v46, %v3451_v44  ;;  %v4243_v46 = vadd.f32 %v4242_v10, %v4212_v29 }
 0x2b3   : > { %v4037_v18 = vpop.f32.mrf.mxu0 }
 0x2b4   : > { %v6285_v40 = vadd.f32 %v4035_v21, %v3749_v37  ;;  %v2925_v21 = vld [vmem:[%s5787_s12 + $0xf0] sm:$0xff] }
 0x2b6   : > { %4111 = vst [vmem:[%s5787_s12 + $0xc0] sm:$0xff] %v6285_v40  ;;  %v3409_v12 = vpop.f32.mrf.mxu2  ;;  %v4213_v44 = vmul.f32 %v6285_v40, %v6285_v40  ;;  %v4174_v61 = vadd.f32 %v4173_v1, %v6285_v40 }
 0x2b7   : > { %v3452_v14 = vadd.f32 %v3409_v12, %v3122_v33 }
 0x2b8   : > { %v3082_v38 = vpop.f32.mrf.mxu1 }
 0x2b9   : > { %v3707_v22 = vpop.f32.mrf.mxu3  ;;  %v3123_v36 = vadd.f32 %v3082_v38, %v2921_v58 }
 0x2ba   : > { %v3750_v47 = vadd.f32 %v3707_v22, %v3452_v14 }
 0x2bb   : > { %v4040_v17 = vpop.f32.mrf.mxu0 }
 0x2bc   : > { %v4080_v25 = vadd.f32 %v4037_v18, %v3750_v47  ;;  %v4244_v18 = vadd.f32 %v4243_v46, %v4213_v44 }
 0x2be   : > { %4112 = vst [vmem:[%s5787_s12 + $0xc8] sm:$0xff] %v4080_v25  ;;  %v3412_v62 = vpop.f32.mrf.mxu2  ;;  %v4214_v55 = vmul.f32 %v4080_v25, %v4080_v25  ;;  %v4175_v33 = vadd.f32 %v4174_v61, %v4080_v25 }
 0x2bf   : > { %v3453_v32 = vadd.f32 %v3412_v62, %v3123_v36 }
 0x2c0   : > { %v3084_v57 = vpop.f32.mrf.mxu1  ;;  %v4245_v22 = vadd.f32 %v4244_v18, %v4214_v55 }
 0x2c1   : > { %v3710_v26 = vpop.f32.mrf.mxu3  ;;  %v3124_v34 = vadd.f32 %v3084_v57, %v2922_v60 }
 0x2c2   : > { %v3751_v16 = vadd.f32 %v3710_v26, %v3453_v32 }
 0x2c3   : > { %v4042_v30 = vpop.f32.mrf.mxu0 }
 0x2c4   : > { %v4081_v11 = vadd.f32 %v4040_v17, %v3751_v16  ;;  %v2926_v17 = vld [vmem:[%s5787_s12 + $0xf8] sm:$0xff] }
 0x2c6   : > { %4113 = vst [vmem:[%s5787_s12 + $0xd0] sm:$0xff] %v4081_v11  ;;  %v3414_v31 = vpop.f32.mrf.mxu2  ;;  %v4215_v12 = vmul.f32 %v4081_v11, %v4081_v11  ;;  %v4176_v38 = vadd.f32 %v4175_v33, %v4081_v11 }
 0x2c7   : > { %v3454_v53 = vadd.f32 %v3414_v31, %v3124_v34 }
 0x2c8   : > { %v3087_v59 = vpop.f32.mrf.mxu1  ;;  %v4246_v36 = vadd.f32 %v4245_v22, %v4215_v12 }
 0x2c9   : > { %v3712_v35 = vpop.f32.mrf.mxu3  ;;  %v3125_v20 = vadd.f32 %v3087_v59, %v2923_v0 }
 0x2ca   : > { %v3752_v27 = vadd.f32 %v3712_v35, %v3454_v53 }
 0x2cb   : > { %v4045_v51 = vpop.f32.mrf.mxu0 }
 0x2cc   : > { %v4082_v54 = vadd.f32 %v4042_v30, %v3752_v27 }
 0x2ce   : > { %4114 = vst [vmem:[%s5787_s12 + $0xd8] sm:$0xff] %v4082_v54  ;;  %v3417_v49 = vpop.f32.mrf.mxu2  ;;  %v4216_v47 = vmul.f32 %v4082_v54, %v4082_v54  ;;  %v4177_v62 = vadd.f32 %v4176_v38, %v4082_v54 }
 0x2cf   : > { %v3455_v9 = vadd.f32 %v3417_v49, %v3125_v20 }
 0x2d0   : > { %v3089_v50 = vpop.f32.mrf.mxu1  ;;  %v4247_v57 = vadd.f32 %v4246_v36, %v4216_v47 }
 0x2d1   : > { %v3715_v45 = vpop.f32.mrf.mxu3  ;;  %v3126_v2 = vadd.f32 %v3089_v50, %v2924_v52 }
 0x2d2   : > { %v3753_v24 = vadd.f32 %v3715_v45, %v3455_v9 }
 0x2d3   : > { %v4047_v56 = vpop.f32.mrf.mxu0 }
 0x2d4   : > { %v4083_v41 = vadd.f32 %v4045_v51, %v3753_v24 }
 0x2d6   : > { %4115 = vst [vmem:[%s5787_s12 + $0xe0] sm:$0xff] %v4083_v41  ;;  %v3419_v19 = vpop.f32.mrf.mxu2  ;;  %v4217_v32 = vmul.f32 %v4083_v41, %v4083_v41  ;;  %v4178_v16 = vadd.f32 %v4177_v62, %v4083_v41 }
 0x2d7   : > { %v3456_v6 = vadd.f32 %v3419_v19, %v3126_v2 }
 0x2d8   : > { %v3092_v28 = vpop.f32.mrf.mxu1  ;;  %v4248_v34 = vadd.f32 %v4247_v57, %v4217_v32 }
 0x2d9   : > { %v3717_v39 = vpop.f32.mrf.mxu3  ;;  %v3127_v42 = vadd.f32 %v3092_v28, %v2925_v21 }
 0x2da   : > { %v3754_v4 = vadd.f32 %v3717_v39, %v3456_v6 }
 0x2db   : > { %v4050_v63 = vpop.f32.mrf.mxu0 }
 0x2dc   : > { %v4084_v48 = vadd.f32 %v4047_v56, %v3754_v4 }
 0x2de   : > { %4116 = vst [vmem:[%s5787_s12 + $0xe8] sm:$0xff] %v4084_v48  ;;  %v3422_v23 = vpop.f32.mrf.mxu2  ;;  %v4218_v25 = vmul.f32 %v4084_v48, %v4084_v48  ;;  %v4179_v31 = vadd.f32 %v4178_v16, %v4084_v48 }
 0x2df   : > { %v3457_v7 = vadd.f32 %v3422_v23, %v3127_v42 }
 0x2e0   : > { %v3094_v43 = vpop.f32.mrf.mxu1  ;;  %v4249_v59 = vadd.f32 %v4248_v34, %v4218_v25 }
 0x2e1   : > { %v3720_v37 = vpop.f32.mrf.mxu3  ;;  %v3128_v26 = vadd.f32 %v3094_v43, %v2926_v17 }
 0x2e2   : > { %v3755_v14 = vadd.f32 %v3720_v37, %v3457_v7 }
 0x2e3   : > { %v4052_v35 = vpop.f32.mrf.mxu0 }
 0x2e4   : > { %v4085_v58 = vadd.f32 %v4050_v63, %v3755_v14 }
 0x2e6   : > { %4117 = vst [vmem:[%s5787_s12 + $0xf0] sm:$0xff] %v4085_v58  ;;  %v3424_v40 = vpop.f32.mrf.mxu2  ;;  %v4219_v53 = vmul.f32 %v4085_v58, %v4085_v58  ;;  %v4180_v27 = vadd.f32 %v4179_v31, %v4085_v58 }
 0x2e7   : > { %v3458_v60 = vadd.f32 %v3424_v40, %v3128_v26 }
 0x2e8   : > { %v4250_v0 = vadd.f32 %v4249_v59, %v4219_v53 }
 0x2e9   : > { %v3722_v30 = vpop.f32.mrf.mxu3 }
 0x2ea   : > { %v3756_v11 = vadd.f32 %v3722_v30, %v3458_v60 }
 0x2ec   : > { %v4086_v54 = vadd.f32 %v4052_v35, %v3756_v11 }
 0x2ee   : > { %4118 = vst [vmem:[%s5787_s12 + $0xf8] sm:$0xff] %v4086_v54  ;;  %v4181_v51 = vadd.f32 %v4180_v27, %v4086_v54  ;;  %v4220_v20 = vmul.f32 %v4086_v54, %v4086_v54 }
 0x2f0   : > { %v4182_v49 = vrot.slane %v4181_v51, 4  ;;  %v4251_v9 = vadd.f32 %v4250_v0, %v4220_v20 }
 0x2f2   : > { %v4183_v45 = vadd.f32 %v4182_v49, %v4181_v51  ;;  %v4252_v50 = vrot.slane %v4251_v9, 4 }
 0x2f4   : > { %v4184_v24 = vrot.slane %v4183_v45, 2  ;;  %v4253_v41 = vadd.f32 %v4252_v50, %v4251_v9 }
 0x2f6   : > { %v4185_v52 = vadd.f32 %v4184_v24, %v4183_v45  ;;  %v4254_v2 = vrot.slane %v4253_v41, 2 }
 0x2f8   : > { %v4186_v19 = vrot.slane %v4185_v52, 1  ;;  %v4255_v56 = vadd.f32 %v4254_v2, %v4253_v41 }
 0x2fa   : > { %v4187_v3 = vadd.f32 %v4186_v19, %v4185_v52  ;;  %v4256_v6 = vrot.slane %v4255_v56, 1 }
 0x2fc   : > { %4188 = vst [vmem:[%s238_s27] sm:$0x1] %v4187_v3  ;;  %v4257_v39 = vadd.f32 %v4256_v6, %v4255_v56 }
 0x2fe   : > { %4258 = vst [vmem:[%s238_s27 + $0x1] sm:$0x1] %v4257_v39 }
 0x2ff PF: > { %s16_s18 = sadd.s32 1, %s5180_s18  }
 0x300   : > { %p13_p5 = scmp.ge.s32.totalorder %s16_s18, 4  }
 0x302   :  { %15 = sbr.rel (!%p13_p5) target bundleno = 1 (0x1), region = 86 }

</bundles_post_ra>
